<compile_context>
chip_gen: v7x
topology: tpu7x:2x2x1
jax: 0.10.0
libtpu: 0.0.40
codegen_flags: <defaults>
</compile_context>

<pallas_src>
import jax
import jax.numpy as jnp
from jax import lax
from jax.experimental import pallas as pl
from jax.experimental.pallas import tpu as pltpu


def _round_up(a, b):
    return (a + b - 1) // b * b


def _vmem_limit_bytes():
    # v5e/v6e have 128 MiB VMEM, v7x has 64 MiB; use ~3/4 of capacity, capped,
    # with a conservative fallback that is valid on every generation.
    try:
        cap = getattr(pltpu.get_tpu_info(), "vmem_capacity_bytes", None)
        if cap:
            return int(min(cap * 3 // 4, 100 * 1024 * 1024))
    except Exception:
        pass
    return 48 * 1024 * 1024


VMEM_LIMIT = _vmem_limit_bytes()


# --------------------------------------------------------------------------
# Kernel 1: both autoencoders + (batched) discriminator, tiled over node rows.
# --------------------------------------------------------------------------
def _ae_disc_kernel(
    x_ref, c_ref,
    wse1, bse1, wse2, bse2,
    wsd1, bsd1, wsd2, bsd2,
    wae1, bae1, wae2, bae2,
    wad1, bad1, wad2, bad2,
    wd1, bd1, wd2r, bd2,
    h_s_ref, h_s_bf_ref, x_hat_ref, h_a_ref, h_a_bf_ref, c_hat_ref,
    dis_a_ref, dis_s_ref,
):
    bf16 = jnp.bfloat16

    def lin(h, w_ref, b_ref):
        return jnp.dot(h, w_ref[...], preferred_element_type=jnp.float32) + b_ref[...]

    def relu(t):
        return jnp.maximum(t, 0.0)

    def mlp2(inp, w1, b1, w2, b2):
        # linear_in -> ReLU -> (dropout = identity) -> linear_out -> ReLU
        h = relu(lin(inp, w1, b1))
        return relu(lin(h.astype(bf16), w2, b2))

    x = x_ref[...]                                            # (TR, Nc) bf16
    c = c_ref[...]                                            # (TR, Fp) bf16

    h_s = mlp2(x, wse1, bse1, wse2, bse2)                     # struct encoder (f32)
    x_hat = mlp2(h_s.astype(bf16), wsd1, bsd1, wsd2, bsd2)    # struct decoder
    h_a = mlp2(c, wae1, bae1, wae2, bae2)                     # attr encoder
    c_hat = mlp2(h_a.astype(bf16), wad1, bad1, wad2, bad2)    # attr decoder

    # Discriminator, batched over [h_a; h_s]: one MXU matmul (Hp -> HALFp), then
    # the (HALFp -> 1) layer on the VPU (multiply by weight row, lane reduce).
    tr = h_a.shape[0]
    h_both = jnp.concatenate([h_a.astype(bf16), h_s.astype(bf16)], axis=0)  # (2TR, Hp)
    t = relu(lin(h_both, wd1, bd1))                           # (2TR, HALFp) f32
    s = jnp.sum(t * wd2r[...], axis=-1, keepdims=True) + bd2[...]
    dis = jnp.tanh(s)                                         # (2TR, 1)

    h_s_ref[...] = h_s
    h_s_bf_ref[...] = h_s.astype(bf16)                        # feeds kernel 2 directly
    x_hat_ref[...] = x_hat.astype(x_hat_ref.dtype)            # bf16: halves N^2 writeback
    h_a_ref[...] = h_a
    h_a_bf_ref[...] = h_a.astype(bf16)
    c_hat_ref[...] = c_hat.astype(c_hat_ref.dtype)            # bf16
    # lane-dense stores (value broadcast over 128 lanes; wrapper slices lane 0)
    dis_a_ref[...] = jnp.broadcast_to(dis[:tr], dis_a_ref.shape)
    dis_s_ref[...] = jnp.broadcast_to(dis[tr:], dis_s_ref.shape)


# --------------------------------------------------------------------------
# Kernel 2: homophily mean over in-edges of ||h_u - h_v||, blocked pairwise.
#   grid = (v_tiles, u_tiles); u is the trailing reduction axis (accumulated
#   in VMEM scratch, init at u==0, finalize at u==last).
#   adjt[v, u] = adj[u, v] (int8); h_s/h_a are VMEM-resident (full arrays) and
#   the (TV, Hp)/(TU, Hp) tiles are sliced in-kernel.
# --------------------------------------------------------------------------
def _homophily_kernel(
    adjt_ref, hs_ref, ha_ref, sqsu_ref, sqau_ref,
    str_ref, attr_ref,
    num_s, num_a, indeg, sqsv, sqav,
):
    v = pl.program_id(0)
    u = pl.program_id(1)
    nu = pl.num_programs(1)
    tv, tu = adjt_ref.shape
    v0 = pl.multiple_of(v * tv, tv)
    u0 = pl.multiple_of(u * tu, tu)

    hsv = hs_ref[pl.ds(v0, tv), :]                            # (TV, Hp) bf16
    hav = ha_ref[pl.ds(v0, tv), :]

    @pl.when(u == 0)
    def _():
        num_s[...] = jnp.zeros_like(num_s)
        num_a[...] = jnp.zeros_like(num_a)
        indeg[...] = jnp.zeros_like(indeg)
        hs32 = hsv.astype(jnp.float32)
        ha32 = hav.astype(jnp.float32)
        sqsv[...] = jnp.sum(hs32 * hs32, axis=-1, keepdims=True)   # hoisted ||h_v||^2
        sqav[...] = jnp.sum(ha32 * ha32, axis=-1, keepdims=True)

    adjt = adjt_ref[...].astype(jnp.float32)                  # (TV, TU), 0/1 from int8

    def partial_sum(hv, h_ref, squ_ref, sqv_ref):
        hu = h_ref[pl.ds(u0, tu), :]                          # (TU, Hp) bf16, resident
        gram = lax.dot_general(                               # contraction over last dims
            hv, hu, dimension_numbers=(((1,), (1,)), ((), ())),
            preferred_element_type=jnp.float32)               # (TV, TU) f32
        d2 = jnp.maximum(sqv_ref[...] + squ_ref[...] - 2.0 * gram, 0.0)
        d = jnp.sqrt(d2)
        return jnp.sum(adjt * d, axis=-1, keepdims=True)      # (TV, 1)

    num_s[...] += partial_sum(hsv, hs_ref, sqsu_ref, sqsv)
    num_a[...] += partial_sum(hav, ha_ref, sqau_ref, sqav)
    indeg[...] += jnp.sum(adjt, axis=-1, keepdims=True)       # shared by both terms

    @pl.when(u == nu - 1)
    def _():
        deg = indeg[...]
        safe = jnp.maximum(deg, 1.0)
        str_ref[...] = jnp.broadcast_to(
            jnp.where(deg > 0.0, num_s[...] / safe, 0.0), str_ref.shape)
        attr_ref[...] = jnp.broadcast_to(
            jnp.where(deg > 0.0, num_a[...] / safe, 0.0), attr_ref.shape)


# --------------------------------------------------------------------------
# Wrapper
# --------------------------------------------------------------------------
@jax.jit
def adone_forward(x, c, adj, params):
    N = x.shape[0]
    F = c.shape[1]
    H = params["wse1"].shape[1]
    half = params["wd1"].shape[1]

    bf16 = jnp.bfloat16
    f32 = jnp.float32
    i8 = jnp.int8

    # ---- padded / tiled sizes ----
    Np = _round_up(N, 128)           # padded node count (rows & adjacency lanes)
    Nc = _round_up(N, 128)           # structural-feature columns (lane axis)
    Fp = _round_up(F, 128)
    Hp = _round_up(H, 128)
    HALFp = _round_up(half, 128)

    # kernel-2 reduction (u) tile: as wide as divisibility allows, up to 512.
    if Np % 512 == 0:
        TU = 512
    elif Np % 256 == 0:
        TU = 256
    else:
        TU = 128

    # row tile (kernel-1 rows, kernel-2 v rows); keep >= 2 tiles so the
    # 'parallel' grid axis splits across both TensorCores on v7x megacore.
    if Np > 256:
        tile_n = 256 if Np % 256 == 0 else 128
    else:
        tile_n = max(64, Np // 2)
    n_tiles = Np // tile_n
    n_utiles = Np // TU
    # TODO(synk): for very large N on v7x (Nc >= ~8192) add a column grid axis
    # over Nc for x / x_hat (or drop tile_n to 128) to stay within 64 MiB VMEM.

    def pad2(a, rows, cols, dtype):
        a = a.astype(dtype)
        return jnp.pad(a, ((0, rows - a.shape[0]), (0, cols - a.shape[1])))

    # data: bf16 features, int8 transposed adjacency (0/1 -> halves N^2 read)
    x_p = pad2(x, Np, Nc, bf16)
    c_p = pad2(c, Np, Fp, bf16)
    adjt_p = pad2(adj.T, Np, Np, i8)     # adjt[v, u] = adj[u, v]; padded entries 0

    # weights bf16, biases f32 (zero-padded -> padded features stay exactly 0)
    w = lambda k, r, co: pad2(params[k], r, co, bf16)
    b = lambda k, co: pad2(params[k], 1, co, f32)
    wse1 = w("wse1", Nc, Hp); bse1 = b("bse1", Hp)
    wse2 = w("wse2", Hp, Hp); bse2 = b("bse2", Hp)
    wsd1 = w("wsd1", Hp, Hp); bsd1 = b("bsd1", Hp)
    wsd2 = w("wsd2", Hp, Nc); bsd2 = b("bsd2", Nc)
    wae1 = w("wae1", Fp, Hp); bae1 = b("bae1", Hp)
    wae2 = w("wae2", Hp, Hp); bae2 = b("bae2", Hp)
    wad1 = w("wad1", Hp, Hp); bad1 = b("bad1", Hp)
    wad2 = w("wad2", Hp, Fp); bad2 = b("bad2", Fp)
    wd1 = w("wd1", Hp, HALFp); bd1 = b("bd1", HALFp)
    wd2r = pad2(params["wd2"].T, 1, HALFp, f32)      # (1, HALFp) row for VPU reduce
    bd2 = params["bd2"].astype(f32).reshape(1, 1)

    weight_args = [wse1, bse1, wse2, bse2, wsd1, bsd1, wsd2, bsd2,
                   wae1, bae1, wae2, bae2, wad1, bad1, wad2, bad2,
                   wd1, bd1, wd2r, bd2]

    # -------------------- kernel 1: AEs + discriminator --------------------
    row_spec = lambda cols: pl.BlockSpec((tile_n, cols), lambda i: (i, 0))
    full_spec = lambda a: pl.BlockSpec(a.shape, lambda i: (0, 0))   # VMEM-resident

    in_specs1 = [row_spec(Nc), row_spec(Fp)] + [full_spec(a) for a in weight_args]
    out_shape1 = (
        jax.ShapeDtypeStruct((Np, Hp), f32),    # h_s
        jax.ShapeDtypeStruct((Np, Hp), bf16),   # h_s bf16 copy (feeds kernel 2)
        jax.ShapeDtypeStruct((Np, Nc), bf16),   # x_hat (bf16 writeback)
        jax.ShapeDtypeStruct((Np, Hp), f32),    # h_a
        jax.ShapeDtypeStruct((Np, Hp), bf16),   # h_a bf16 copy
        jax.ShapeDtypeStruct((Np, Fp), bf16),   # c_hat (bf16 writeback)
        jax.ShapeDtypeStruct((Np, 128), f32),   # dis_a (lane-broadcast)
        jax.ShapeDtypeStruct((Np, 128), f32),   # dis_s (lane-broadcast)
    )
    out_specs1 = (row_spec(Hp), row_spec(Hp), row_spec(Nc), row_spec(Hp),
                  row_spec(Hp), row_spec(Fp), row_spec(128), row_spec(128))

    flops1 = int(2 * Np * (2 * Nc * Hp + 4 * Hp * Hp + 2 * Fp * Hp + 2 * Hp * HALFp))
    bytes1 = int(2 * Np * (Nc + Fp)
                 + sum(int(a.size) * a.dtype.itemsize for a in weight_args)
                 + Np * (4 * Hp + 2 * Hp + 2 * Nc + 4 * Hp + 2 * Hp + 2 * Fp + 8 * 128))
    cost1 = pl.CostEstimate(flops=flops1, transcendentals=int(2 * Np),
                            bytes_accessed=bytes1)

    (h_s_p, h_s_bf, x_hat_p, h_a_p, h_a_bf, c_hat_p,
     dis_a_p, dis_s_p) = pl.pallas_call(
        _ae_disc_kernel,
        grid=(n_tiles,),
        in_specs=in_specs1,
        out_specs=out_specs1,
        out_shape=out_shape1,
        compiler_params=pltpu.CompilerParams(
            dimension_semantics=("parallel",),
            vmem_limit_bytes=VMEM_LIMIT),
        cost_estimate=cost1,
    )(x_p, c_p, *weight_args)

    # -------------------- kernel 2: homophily aggregation --------------------
    # ||h_u||^2 rows, lane-oriented (tiny Np x Hp pass; bf16 copies come straight
    # from kernel 1, so no standalone f32->bf16 cast of the embeddings is needed).
    hs32 = h_s_bf.astype(f32)
    ha32 = h_a_bf.astype(f32)
    sqs_u = jnp.sum(hs32 * hs32, axis=1).reshape(1, Np)
    sqa_u = jnp.sum(ha32 * ha32, axis=1).reshape(1, Np)

    adjt_spec = pl.BlockSpec((tile_n, TU), lambda i, j: (i, j))
    h_res_spec = pl.BlockSpec((Np, Hp), lambda i, j: (0, 0))    # VMEM-resident h
    squ_spec = pl.BlockSpec((1, TU), lambda i, j: (0, j))
    out_spec2 = pl.BlockSpec((tile_n, 128), lambda i, j: (i, 0))

    flops2 = int(2 * 2 * Np * Np * Hp + 12 * Np * Np)
    bytes2 = int(Np * Np + 2 * 2 * Np * Hp + 2 * 4 * Np * n_tiles + 2 * Np * 128 * 4)
    cost2 = pl.CostEstimate(flops=flops2, transcendentals=int(2 * Np * Np),
                            bytes_accessed=bytes2)

    h_str_p, h_attr_p = pl.pallas_call(
        _homophily_kernel,
        grid=(n_tiles, n_utiles),
        in_specs=[adjt_spec, h_res_spec, h_res_spec, squ_spec, squ_spec],
        out_specs=(out_spec2, out_spec2),
        out_shape=(jax.ShapeDtypeStruct((Np, 128), f32),
                   jax.ShapeDtypeStruct((Np, 128), f32)),
        scratch_shapes=[pltpu.VMEM((tile_n, 1), f32),   # num_s
                        pltpu.VMEM((tile_n, 1), f32),   # num_a
                        pltpu.VMEM((tile_n, 1), f32),   # indeg
                        pltpu.VMEM((tile_n, 1), f32),   # ||h_s[v]||^2 (hoisted)
                        pltpu.VMEM((tile_n, 1), f32)],  # ||h_a[v]||^2 (hoisted)
        compiler_params=pltpu.CompilerParams(
            dimension_semantics=("parallel", "arbitrary"),
            vmem_limit_bytes=VMEM_LIMIT),
        cost_estimate=cost2,
    )(adjt_p, h_s_bf, h_a_bf, sqs_u, sqa_u)

    # -------------------- unpad / unpack --------------------
    h_s = h_s_p[:N, :H]
    x_hat = x_hat_p[:N, :N]        # bf16 (perf: halved N^2 HBM writeback)
    h_a = h_a_p[:N, :H]
    c_hat = c_hat_p[:N, :F]        # bf16
    dis_a = dis_a_p[:N, 0:1]
    dis_s = dis_s_p[:N, 0:1]
    h_str = h_str_p[:N, 0]         # 1-D [N], like g.ndata['h_str']
    h_attr = h_attr_p[:N, 0]
    return h_s, x_hat, h_a, c_hat, h_str, h_attr, dis_a, dis_s


def init_params(key, feat_size, num_nodes, hid_feats):
    """Deterministic parameter init, mirroring AdONE_Base.__init__ shapes."""
    half = hid_feats // 2

    def lin(k, din, dout, scale=0.1):
        kw, kb = jax.random.split(k)
        w = jax.random.normal(kw, (din, dout), jnp.float32) * scale
        b = jax.random.normal(kb, (1, dout), jnp.float32) * scale
        return w, b

    keys = jax.random.split(key, 10)
    p = {}
    p["wse1"], p["bse1"] = lin(keys[0], num_nodes, hid_feats)   # struct_encoder
    p["wse2"], p["bse2"] = lin(keys[1], hid_feats, hid_feats)
    p["wsd1"], p["bsd1"] = lin(keys[2], hid_feats, hid_feats)   # struct_decoder
    p["wsd2"], p["bsd2"] = lin(keys[3], hid_feats, num_nodes)
    p["wae1"], p["bae1"] = lin(keys[4], feat_size, hid_feats)   # attr_encoder
    p["wae2"], p["bae2"] = lin(keys[5], hid_feats, hid_feats)
    p["wad1"], p["bad1"] = lin(keys[6], hid_feats, hid_feats)   # attr_decoder
    p["wad2"], p["bad2"] = lin(keys[7], hid_feats, feat_size)
    p["wd1"], p["bd1"] = lin(keys[8], hid_feats, half)          # discriminator
    p["wd2"], p["bd2"] = lin(keys[9], half, 1)
    return p


if __name__ == "__main__":
    num_nodes = 8      # N
    feat_size = 16     # F
    hid_feats = 32     # H
    # num_layers = 2 (minimum allowed): linear_in + linear_out per MLP.
    # TODO(synk): dropout between layers is identity here (eval-mode forward).

    key = jax.random.PRNGKey(0)
    k_x, k_c, k_adj, k_p = jax.random.split(key, 4)

    x = jax.random.normal(k_x, (num_nodes, num_nodes), jnp.float32)
    c = jax.random.normal(k_c, (num_nodes, feat_size), jnp.float32)

    adj = (jax.random.uniform(k_adj, (num_nodes, num_nodes)) < 0.4).astype(jnp.float32)
    adj = adj * (1.0 - jnp.eye(num_nodes, dtype=jnp.float32))   # no self loops

    params = init_params(k_p, feat_size, num_nodes, hid_feats)

    outs = adone_forward(x, c, adj, params)
    outs = jax.block_until_ready(outs)

    h_s, x_hat, h_a, c_hat, h_str, h_attr, dis_a, dis_s = outs
    assert h_s.shape == (num_nodes, hid_feats)
    assert x_hat.shape == (num_nodes, num_nodes)
    assert h_a.shape == (num_nodes, hid_feats)
    assert c_hat.shape == (num_nodes, feat_size)
    assert h_str.shape == (num_nodes,)
    assert h_attr.shape == (num_nodes,)
    assert dis_a.shape == (num_nodes, 1)
    assert dis_s.shape == (num_nodes, 1)
    print("KERNEL_OK")
</pallas_src>

<mosaic_0001>
module attributes {stable_mosaic.version = 11 : i64} {
  func.func @_ae_disc_kernel(%arg0: i32, %arg1: memref<64x128xbf16, #tpu.memory_space<vmem>>, %arg2: memref<64x128xbf16, #tpu.memory_space<vmem>>, %arg3: memref<128x128xbf16, #tpu.memory_space<vmem>>, %arg4: memref<1x128xf32, #tpu.memory_space<vmem>>, %arg5: memref<128x128xbf16, #tpu.memory_space<vmem>>, %arg6: memref<1x128xf32, #tpu.memory_space<vmem>>, %arg7: memref<128x128xbf16, #tpu.memory_space<vmem>>, %arg8: memref<1x128xf32, #tpu.memory_space<vmem>>, %arg9: memref<128x128xbf16, #tpu.memory_space<vmem>>, %arg10: memref<1x128xf32, #tpu.memory_space<vmem>>, %arg11: memref<128x128xbf16, #tpu.memory_space<vmem>>, %arg12: memref<1x128xf32, #tpu.memory_space<vmem>>, %arg13: memref<128x128xbf16, #tpu.memory_space<vmem>>, %arg14: memref<1x128xf32, #tpu.memory_space<vmem>>, %arg15: memref<128x128xbf16, #tpu.memory_space<vmem>>, %arg16: memref<1x128xf32, #tpu.memory_space<vmem>>, %arg17: memref<128x128xbf16, #tpu.memory_space<vmem>>, %arg18: memref<1x128xf32, #tpu.memory_space<vmem>>, %arg19: memref<128x128xbf16, #tpu.memory_space<vmem>>, %arg20: memref<1x128xf32, #tpu.memory_space<vmem>>, %arg21: memref<1x128xf32, #tpu.memory_space<vmem>>, %arg22: memref<1x1xf32, #tpu.memory_space<vmem>>, %arg23: memref<64x128xf32, #tpu.memory_space<vmem>>, %arg24: memref<64x128xbf16, #tpu.memory_space<vmem>>, %arg25: memref<64x128xbf16, #tpu.memory_space<vmem>>, %arg26: memref<64x128xf32, #tpu.memory_space<vmem>>, %arg27: memref<64x128xbf16, #tpu.memory_space<vmem>>, %arg28: memref<64x128xbf16, #tpu.memory_space<vmem>>, %arg29: memref<64x128xf32, #tpu.memory_space<vmem>>, %arg30: memref<64x128xf32, #tpu.memory_space<vmem>>) attributes {dimension_semantics = [#tpu.dimension_semantics<parallel>], iteration_bounds = array<i64: 2>, scalar_prefetch = 0 : i64, scratch_operands = 0 : i64, tpu.core_type = #tpu.core_type<tc>, window_params = [{transform_indices = @transform_0, window_bounds = array<i64: 64, 128>}, {transform_indices = @transform_1, window_bounds = array<i64: 64, 128>}, {pipeline_mode = #tpu.pipeline_mode<synchronous>, transform_indices = @transform_2, window_bounds = array<i64: 128, 128>}, {pipeline_mode = #tpu.pipeline_mode<synchronous>, transform_indices = @transform_3, window_bounds = array<i64: 1, 128>}, {pipeline_mode = #tpu.pipeline_mode<synchronous>, transform_indices = @transform_4, window_bounds = array<i64: 128, 128>}, {pipeline_mode = #tpu.pipeline_mode<synchronous>, transform_indices = @transform_5, window_bounds = array<i64: 1, 128>}, {pipeline_mode = #tpu.pipeline_mode<synchronous>, transform_indices = @transform_6, window_bounds = array<i64: 128, 128>}, {pipeline_mode = #tpu.pipeline_mode<synchronous>, transform_indices = @transform_7, window_bounds = array<i64: 1, 128>}, {pipeline_mode = #tpu.pipeline_mode<synchronous>, transform_indices = @transform_8, window_bounds = array<i64: 128, 128>}, {pipeline_mode = #tpu.pipeline_mode<synchronous>, transform_indices = @transform_9, window_bounds = array<i64: 1, 128>}, {pipeline_mode = #tpu.pipeline_mode<synchronous>, transform_indices = @transform_10, window_bounds = array<i64: 128, 128>}, {pipeline_mode = #tpu.pipeline_mode<synchronous>, transform_indices = @transform_11, window_bounds = array<i64: 1, 128>}, {pipeline_mode = #tpu.pipeline_mode<synchronous>, transform_indices = @transform_12, window_bounds = array<i64: 128, 128>}, {pipeline_mode = #tpu.pipeline_mode<synchronous>, transform_indices = @transform_13, window_bounds = array<i64: 1, 128>}, {pipeline_mode = #tpu.pipeline_mode<synchronous>, transform_indices = @transform_14, window_bounds = array<i64: 128, 128>}, {pipeline_mode = #tpu.pipeline_mode<synchronous>, transform_indices = @transform_15, window_bounds = array<i64: 1, 128>}, {pipeline_mode = #tpu.pipeline_mode<synchronous>, transform_indices = @transform_16, window_bounds = array<i64: 128, 128>}, {pipeline_mode = #tpu.pipeline_mode<synchronous>, transform_indices = @transform_17, window_bounds = array<i64: 1, 128>}, {pipeline_mode = #tpu.pipeline_mode<synchronous>, transform_indices = @transform_18, window_bounds = array<i64: 128, 128>}, {pipeline_mode = #tpu.pipeline_mode<synchronous>, transform_indices = @transform_19, window_bounds = array<i64: 1, 128>}, {pipeline_mode = #tpu.pipeline_mode<synchronous>, transform_indices = @transform_20, window_bounds = array<i64: 1, 128>}, {pipeline_mode = #tpu.pipeline_mode<synchronous>, transform_indices = @transform_21, window_bounds = array<i64: 1, 1>}, {transform_indices = @transform_22, window_bounds = array<i64: 64, 128>}, {transform_indices = @transform_23, window_bounds = array<i64: 64, 128>}, {transform_indices = @transform_24, window_bounds = array<i64: 64, 128>}, {transform_indices = @transform_25, window_bounds = array<i64: 64, 128>}, {transform_indices = @transform_26, window_bounds = array<i64: 64, 128>}, {transform_indices = @transform_27, window_bounds = array<i64: 64, 128>}, {transform_indices = @transform_28, window_bounds = array<i64: 64, 128>}, {transform_indices = @transform_29, window_bounds = array<i64: 64, 128>}]} {
    %c0 = arith.constant 0 : index
    %c0_0 = arith.constant 0 : index
    %0 = vector.load %arg1[%c0, %c0_0] : memref<64x128xbf16, #tpu.memory_space<vmem>>, vector<64x128xbf16>
    %c0_1 = arith.constant 0 : index
    %c0_2 = arith.constant 0 : index
    %1 = vector.load %arg2[%c0_1, %c0_2] : memref<64x128xbf16, #tpu.memory_space<vmem>>, vector<64x128xbf16>
    %c0_3 = arith.constant 0 : index
    %c0_4 = arith.constant 0 : index
    %2 = vector.load %arg3[%c0_3, %c0_4] : memref<128x128xbf16, #tpu.memory_space<vmem>>, vector<128x128xbf16>
    %cst = arith.constant dense<0.000000e+00> : vector<64x128xf32>
    %3 = tpu.matmul %0, %2, %cst {dimension_numbers = #tpu.dot_dimension_numbers<[1], [0], [0], [1], [0, 0, 1, 1], [], []>} : vector<64x128xbf16>, vector<128x128xbf16>, vector<64x128xf32> -> vector<64x128xf32>
    %c0_5 = arith.constant 0 : index
    %c0_6 = arith.constant 0 : index
    %4 = vector.load %arg4[%c0_5, %c0_6] : memref<1x128xf32, #tpu.memory_space<vmem>>, vector<1x128xf32>
    %5 = vector.broadcast %4 : vector<1x128xf32> to vector<64x128xf32>
    %6 = arith.addf %3, %5 : vector<64x128xf32>
    %cst_7 = arith.constant 0.000000e+00 : f32
    %7 = vector.broadcast %cst_7 : f32 to vector<64x128xf32>
    %8 = arith.maximumf %6, %7 : vector<64x128xf32>
    %9 = arith.truncf %8 : vector<64x128xf32> to vector<64x128xbf16>
    %c0_8 = arith.constant 0 : index
    %c0_9 = arith.constant 0 : index
    %10 = vector.load %arg5[%c0_8, %c0_9] : memref<128x128xbf16, #tpu.memory_space<vmem>>, vector<128x128xbf16>
    %cst_10 = arith.constant dense<0.000000e+00> : vector<64x128xf32>
    %11 = tpu.matmul %9, %10, %cst_10 {dimension_numbers = #tpu.dot_dimension_numbers<[1], [0], [0], [1], [0, 0, 1, 1], [], []>} : vector<64x128xbf16>, vector<128x128xbf16>, vector<64x128xf32> -> vector<64x128xf32>
    %c0_11 = arith.constant 0 : index
    %c0_12 = arith.constant 0 : index
    %12 = vector.load %arg6[%c0_11, %c0_12] : memref<1x128xf32, #tpu.memory_space<vmem>>, vector<1x128xf32>
    %13 = vector.broadcast %12 : vector<1x128xf32> to vector<64x128xf32>
    %14 = arith.addf %11, %13 : vector<64x128xf32>
    %cst_13 = arith.constant 0.000000e+00 : f32
    %15 = vector.broadcast %cst_13 : f32 to vector<64x128xf32>
    %16 = arith.maximumf %14, %15 : vector<64x128xf32>
    %17 = arith.truncf %16 : vector<64x128xf32> to vector<64x128xbf16>
    %c0_14 = arith.constant 0 : index
    %c0_15 = arith.constant 0 : index
    %18 = vector.load %arg7[%c0_14, %c0_15] : memref<128x128xbf16, #tpu.memory_space<vmem>>, vector<128x128xbf16>
    %cst_16 = arith.constant dense<0.000000e+00> : vector<64x128xf32>
    %19 = tpu.matmul %17, %18, %cst_16 {dimension_numbers = #tpu.dot_dimension_numbers<[1], [0], [0], [1], [0, 0, 1, 1], [], []>} : vector<64x128xbf16>, vector<128x128xbf16>, vector<64x128xf32> -> vector<64x128xf32>
    %c0_17 = arith.constant 0 : index
    %c0_18 = arith.constant 0 : index
    %20 = vector.load %arg8[%c0_17, %c0_18] : memref<1x128xf32, #tpu.memory_space<vmem>>, vector<1x128xf32>
    %21 = vector.broadcast %20 : vector<1x128xf32> to vector<64x128xf32>
    %22 = arith.addf %19, %21 : vector<64x128xf32>
    %cst_19 = arith.constant 0.000000e+00 : f32
    %23 = vector.broadcast %cst_19 : f32 to vector<64x128xf32>
    %24 = arith.maximumf %22, %23 : vector<64x128xf32>
    %25 = arith.truncf %24 : vector<64x128xf32> to vector<64x128xbf16>
    %c0_20 = arith.constant 0 : index
    %c0_21 = arith.constant 0 : index
    %26 = vector.load %arg9[%c0_20, %c0_21] : memref<128x128xbf16, #tpu.memory_space<vmem>>, vector<128x128xbf16>
    %cst_22 = arith.constant dense<0.000000e+00> : vector<64x128xf32>
    %27 = tpu.matmul %25, %26, %cst_22 {dimension_numbers = #tpu.dot_dimension_numbers<[1], [0], [0], [1], [0, 0, 1, 1], [], []>} : vector<64x128xbf16>, vector<128x128xbf16>, vector<64x128xf32> -> vector<64x128xf32>
    %c0_23 = arith.constant 0 : index
    %c0_24 = arith.constant 0 : index
    %28 = vector.load %arg10[%c0_23, %c0_24] : memref<1x128xf32, #tpu.memory_space<vmem>>, vector<1x128xf32>
    %29 = vector.broadcast %28 : vector<1x128xf32> to vector<64x128xf32>
    %30 = arith.addf %27, %29 : vector<64x128xf32>
    %cst_25 = arith.constant 0.000000e+00 : f32
    %31 = vector.broadcast %cst_25 : f32 to vector<64x128xf32>
    %32 = arith.maximumf %30, %31 : vector<64x128xf32>
    %c0_26 = arith.constant 0 : index
    %c0_27 = arith.constant 0 : index
    %33 = vector.load %arg11[%c0_26, %c0_27] : memref<128x128xbf16, #tpu.memory_space<vmem>>, vector<128x128xbf16>
    %cst_28 = arith.constant dense<0.000000e+00> : vector<64x128xf32>
    %34 = tpu.matmul %1, %33, %cst_28 {dimension_numbers = #tpu.dot_dimension_numbers<[1], [0], [0], [1], [0, 0, 1, 1], [], []>} : vector<64x128xbf16>, vector<128x128xbf16>, vector<64x128xf32> -> vector<64x128xf32>
    %c0_29 = arith.constant 0 : index
    %c0_30 = arith.constant 0 : index
    %35 = vector.load %arg12[%c0_29, %c0_30] : memref<1x128xf32, #tpu.memory_space<vmem>>, vector<1x128xf32>
    %36 = vector.broadcast %35 : vector<1x128xf32> to vector<64x128xf32>
    %37 = arith.addf %34, %36 : vector<64x128xf32>
    %cst_31 = arith.constant 0.000000e+00 : f32
    %38 = vector.broadcast %cst_31 : f32 to vector<64x128xf32>
    %39 = arith.maximumf %37, %38 : vector<64x128xf32>
    %40 = arith.truncf %39 : vector<64x128xf32> to vector<64x128xbf16>
    %c0_32 = arith.constant 0 : index
    %c0_33 = arith.constant 0 : index
    %41 = vector.load %arg13[%c0_32, %c0_33] : memref<128x128xbf16, #tpu.memory_space<vmem>>, vector<128x128xbf16>
    %cst_34 = arith.constant dense<0.000000e+00> : vector<64x128xf32>
    %42 = tpu.matmul %40, %41, %cst_34 {dimension_numbers = #tpu.dot_dimension_numbers<[1], [0], [0], [1], [0, 0, 1, 1], [], []>} : vector<64x128xbf16>, vector<128x128xbf16>, vector<64x128xf32> -> vector<64x128xf32>
    %c0_35 = arith.constant 0 : index
    %c0_36 = arith.constant 0 : index
    %43 = vector.load %arg14[%c0_35, %c0_36] : memref<1x128xf32, #tpu.memory_space<vmem>>, vector<1x128xf32>
    %44 = vector.broadcast %43 : vector<1x128xf32> to vector<64x128xf32>
    %45 = arith.addf %42, %44 : vector<64x128xf32>
    %cst_37 = arith.constant 0.000000e+00 : f32
    %46 = vector.broadcast %cst_37 : f32 to vector<64x128xf32>
    %47 = arith.maximumf %45, %46 : vector<64x128xf32>
    %48 = arith.truncf %47 : vector<64x128xf32> to vector<64x128xbf16>
    %c0_38 = arith.constant 0 : index
    %c0_39 = arith.constant 0 : index
    %49 = vector.load %arg15[%c0_38, %c0_39] : memref<128x128xbf16, #tpu.memory_space<vmem>>, vector<128x128xbf16>
    %cst_40 = arith.constant dense<0.000000e+00> : vector<64x128xf32>
    %50 = tpu.matmul %48, %49, %cst_40 {dimension_numbers = #tpu.dot_dimension_numbers<[1], [0], [0], [1], [0, 0, 1, 1], [], []>} : vector<64x128xbf16>, vector<128x128xbf16>, vector<64x128xf32> -> vector<64x128xf32>
    %c0_41 = arith.constant 0 : index
    %c0_42 = arith.constant 0 : index
    %51 = vector.load %arg16[%c0_41, %c0_42] : memref<1x128xf32, #tpu.memory_space<vmem>>, vector<1x128xf32>
    %52 = vector.broadcast %51 : vector<1x128xf32> to vector<64x128xf32>
    %53 = arith.addf %50, %52 : vector<64x128xf32>
    %cst_43 = arith.constant 0.000000e+00 : f32
    %54 = vector.broadcast %cst_43 : f32 to vector<64x128xf32>
    %55 = arith.maximumf %53, %54 : vector<64x128xf32>
    %56 = arith.truncf %55 : vector<64x128xf32> to vector<64x128xbf16>
    %c0_44 = arith.constant 0 : index
    %c0_45 = arith.constant 0 : index
    %57 = vector.load %arg17[%c0_44, %c0_45] : memref<128x128xbf16, #tpu.memory_space<vmem>>, vector<128x128xbf16>
    %cst_46 = arith.constant dense<0.000000e+00> : vector<64x128xf32>
    %58 = tpu.matmul %56, %57, %cst_46 {dimension_numbers = #tpu.dot_dimension_numbers<[1], [0], [0], [1], [0, 0, 1, 1], [], []>} : vector<64x128xbf16>, vector<128x128xbf16>, vector<64x128xf32> -> vector<64x128xf32>
    %c0_47 = arith.constant 0 : index
    %c0_48 = arith.constant 0 : index
    %59 = vector.load %arg18[%c0_47, %c0_48] : memref<1x128xf32, #tpu.memory_space<vmem>>, vector<1x128xf32>
    %60 = vector.broadcast %59 : vector<1x128xf32> to vector<64x128xf32>
    %61 = arith.addf %58, %60 : vector<64x128xf32>
    %cst_49 = arith.constant 0.000000e+00 : f32
    %62 = vector.broadcast %cst_49 : f32 to vector<64x128xf32>
    %63 = arith.maximumf %61, %62 : vector<64x128xf32>
    %64 = arith.truncf %47 : vector<64x128xf32> to vector<64x128xbf16>
    %65 = arith.truncf %16 : vector<64x128xf32> to vector<64x128xbf16>
    %66 = tpu.concatenate %64, %65 in 0 : vector<64x128xbf16>, vector<64x128xbf16> -> vector<128x128xbf16>
    %c0_50 = arith.constant 0 : index
    %c0_51 = arith.constant 0 : index
    %67 = vector.load %arg19[%c0_50, %c0_51] : memref<128x128xbf16, #tpu.memory_space<vmem>>, vector<128x128xbf16>
    %cst_52 = arith.constant dense<0.000000e+00> : vector<128x128xf32>
    %68 = tpu.matmul %66, %67, %cst_52 {dimension_numbers = #tpu.dot_dimension_numbers<[1], [0], [0], [1], [0, 0, 1, 1], [], []>} : vector<128x128xbf16>, vector<128x128xbf16>, vector<128x128xf32> -> vector<128x128xf32>
    %c0_53 = arith.constant 0 : index
    %c0_54 = arith.constant 0 : index
    %69 = vector.load %arg20[%c0_53, %c0_54] : memref<1x128xf32, #tpu.memory_space<vmem>>, vector<1x128xf32>
    %70 = vector.broadcast %69 : vector<1x128xf32> to vector<128x128xf32>
    %71 = arith.addf %68, %70 : vector<128x128xf32>
    %cst_55 = arith.constant 0.000000e+00 : f32
    %72 = vector.broadcast %cst_55 : f32 to vector<128x128xf32>
    %73 = arith.maximumf %71, %72 : vector<128x128xf32>
    %c0_56 = arith.constant 0 : index
    %c0_57 = arith.constant 0 : index
    %74 = vector.load %arg21[%c0_56, %c0_57] : memref<1x128xf32, #tpu.memory_space<vmem>>, vector<1x128xf32>
    %75 = vector.broadcast %74 : vector<1x128xf32> to vector<128x128xf32>
    %76 = arith.mulf %73, %75 : vector<128x128xf32>
    %cst_58 = arith.constant dense<0.000000e+00> : vector<128xf32>
    %77 = vector.multi_reduction <add>, %76, %cst_58 [1] : vector<128x128xf32> to vector<128xf32>
    %78 = vector.shape_cast %77 : vector<128xf32> to vector<128x1xf32>
    %c0_59 = arith.constant 0 : index
    %c0_60 = arith.constant 0 : index
    %79 = vector.load %arg22[%c0_59, %c0_60] : memref<1x1xf32, #tpu.memory_space<vmem>>, vector<1x1xf32>
    %80 = vector.broadcast %79 : vector<1x1xf32> to vector<128x1xf32>
    %81 = arith.addf %78, %80 : vector<128x1xf32>
    %82 = math.tanh %81 : vector<128x1xf32>
    %c0_61 = arith.constant 0 : index
    %c0_62 = arith.constant 0 : index
    %83 = vector.load %arg23[%c0_61, %c0_62] : memref<64x128xf32, #tpu.memory_space<vmem>>, vector<64x128xf32>
    tpu.vector_store %arg23[%c0_61, %c0_62], %16 {strides = array<i32>} : memref<64x128xf32, #tpu.memory_space<vmem>>, vector<64x128xf32>,
    %84 = arith.truncf %16 : vector<64x128xf32> to vector<64x128xbf16>
    %c0_63 = arith.constant 0 : index
    %c0_64 = arith.constant 0 : index
    %85 = vector.load %arg24[%c0_63, %c0_64] : memref<64x128xbf16, #tpu.memory_space<vmem>>, vector<64x128xbf16>
    tpu.vector_store %arg24[%c0_63, %c0_64], %84 {strides = array<i32>} : memref<64x128xbf16, #tpu.memory_space<vmem>>, vector<64x128xbf16>,
    %86 = arith.truncf %32 : vector<64x128xf32> to vector<64x128xbf16>
    %c0_65 = arith.constant 0 : index
    %c0_66 = arith.constant 0 : index
    %87 = vector.load %arg25[%c0_65, %c0_66] : memref<64x128xbf16, #tpu.memory_space<vmem>>, vector<64x128xbf16>
    tpu.vector_store %arg25[%c0_65, %c0_66], %86 {strides = array<i32>} : memref<64x128xbf16, #tpu.memory_space<vmem>>, vector<64x128xbf16>,
    %c0_67 = arith.constant 0 : index
    %c0_68 = arith.constant 0 : index
    %88 = vector.load %arg26[%c0_67, %c0_68] : memref<64x128xf32, #tpu.memory_space<vmem>>, vector<64x128xf32>
    tpu.vector_store %arg26[%c0_67, %c0_68], %47 {strides = array<i32>} : memref<64x128xf32, #tpu.memory_space<vmem>>, vector<64x128xf32>,
    %89 = arith.truncf %47 : vector<64x128xf32> to vector<64x128xbf16>
    %c0_69 = arith.constant 0 : index
    %c0_70 = arith.constant 0 : index
    %90 = vector.load %arg27[%c0_69, %c0_70] : memref<64x128xbf16, #tpu.memory_space<vmem>>, vector<64x128xbf16>
    tpu.vector_store %arg27[%c0_69, %c0_70], %89 {strides = array<i32>} : memref<64x128xbf16, #tpu.memory_space<vmem>>, vector<64x128xbf16>,
    %91 = arith.truncf %63 : vector<64x128xf32> to vector<64x128xbf16>
    %c0_71 = arith.constant 0 : index
    %c0_72 = arith.constant 0 : index
    %92 = vector.load %arg28[%c0_71, %c0_72] : memref<64x128xbf16, #tpu.memory_space<vmem>>, vector<64x128xbf16>
    tpu.vector_store %arg28[%c0_71, %c0_72], %91 {strides = array<i32>} : memref<64x128xbf16, #tpu.memory_space<vmem>>, vector<64x128xbf16>,
    %93 = vector.extract_strided_slice %82 {offsets = [0, 0], sizes = [64, 1], strides = [1, 1]} : vector<128x1xf32> to vector<64x1xf32>
    %94 = vector.shape_cast %93 : vector<64x1xf32> to vector<64x1xf32>
    %95 = vector.broadcast %94 : vector<64x1xf32> to vector<64x128xf32>
    %c0_73 = arith.constant 0 : index
    %c0_74 = arith.constant 0 : index
    %96 = vector.load %arg29[%c0_73, %c0_74] : memref<64x128xf32, #tpu.memory_space<vmem>>, vector<64x128xf32>
    tpu.vector_store %arg29[%c0_73, %c0_74], %95 {strides = array<i32>} : memref<64x128xf32, #tpu.memory_space<vmem>>, vector<64x128xf32>,
    %97 = vector.extract_strided_slice %82 {offsets = [64, 0], sizes = [64, 1], strides = [1, 1]} : vector<128x1xf32> to vector<64x1xf32>
    %98 = vector.shape_cast %97 : vector<64x1xf32> to vector<64x1xf32>
    %99 = vector.broadcast %98 : vector<64x1xf32> to vector<64x128xf32>
    %c0_75 = arith.constant 0 : index
    %c0_76 = arith.constant 0 : index
    %100 = vector.load %arg30[%c0_75, %c0_76] : memref<64x128xf32, #tpu.memory_space<vmem>>, vector<64x128xf32>
    tpu.vector_store %arg30[%c0_75, %c0_76], %99 {strides = array<i32>} : memref<64x128xf32, #tpu.memory_space<vmem>>, vector<64x128xf32>,
    return
  }
  func.func @transform_0(%arg0: i32) -> (i32, i32) {
    %c0_i32 = arith.constant 0 : i32
    %c0_i32_0 = arith.constant 0 : i32
    return %arg0, %c0_i32 : i32, i32
  }
  func.func @transform_1(%arg0: i32) -> (i32, i32) {
    %c0_i32 = arith.constant 0 : i32
    %c0_i32_0 = arith.constant 0 : i32
    return %arg0, %c0_i32 : i32, i32
  }
  func.func @transform_2(%arg0: i32) -> (i32, i32) {
    %c0_i32 = arith.constant 0 : i32
    %c0_i32_0 = arith.constant 0 : i32
    %c0_i32_1 = arith.constant 0 : i32
    return %c0_i32, %c0_i32_0 : i32, i32
  }
  func.func @transform_3(%arg0: i32) -> (i32, i32) {
    %c0_i32 = arith.constant 0 : i32
    %c0_i32_0 = arith.constant 0 : i32
    %c0_i32_1 = arith.constant 0 : i32
    return %c0_i32, %c0_i32_0 : i32, i32
  }
  func.func @transform_4(%arg0: i32) -> (i32, i32) {
    %c0_i32 = arith.constant 0 : i32
    %c0_i32_0 = arith.constant 0 : i32
    %c0_i32_1 = arith.constant 0 : i32
    return %c0_i32, %c0_i32_0 : i32, i32
  }
  func.func @transform_5(%arg0: i32) -> (i32, i32) {
    %c0_i32 = arith.constant 0 : i32
    %c0_i32_0 = arith.constant 0 : i32
    %c0_i32_1 = arith.constant 0 : i32
    return %c0_i32, %c0_i32_0 : i32, i32
  }
  func.func @transform_6(%arg0: i32) -> (i32, i32) {
    %c0_i32 = arith.constant 0 : i32
    %c0_i32_0 = arith.constant 0 : i32
    %c0_i32_1 = arith.constant 0 : i32
    return %c0_i32, %c0_i32_0 : i32, i32
  }
  func.func @transform_7(%arg0: i32) -> (i32, i32) {
    %c0_i32 = arith.constant 0 : i32
    %c0_i32_0 = arith.constant 0 : i32
    %c0_i32_1 = arith.constant 0 : i32
    return %c0_i32, %c0_i32_0 : i32, i32
  }
  func.func @transform_8(%arg0: i32) -> (i32, i32) {
    %c0_i32 = arith.constant 0 : i32
    %c0_i32_0 = arith.constant 0 : i32
    %c0_i32_1 = arith.constant 0 : i32
    return %c0_i32, %c0_i32_0 : i32, i32
  }
  func.func @transform_9(%arg0: i32) -> (i32, i32) {
    %c0_i32 = arith.constant 0 : i32
    %c0_i32_0 = arith.constant 0 : i32
    %c0_i32_1 = arith.constant 0 : i32
    return %c0_i32, %c0_i32_0 : i32, i32
  }
  func.func @transform_10(%arg0: i32) -> (i32, i32) {
    %c0_i32 = arith.constant 0 : i32
    %c0_i32_0 = arith.constant 0 : i32
    %c0_i32_1 = arith.constant 0 : i32
    return %c0_i32, %c0_i32_0 : i32, i32
  }
  func.func @transform_11(%arg0: i32) -> (i32, i32) {
    %c0_i32 = arith.constant 0 : i32
    %c0_i32_0 = arith.constant 0 : i32
    %c0_i32_1 = arith.constant 0 : i32
    return %c0_i32, %c0_i32_0 : i32, i32
  }
  func.func @transform_12(%arg0: i32) -> (i32, i32) {
    %c0_i32 = arith.constant 0 : i32
    %c0_i32_0 = arith.constant 0 : i32
    %c0_i32_1 = arith.constant 0 : i32
    return %c0_i32, %c0_i32_0 : i32, i32
  }
  func.func @transform_13(%arg0: i32) -> (i32, i32) {
    %c0_i32 = arith.constant 0 : i32
    %c0_i32_0 = arith.constant 0 : i32
    %c0_i32_1 = arith.constant 0 : i32
    return %c0_i32, %c0_i32_0 : i32, i32
  }
  func.func @transform_14(%arg0: i32) -> (i32, i32) {
    %c0_i32 = arith.constant 0 : i32
    %c0_i32_0 = arith.constant 0 : i32
    %c0_i32_1 = arith.constant 0 : i32
    return %c0_i32, %c0_i32_0 : i32, i32
  }
  func.func @transform_15(%arg0: i32) -> (i32, i32) {
    %c0_i32 = arith.constant 0 : i32
    %c0_i32_0 = arith.constant 0 : i32
    %c0_i32_1 = arith.constant 0 : i32
    return %c0_i32, %c0_i32_0 : i32, i32
  }
  func.func @transform_16(%arg0: i32) -> (i32, i32) {
    %c0_i32 = arith.constant 0 : i32
    %c0_i32_0 = arith.constant 0 : i32
    %c0_i32_1 = arith.constant 0 : i32
    return %c0_i32, %c0_i32_0 : i32, i32
  }
  func.func @transform_17(%arg0: i32) -> (i32, i32) {
    %c0_i32 = arith.constant 0 : i32
    %c0_i32_0 = arith.constant 0 : i32
    %c0_i32_1 = arith.constant 0 : i32
    return %c0_i32, %c0_i32_0 : i32, i32
  }
  func.func @transform_18(%arg0: i32) -> (i32, i32) {
    %c0_i32 = arith.constant 0 : i32
    %c0_i32_0 = arith.constant 0 : i32
    %c0_i32_1 = arith.constant 0 : i32
    return %c0_i32, %c0_i32_0 : i32, i32
  }
  func.func @transform_19(%arg0: i32) -> (i32, i32) {
    %c0_i32 = arith.constant 0 : i32
    %c0_i32_0 = arith.constant 0 : i32
    %c0_i32_1 = arith.constant 0 : i32
    return %c0_i32, %c0_i32_0 : i32, i32
  }
  func.func @transform_20(%arg0: i32) -> (i32, i32) {
    %c0_i32 = arith.constant 0 : i32
    %c0_i32_0 = arith.constant 0 : i32
    %c0_i32_1 = arith.constant 0 : i32
    return %c0_i32, %c0_i32_0 : i32, i32
  }
  func.func @transform_21(%arg0: i32) -> (i32, i32) {
    %c0_i32 = arith.constant 0 : i32
    %c0_i32_0 = arith.constant 0 : i32
    %c0_i32_1 = arith.constant 0 : i32
    return %c0_i32, %c0_i32_0 : i32, i32
  }
  func.func @transform_22(%arg0: i32) -> (i32, i32) {
    %c0_i32 = arith.constant 0 : i32
    %c0_i32_0 = arith.constant 0 : i32
    return %arg0, %c0_i32 : i32, i32
  }
  func.func @transform_23(%arg0: i32) -> (i32, i32) {
    %c0_i32 = arith.constant 0 : i32
    %c0_i32_0 = arith.constant 0 : i32
    return %arg0, %c0_i32 : i32, i32
  }
  func.func @transform_24(%arg0: i32) -> (i32, i32) {
    %c0_i32 = arith.constant 0 : i32
    %c0_i32_0 = arith.constant 0 : i32
    return %arg0, %c0_i32 : i32, i32
  }
  func.func @transform_25(%arg0: i32) -> (i32, i32) {
    %c0_i32 = arith.constant 0 : i32
    %c0_i32_0 = arith.constant 0 : i32
    return %arg0, %c0_i32 : i32, i32
  }
  func.func @transform_26(%arg0: i32) -> (i32, i32) {
    %c0_i32 = arith.constant 0 : i32
    %c0_i32_0 = arith.constant 0 : i32
    return %arg0, %c0_i32 : i32, i32
  }
  func.func @transform_27(%arg0: i32) -> (i32, i32) {
    %c0_i32 = arith.constant 0 : i32
    %c0_i32_0 = arith.constant 0 : i32
    return %arg0, %c0_i32 : i32, i32
  }
  func.func @transform_28(%arg0: i32) -> (i32, i32) {
    %c0_i32 = arith.constant 0 : i32
    %c0_i32_0 = arith.constant 0 : i32
    return %arg0, %c0_i32 : i32, i32
  }
  func.func @transform_29(%arg0: i32) -> (i32, i32) {
    %c0_i32 = arith.constant 0 : i32
    %c0_i32_0 = arith.constant 0 : i32
    return %arg0, %c0_i32 : i32, i32
  }
}

module attributes {stable_mosaic.version = 11 : i64} {
  func.func @_homophily_kernel(%arg0: i32, %arg1: i32, %arg2: memref<64x128xi8, #tpu.memory_space<vmem>>, %arg3: memref<128x128xbf16, #tpu.memory_space<vmem>>, %arg4: memref<128x128xbf16, #tpu.memory_space<vmem>>, %arg5: memref<1x128xf32, #tpu.memory_space<vmem>>, %arg6: memref<1x128xf32, #tpu.memory_space<vmem>>, %arg7: memref<64x128xf32, #tpu.memory_space<vmem>>, %arg8: memref<64x128xf32, #tpu.memory_space<vmem>>, %arg9: memref<64x1xf32, #tpu.memory_space<vmem>>, %arg10: memref<64x1xf32, #tpu.memory_space<vmem>>, %arg11: memref<64x1xf32, #tpu.memory_space<vmem>>, %arg12: memref<64x1xf32, #tpu.memory_space<vmem>>, %arg13: memref<64x1xf32, #tpu.memory_space<vmem>>) attributes {dimension_semantics = [#tpu.dimension_semantics<parallel>, #tpu.dimension_semantics<arbitrary>], iteration_bounds = array<i64: 2, 1>, scalar_prefetch = 0 : i64, scratch_operands = 5 : i64, tpu.core_type = #tpu.core_type<tc>, window_params = [{transform_indices = @transform_0, window_bounds = array<i64: 64, 128>}, {pipeline_mode = #tpu.pipeline_mode<synchronous>, transform_indices = @transform_1, window_bounds = array<i64: 128, 128>}, {pipeline_mode = #tpu.pipeline_mode<synchronous>, transform_indices = @transform_2, window_bounds = array<i64: 128, 128>}, {transform_indices = @transform_3, window_bounds = array<i64: 1, 128>}, {transform_indices = @transform_4, window_bounds = array<i64: 1, 128>}, {transform_indices = @transform_5, window_bounds = array<i64: 64, 128>}, {transform_indices = @transform_6, window_bounds = array<i64: 64, 128>}]} {
    %c64_i32 = arith.constant 64 : i32
    %0 = arith.muli %arg0, %c64_i32 : i32
    %1 = tpu.assume_multiple %0, 64 : i32
    %c128_i32 = arith.constant 128 : i32
    %2 = arith.muli %arg1, %c128_i32 : i32
    %3 = tpu.assume_multiple %2, 128 : i32
    %4 = arith.index_cast %1 : i32 to index
    %c0 = arith.constant 0 : index
    %5 = vector.load %arg3[%4, %c0] : memref<128x128xbf16, #tpu.memory_space<vmem>>, vector<64x128xbf16>
    %6 = arith.index_cast %1 : i32 to index
    %c0_0 = arith.constant 0 : index
    %7 = vector.load %arg4[%6, %c0_0] : memref<128x128xbf16, #tpu.memory_space<vmem>>, vector<64x128xbf16>
    %c0_i32 = arith.constant 0 : i32
    %8 = arith.cmpi eq, %arg1, %c0_i32 : i32
    %9 = arith.extui %8 : i1 to i32
    %c0_i32_1 = arith.constant 0 : i32
    %10 = arith.cmpi ne, %9, %c0_i32_1 : i32
    scf.if %10 {
      %cst_36 = arith.constant 0.000000e+00 : f32
      %61 = vector.broadcast %cst_36 : f32 to vector<64x1xf32>
      %c0_37 = arith.constant 0 : index
      %c0_38 = arith.constant 0 : index
      %62 = vector.load %arg9[%c0_37, %c0_38] : memref<64x1xf32, #tpu.memory_space<vmem>>, vector<64x1xf32>
      tpu.vector_store %arg9[%c0_37, %c0_38], %61 {strides = array<i32>} : memref<64x1xf32, #tpu.memory_space<vmem>>, vector<64x1xf32>,
      %cst_39 = arith.constant 0.000000e+00 : f32
      %63 = vector.broadcast %cst_39 : f32 to vector<64x1xf32>
      %c0_40 = arith.constant 0 : index
      %c0_41 = arith.constant 0 : index
      %64 = vector.load %arg10[%c0_40, %c0_41] : memref<64x1xf32, #tpu.memory_space<vmem>>, vector<64x1xf32>
      tpu.vector_store %arg10[%c0_40, %c0_41], %63 {strides = array<i32>} : memref<64x1xf32, #tpu.memory_space<vmem>>, vector<64x1xf32>,
      %cst_42 = arith.constant 0.000000e+00 : f32
      %65 = vector.broadcast %cst_42 : f32 to vector<64x1xf32>
      %c0_43 = arith.constant 0 : index
      %c0_44 = arith.constant 0 : index
      %66 = vector.load %arg11[%c0_43, %c0_44] : memref<64x1xf32, #tpu.memory_space<vmem>>, vector<64x1xf32>
      tpu.vector_store %arg11[%c0_43, %c0_44], %65 {strides = array<i32>} : memref<64x1xf32, #tpu.memory_space<vmem>>, vector<64x1xf32>,
      %67 = arith.extf %5 : vector<64x128xbf16> to vector<64x128xf32>
      %68 = arith.extf %7 : vector<64x128xbf16> to vector<64x128xf32>
      %69 = arith.mulf %67, %67 : vector<64x128xf32>
      %cst_45 = arith.constant dense<0.000000e+00> : vector<64xf32>
      %70 = vector.multi_reduction <add>, %69, %cst_45 [1] : vector<64x128xf32> to vector<64xf32>
      %71 = vector.shape_cast %70 : vector<64xf32> to vector<64x1xf32>
      %c0_46 = arith.constant 0 : index
      %c0_47 = arith.constant 0 : index
      %72 = vector.load %arg12[%c0_46, %c0_47] : memref<64x1xf32, #tpu.memory_space<vmem>>, vector<64x1xf32>
      tpu.vector_store %arg12[%c0_46, %c0_47], %71 {strides = array<i32>} : memref<64x1xf32, #tpu.memory_space<vmem>>, vector<64x1xf32>,
      %73 = arith.mulf %68, %68 : vector<64x128xf32>
      %cst_48 = arith.constant dense<0.000000e+00> : vector<64xf32>
      %74 = vector.multi_reduction <add>, %73, %cst_48 [1] : vector<64x128xf32> to vector<64xf32>
      %75 = vector.shape_cast %74 : vector<64xf32> to vector<64x1xf32>
      %c0_49 = arith.constant 0 : index
      %c0_50 = arith.constant 0 : index
      %76 = vector.load %arg13[%c0_49, %c0_50] : memref<64x1xf32, #tpu.memory_space<vmem>>, vector<64x1xf32>
      tpu.vector_store %arg13[%c0_49, %c0_50], %75 {strides = array<i32>} : memref<64x1xf32, #tpu.memory_space<vmem>>, vector<64x1xf32>,
    } else {
    }
    %c0_2 = arith.constant 0 : index
    %c0_3 = arith.constant 0 : index
    %11 = vector.load %arg2[%c0_2, %c0_3] : memref<64x128xi8, #tpu.memory_space<vmem>>, vector<64x128xi8>
    %12 = arith.sitofp %11 : vector<64x128xi8> to vector<64x128xf32>
    %c0_4 = arith.constant 0 : index
    %c0_5 = arith.constant 0 : index
    %13 = vector.load %arg9[%c0_4, %c0_5] : memref<64x1xf32, #tpu.memory_space<vmem>>, vector<64x1xf32>
    %14 = arith.index_cast %3 : i32 to index
    %c0_6 = arith.constant 0 : index
    %15 = vector.load %arg3[%14, %c0_6] : memref<128x128xbf16, #tpu.memory_space<vmem>>, vector<128x128xbf16>
    %cst = arith.constant dense<0.000000e+00> : vector<64x128xf32>
    %16 = tpu.matmul %5, %15, %cst {dimension_numbers = #tpu.dot_dimension_numbers<[1], [1], [0], [0], [0, 0, 1, 0], [], []>} : vector<64x128xbf16>, vector<128x128xbf16>, vector<64x128xf32> -> vector<64x128xf32>
    %c0_7 = arith.constant 0 : index
    %c0_8 = arith.constant 0 : index
    %17 = vector.load %arg12[%c0_7, %c0_8] : memref<64x1xf32, #tpu.memory_space<vmem>>, vector<64x1xf32>
    %c0_9 = arith.constant 0 : index
    %c0_10 = arith.constant 0 : index
    %18 = vector.load %arg5[%c0_9, %c0_10] : memref<1x128xf32, #tpu.memory_space<vmem>>, vector<1x128xf32>
    %19 = vector.broadcast %17 : vector<64x1xf32> to vector<64x128xf32>
    %20 = vector.broadcast %18 : vector<1x128xf32> to vector<64x128xf32>
    %21 = arith.addf %19, %20 : vector<64x128xf32>
    %cst_11 = arith.constant 2.000000e+00 : f32
    %22 = vector.broadcast %cst_11 : f32 to vector<64x128xf32>
    %23 = arith.mulf %22, %16 : vector<64x128xf32>
    %24 = arith.subf %21, %23 : vector<64x128xf32>
    %cst_12 = arith.constant 0.000000e+00 : f32
    %25 = vector.broadcast %cst_12 : f32 to vector<64x128xf32>
    %26 = arith.maximumf %24, %25 : vector<64x128xf32>
    %27 = math.sqrt %26 : vector<64x128xf32>
    %28 = arith.mulf %12, %27 : vector<64x128xf32>
    %cst_13 = arith.constant dense<0.000000e+00> : vector<64xf32>
    %29 = vector.multi_reduction <add>, %28, %cst_13 [1] : vector<64x128xf32> to vector<64xf32>
    %30 = vector.shape_cast %29 : vector<64xf32> to vector<64x1xf32>
    %31 = arith.addf %13, %30 : vector<64x1xf32>
    %c0_14 = arith.constant 0 : index
    %c0_15 = arith.constant 0 : index
    %32 = vector.load %arg9[%c0_14, %c0_15] : memref<64x1xf32, #tpu.memory_space<vmem>>, vector<64x1xf32>
    tpu.vector_store %arg9[%c0_14, %c0_15], %31 {strides = array<i32>} : memref<64x1xf32, #tpu.memory_space<vmem>>, vector<64x1xf32>,
    %c0_16 = arith.constant 0 : index
    %c0_17 = arith.constant 0 : index
    %33 = vector.load %arg10[%c0_16, %c0_17] : memref<64x1xf32, #tpu.memory_space<vmem>>, vector<64x1xf32>
    %34 = arith.index_cast %3 : i32 to index
    %c0_18 = arith.constant 0 : index
    %35 = vector.load %arg4[%34, %c0_18] : memref<128x128xbf16, #tpu.memory_space<vmem>>, vector<128x128xbf16>
    %cst_19 = arith.constant dense<0.000000e+00> : vector<64x128xf32>
    %36 = tpu.matmul %7, %35, %cst_19 {dimension_numbers = #tpu.dot_dimension_numbers<[1], [1], [0], [0], [0, 0, 1, 0], [], []>} : vector<64x128xbf16>, vector<128x128xbf16>, vector<64x128xf32> -> vector<64x128xf32>
    %c0_20 = arith.constant 0 : index
    %c0_21 = arith.constant 0 : index
    %37 = vector.load %arg13[%c0_20, %c0_21] : memref<64x1xf32, #tpu.memory_space<vmem>>, vector<64x1xf32>
    %c0_22 = arith.constant 0 : index
    %c0_23 = arith.constant 0 : index
    %38 = vector.load %arg6[%c0_22, %c0_23] : memref<1x128xf32, #tpu.memory_space<vmem>>, vector<1x128xf32>
    %39 = vector.broadcast %37 : vector<64x1xf32> to vector<64x128xf32>
    %40 = vector.broadcast %38 : vector<1x128xf32> to vector<64x128xf32>
    %41 = arith.addf %39, %40 : vector<64x128xf32>
    %cst_24 = arith.constant 2.000000e+00 : f32
    %42 = vector.broadcast %cst_24 : f32 to vector<64x128xf32>
    %43 = arith.mulf %42, %36 : vector<64x128xf32>
    %44 = arith.subf %41, %43 : vector<64x128xf32>
    %cst_25 = arith.constant 0.000000e+00 : f32
    %45 = vector.broadcast %cst_25 : f32 to vector<64x128xf32>
    %46 = arith.maximumf %44, %45 : vector<64x128xf32>
    %47 = math.sqrt %46 : vector<64x128xf32>
    %48 = arith.mulf %12, %47 : vector<64x128xf32>
    %cst_26 = arith.constant dense<0.000000e+00> : vector<64xf32>
    %49 = vector.multi_reduction <add>, %48, %cst_26 [1] : vector<64x128xf32> to vector<64xf32>
    %50 = vector.shape_cast %49 : vector<64xf32> to vector<64x1xf32>
    %51 = arith.addf %33, %50 : vector<64x1xf32>
    %c0_27 = arith.constant 0 : index
    %c0_28 = arith.constant 0 : index
    %52 = vector.load %arg10[%c0_27, %c0_28] : memref<64x1xf32, #tpu.memory_space<vmem>>, vector<64x1xf32>
    tpu.vector_store %arg10[%c0_27, %c0_28], %51 {strides = array<i32>} : memref<64x1xf32, #tpu.memory_space<vmem>>, vector<64x1xf32>,
    %c0_29 = arith.constant 0 : index
    %c0_30 = arith.constant 0 : index
    %53 = vector.load %arg11[%c0_29, %c0_30] : memref<64x1xf32, #tpu.memory_space<vmem>>, vector<64x1xf32>
    %cst_31 = arith.constant dense<0.000000e+00> : vector<64xf32>
    %54 = vector.multi_reduction <add>, %12, %cst_31 [1] : vector<64x128xf32> to vector<64xf32>
    %55 = vector.shape_cast %54 : vector<64xf32> to vector<64x1xf32>
    %56 = arith.addf %53, %55 : vector<64x1xf32>
    %c0_32 = arith.constant 0 : index
    %c0_33 = arith.constant 0 : index
    %57 = vector.load %arg11[%c0_32, %c0_33] : memref<64x1xf32, #tpu.memory_space<vmem>>, vector<64x1xf32>
    tpu.vector_store %arg11[%c0_32, %c0_33], %56 {strides = array<i32>} : memref<64x1xf32, #tpu.memory_space<vmem>>, vector<64x1xf32>,
    %c0_i32_34 = arith.constant 0 : i32
    %58 = arith.cmpi eq, %arg1, %c0_i32_34 : i32
    %59 = arith.extui %58 : i1 to i32
    %c0_i32_35 = arith.constant 0 : i32
    %60 = arith.cmpi ne, %59, %c0_i32_35 : i32
    scf.if %60 {
      %c0_36 = arith.constant 0 : index
      %c0_37 = arith.constant 0 : index
      %61 = vector.load %arg11[%c0_36, %c0_37] : memref<64x1xf32, #tpu.memory_space<vmem>>, vector<64x1xf32>
      %cst_38 = arith.constant 1.000000e+00 : f32
      %62 = vector.broadcast %cst_38 : f32 to vector<64x1xf32>
      %63 = arith.maximumf %61, %62 : vector<64x1xf32>
      %cst_39 = arith.constant 0.000000e+00 : f32
      %64 = vector.broadcast %cst_39 : f32 to vector<64x1xf32>
      %65 = arith.cmpf ogt, %61, %64 : vector<64x1xf32>
      %c0_40 = arith.constant 0 : index
      %c0_41 = arith.constant 0 : index
      %66 = vector.load %arg9[%c0_40, %c0_41] : memref<64x1xf32, #tpu.memory_space<vmem>>, vector<64x1xf32>
      %67 = arith.divf %66, %63 : vector<64x1xf32>
      %cst_42 = arith.constant 0.000000e+00 : f32
      %68 = vector.broadcast %cst_42 : f32 to vector<64x1xf32>
      %69 = arith.select %65, %67, %68 : vector<64x1xi1>, vector<64x1xf32>
      %70 = vector.shape_cast %69 : vector<64x1xf32> to vector<64x1xf32>
      %71 = vector.broadcast %70 : vector<64x1xf32> to vector<64x128xf32>
      %c0_43 = arith.constant 0 : index
      %c0_44 = arith.constant 0 : index
      %72 = vector.load %arg7[%c0_43, %c0_44] : memref<64x128xf32, #tpu.memory_space<vmem>>, vector<64x128xf32>
      tpu.vector_store %arg7[%c0_43, %c0_44], %71 {strides = array<i32>} : memref<64x128xf32, #tpu.memory_space<vmem>>, vector<64x128xf32>,
      %cst_45 = arith.constant 0.000000e+00 : f32
      %73 = vector.broadcast %cst_45 : f32 to vector<64x1xf32>
      %74 = arith.cmpf ogt, %61, %73 : vector<64x1xf32>
      %c0_46 = arith.constant 0 : index
      %c0_47 = arith.constant 0 : index
      %75 = vector.load %arg10[%c0_46, %c0_47] : memref<64x1xf32, #tpu.memory_space<vmem>>, vector<64x1xf32>
      %76 = arith.divf %75, %63 : vector<64x1xf32>
      %cst_48 = arith.constant 0.000000e+00 : f32
      %77 = vector.broadcast %cst_48 : f32 to vector<64x1xf32>
      %78 = arith.select %74, %76, %77 : vector<64x1xi1>, vector<64x1xf32>
      %79 = vector.shape_cast %78 : vector<64x1xf32> to vector<64x1xf32>
      %80 = vector.broadcast %79 : vector<64x1xf32> to vector<64x128xf32>
      %c0_49 = arith.constant 0 : index
      %c0_50 = arith.constant 0 : index
      %81 = vector.load %arg8[%c0_49, %c0_50] : memref<64x128xf32, #tpu.memory_space<vmem>>, vector<64x128xf32>
      tpu.vector_store %arg8[%c0_49, %c0_50], %80 {strides = array<i32>} : memref<64x128xf32, #tpu.memory_space<vmem>>, vector<64x128xf32>,
    } else {
    }
    return
  }
  func.func @transform_0(%arg0: i32, %arg1: i32) -> (i32, i32) {
    %c0_i32 = arith.constant 0 : i32
    return %arg0, %arg1 : i32, i32
  }
  func.func @transform_1(%arg0: i32, %arg1: i32) -> (i32, i32) {
    %c0_i32 = arith.constant 0 : i32
    %c0_i32_0 = arith.constant 0 : i32
    %c0_i32_1 = arith.constant 0 : i32
    return %c0_i32, %c0_i32_0 : i32, i32
  }
  func.func @transform_2(%arg0: i32, %arg1: i32) -> (i32, i32) {
    %c0_i32 = arith.constant 0 : i32
    %c0_i32_0 = arith.constant 0 : i32
    %c0_i32_1 = arith.constant 0 : i32
    return %c0_i32, %c0_i32_0 : i32, i32
  }
  func.func @transform_3(%arg0: i32, %arg1: i32) -> (i32, i32) {
    %c0_i32 = arith.constant 0 : i32
    %c0_i32_0 = arith.constant 0 : i32
    return %c0_i32, %arg1 : i32, i32
  }
  func.func @transform_4(%arg0: i32, %arg1: i32) -> (i32, i32) {
    %c0_i32 = arith.constant 0 : i32
    %c0_i32_0 = arith.constant 0 : i32
    return %c0_i32, %arg1 : i32, i32
  }
  func.func @transform_5(%arg0: i32, %arg1: i32) -> (i32, i32) {
    %c0_i32 = arith.constant 0 : i32
    %c0_i32_0 = arith.constant 0 : i32
    return %arg0, %c0_i32 : i32, i32
  }
  func.func @transform_6(%arg0: i32, %arg1: i32) -> (i32, i32) {
    %c0_i32 = arith.constant 0 : i32
    %c0_i32_0 = arith.constant 0 : i32
    return %arg0, %c0_i32 : i32, i32
  }
}

</mosaic_0001>

<bundles_post_ra>
// kernel: adone_forward.3
= control target key start
LH: loop header
LB: loop body
LE: loop exit
PB: predicated region body
PF: predicated region fallthrough
CT: control target
= control target key end

     0   :  { %s1805_s21 = smov 0   ;;  %s1807_s22 = smov 0   ;;  %s2249_s0 = inlined_call_operand.vmem [shape: s8[128,128], index: 0, kind: input, shape index: {}]   ;;  %s2250_s1 = inlined_call_operand.vmem [shape: bf16[128,128], index: 1, kind: input, shape index: {}]   ;;  %s2251_s2 = inlined_call_operand.vmem [shape: bf16[128,128], index: 2, kind: input, shape index: {}]   ;;  %s2252_s3 = inlined_call_operand.vmem [shape: f32[1,128], index: 3, kind: input, shape index: {}]   ;;  %s2253_s4 = inlined_call_operand.vmem [shape: f32[1,128], index: 4, kind: input, shape index: {}]   ;;  %s2254_s5 = inlined_call_operand.vmem [shape: f32[128,128], index: 5, kind: output, shape index: {0}]   ;;  %s2255_s6 = inlined_call_operand.vmem [shape: f32[128,128], index: 6, kind: output, shape index: {1}]  }
   0x1   :  { %s1809_s23 = smov 0  }
   0x2 LB: > { %s29_s24 = sadd.s32 1, %s1762_s22  ;;  %p1526_p0 = scmp.ge.s32.totalorder %s1766_s23, 1  ;;  %s1766_s23 = sphi %s1809_s23, %s17_s23   ;;  %s1762_s22 = sphi %s1807_s22, %s2257_s22   ;;  %s1758_s21 = sphi %s1805_s21, %s2256_s21  }
   0x3   : > { %p31_p1 = scmp.ge.s32.totalorder %s29_s24, 2  ;;  %p249_p2 = scmp.lt.s32.totalorder %s1766_s23, 3 }
   0x5   : > { %s2259_s24 = smov (%p31_p1, %s29_s24), 0  ;;  %p250_p3 = pnand %p1526_p0, %p249_p2 }
   0x6   : > { %s1533_s25 = sshll.u32 (!%p250_p3), %s1758_s21, 6  ;;  %v1665_v0 = vld [vmem:[%s2250_s1] sm:$0xff] (!%p250_p3)   ;;  %v1666_v1 = vld [vmem:[%s2250_s1 + $0x8] sm:$0xff] (!%p250_p3)   ;;  %v1668_v14 = vld [vmem:[%s2250_s1 + $0x10] sm:$0xff] (!%p250_p3)   ;;  %v1768_v44 = vmov (!%p250_p3), 0   ;;  %vm349_vm0 = vcmask (!%p250_p3), 7168  }
   0x7   : > { %253 = sbr.rel (%p250_p3) target bundleno = 648 (0x288), region = 40  ;;  %s1829_s28 = sshra.s32 (!%p250_p3), %s1533_s25, 3  ;;  %1588 = vmatprep.subr.bf16.mxu0 (!%p250_p3), %v1665_v0  ;;  %v1667_v2 = vld [vmem:[%s2251_s2] sm:$0xff] (!%p250_p3)   ;;  %v1669_v10 = vld [vmem:[%s2251_s2 + $0x8] sm:$0xff] (!%p250_p3)   ;;  %v1671_v19 = vld [vmem:[%s2251_s2 + $0x10] sm:$0xff] (!%p250_p3)   ;;  %1662 = vset.pattern.permute.xlu0 (!%p250_p3), %v1768_v44 }
   0x8   : > { %s1534_s7 = sshll.u32 (!%p250_p3), %s1829_s28, 2  ;;  %1589 = vmatpush3.bf16.xpose.msra.mxu0 (!%p250_p3), %v1665_v0  ;;  %1612 = vmatprep.subr.bf16.mxu1 (!%p250_p3), %v1667_v2  ;;  %v1670_v25 = vld [vmem:[%s2250_s1 + $0x18] sm:$0xff] (!%p250_p3)   ;;  %v1672_v37 = vld [vmem:[%s2250_s1 + $0x20] sm:$0xff] (!%p250_p3)   ;;  %v1674_v49 = vld [vmem:[%s2250_s1 + $0x28] sm:$0xff] (!%p250_p3)   ;;  %s1527_s26 = sshll.u32 (!%p250_p3), %s1758_s21, 1 }
   0x9   : > { %s326_s12 = scalar_lea.vmem (!%p250_p3), %s2250_s1, %s1534_s7  ;;  %1590 = vmatprep.subr.bf16.mxu0 (!%p250_p3), %v1666_v1  ;;  %1613 = vmatpush3.bf16.xpose.msra.mxu1 (!%p250_p3), %v1667_v2  ;;  %s1859_s19 = scalar_lea.vmem (!%p250_p3), %s2251_s2, %s1534_s7  ;;  %v1673_v31 = vld [vmem:[%s2251_s2 + $0x18] sm:$0xff] (!%p250_p3)   ;;  %v1675_v43 = vld [vmem:[%s2251_s2 + $0x20] sm:$0xff] (!%p250_p3)   ;;  %v1677_v52 = vld [vmem:[%s2251_s2 + $0x28] sm:$0xff] (!%p250_p3)  }
   0xa   : > { %v1841_v3 = vld [vmem:[%s326_s12 + $0x8] sm:$0xff] (!%p250_p3)   ;;  %v327_v4 = vld [vmem:[%s326_s12] sm:$0xff] (!%p250_p3)   ;;  %v1845_v8 = vld [vmem:[%s326_s12 + $0x10] sm:$0xff] (!%p250_p3)   ;;  %1614 = vmatprep.subr.bf16.mxu1 (!%p250_p3), %v1669_v10  ;;  %1663 = vset.pattern.permute.xlu1 (!%p250_p3), %v1768_v44  ;;  %p294_p4 = scmp.lt.s32.totalorder (!%p250_p3), %s1527_s26, 3  ;;  %s1529_s11 = sshll.u32 (!%p250_p3), %s1758_s21, 3 }
   0xb   : > { %v376_v5 = vunpack.c.l.bf16 (!%p250_p3), %v1841_v3  ;;  %v374_v6 = vunpack.c.l.bf16 (!%p250_p3), %v327_v4  ;;  %v377_v7 = vunpack.c.h.bf16 (!%p250_p3), %v1841_v3  ;;  %v375_v9 = vunpack.c.h.bf16 (!%p250_p3), %v327_v4  ;;  %v1854_v17 = vld [vmem:[%s326_s12 + $0x18] sm:$0xff] (!%p250_p3)   ;;  %v338_v22 = vld [vmem:[%s1859_s19] sm:$0xff] (!%p250_p3)   ;;  %1604 = vmatprep.mubr.bf16.mxu0 (!%p250_p3), %v327_v4  ;;  %v340_v30 = vld [vmem:[%s1859_s19 + $0x8] sm:$0xff] (!%p250_p3)   ;;  %p309_p5 = scmp.lt.s32.totalorder (!%p250_p3), %s1529_s11, 15 }
   0xc   : > { %v379_v13 = vunpack.c.h.bf16 (!%p250_p3), %v1845_v8  ;;  %v378_v18 = vunpack.c.l.bf16 (!%p250_p3), %v1845_v8  ;;  %v381_v21 = vunpack.c.h.bf16 (!%p250_p3), %v1854_v17  ;;  %v380_v24 = vunpack.c.l.bf16 (!%p250_p3), %v1854_v17  ;;  %1628 = vmatprep.mubr.bf16.mxu1 (!%p250_p3), %v338_v22  ;;  %v342_v36 = vld [vmem:[%s1859_s19 + $0x10] sm:$0xff] (!%p250_p3)   ;;  %v344_v42 = vld [vmem:[%s1859_s19 + $0x18] sm:$0xff] (!%p250_p3)  }
   0xd   : > { %v392_v11 = vmul.f32 (!%p250_p3), %v376_v5, %v376_v5  ;;  %v390_v12 = vmul.f32 (!%p250_p3), %v374_v6, %v374_v6  ;;  %v393_v15 = vmul.f32 (!%p250_p3), %v377_v7, %v377_v7  ;;  %v391_v16 = vmul.f32 (!%p250_p3), %v375_v9, %v375_v9  ;;  %v1676_v53 = vld [vmem:[%s2250_s1 + $0x30] sm:$0xff] (!%p250_p3)   ;;  %v1678_v55 = vld [vmem:[%s2250_s1 + $0x38] sm:$0xff] (!%p250_p3)  }
   0xe   : > { %v395_v20 = vmul.f32 %v379_v13, %v379_v13  ;;  %v394_v23 = vmul.f32 %v378_v18, %v378_v18  ;;  %v397_v26 = vmul.f32 %v381_v21, %v381_v21  ;;  %v383_v27 = vunpack.c.h.bf16 %v338_v22  ;;  %v1679_v54 = vld [vmem:[%s2251_s2 + $0x30] sm:$0xff]   ;;  %v1681_v56 = vld [vmem:[%s2251_s2 + $0x38] sm:$0xff]   ;;  %s2261_s26 = smov (!%p294_p4, %s1527_s26), 3  ;;  %s2263_s11 = smov (!%p309_p5, %s1529_s11), 15 }
   0xf   : > { %402 = vadd.xlane.f32.xlu1 %v392_v11  ;;  %398 = vadd.xlane.f32.xlu0 %v390_v12  ;;  %v396_v28 = vmul.f32 %v380_v24, %v380_v24  ;;  %v382_v29 = vunpack.c.l.bf16 %v338_v22  ;;  %v385_v33 = vunpack.c.h.bf16 %v340_v30  ;;  %v384_v35 = vunpack.c.l.bf16 %v340_v30  ;;  %s1528_s27 = sshll.u32 %s2261_s26, 3  ;;  %s1530_s12 = sshll.u32 %s2263_s11, 3 }
  0x10   : > { %1591 = vmatpush3.bf16.xpose.msra.mxu0 %v1666_v1  ;;  %v423_v32 = vmul.f32 %v383_v27, %v383_v27  ;;  %v387_v39 = vunpack.c.h.bf16 %v342_v36  ;;  %v386_v41 = vunpack.c.l.bf16 %v342_v36  ;;  %v389_v46 = vunpack.c.h.bf16 %v344_v42  ;;  %s300_s30 = scalar_lea.vmem %s2249_s0, %s1528_s27  ;;  %s312_s15 = scalar_lea.vmem %s2254_s5, %s1530_s12 }
  0x11   : > { %1592 = vmatprep.subr.bf16.mxu0 %v1668_v14  ;;  %1615 = vmatpush3.bf16.xpose.msra.mxu1 %v1669_v10  ;;  %v422_v34 = vmul.f32 %v382_v29, %v382_v29  ;;  %v425_v38 = vmul.f32 %v385_v33, %v385_v33  ;;  %v424_v40 = vmul.f32 %v384_v35, %v384_v35  ;;  %v388_v48 = vunpack.c.l.bf16 %v344_v42  ;;  %s318_s18 = scalar_lea.vmem %s2255_s6, %s1530_s12 }
  0x12   : > { %1616 = vmatprep.subr.bf16.mxu1 %v1671_v19  ;;  %v427_v45 = vmul.f32 %v387_v39, %v387_v39  ;;  %v426_v47 = vmul.f32 %v386_v41, %v386_v41  ;;  %v429_v50 = vmul.f32 %v389_v46, %v389_v46 }
  0x13   : > { %404 = vadd.xlane.f32.xlu1 %v393_v15  ;;  %400 = vadd.xlane.f32.xlu0 %v391_v16  ;;  %v428_v51 = vmul.f32 %v388_v48, %v388_v48 }
  0x17   : > { %408 = vadd.xlane.f32.xlu1 %v395_v20  ;;  %406 = vadd.xlane.f32.xlu0 %v394_v23 }
  0x18   : > { %1593 = vmatpush3.bf16.xpose.msra.mxu0 %v1668_v14 }
  0x19   : > { %1594 = vmatprep.subr.bf16.mxu0 %v1670_v25  ;;  %1617 = vmatpush3.bf16.xpose.msra.mxu1 %v1671_v19 }
  0x1a   : > { %1618 = vmatprep.subr.bf16.mxu1 %v1673_v31 }
  0x1b   : > { %412 = vadd.xlane.f32.xlu1 %v397_v26  ;;  %410 = vadd.xlane.f32.xlu0 %v396_v28 }
  0x1f   : > { %432 = vadd.xlane.f32.xlu1 %v423_v32  ;;  %430 = vadd.xlane.f32.xlu0 %v422_v34 }
  0x20   : > { %1595 = vmatpush3.bf16.xpose.msra.mxu0 %v1670_v25  ;;  %v454_v25 = vld [vmem:[%s300_s30] sm:$0xff] }
  0x21   : > { %1596 = vmatprep.subr.bf16.mxu0 %v1672_v37  ;;  %1619 = vmatpush3.bf16.xpose.msra.mxu1 %v1673_v31  ;;  %v456_v26 = vunpack.c.0.s8 %v454_v25  ;;  %v457_v28 = vunpack.c.1.s8 %v454_v25  ;;  %v455_v31 = vld [vmem:[%s300_s30 + $0x8] sm:$0xff] }
  0x22   : > { %1620 = vmatprep.subr.bf16.mxu1 %v1675_v43  ;;  %v461_v33 = vunpack.c.1.s8 %v455_v31  ;;  %v463_v35 = vunpack.c.3.s8 %v455_v31 }
  0x23   : > { %436 = vadd.xlane.f32.xlu1 %v425_v38  ;;  %434 = vadd.xlane.f32.xlu0 %v424_v40  ;;  %v1924_v27 = vcvt.s32.f32 %v456_v26  ;;  %v1927_v29 = vcvt.s32.f32 %v457_v28  ;;  %v1769_v38 = vmov 0.0   ;;  %v460_v40 = vunpack.c.0.s8 %v455_v31 }
  0x24   : > { %v1933_v34 = vcvt.s32.f32 %v461_v33  ;;  %366 = vst.msk [vmem:[#allocation4] sm:$0xff] %vm349_vm0, %v1769_v38  ;;  %350 = vst.msk [vmem:[#allocation2] sm:$0xff] %vm349_vm0, %v1769_v38 }
  0x25   : > { %351 = vst.msk [vmem:[#allocation2 + $0x8] sm:$0xff] %vm349_vm0, %v1769_v38  ;;  %352 = vst.msk [vmem:[#allocation2 + $0x10] sm:$0xff] %vm349_vm0, %v1769_v38  ;;  %v1966_v41 = vcvt.s32.f32 %v460_v40 }
  0x26   : > { %353 = vst.msk [vmem:[#allocation2 + $0x18] sm:$0xff] %vm349_vm0, %v1769_v38  ;;  %354 = vst.msk [vmem:[#allocation2 + $0x20] sm:$0xff] %vm349_vm0, %v1769_v38 }
  0x27   : > { %440 = vadd.xlane.f32.xlu1 %v427_v45  ;;  %438 = vadd.xlane.f32.xlu0 %v426_v47  ;;  %355 = vst.msk [vmem:[#allocation2 + $0x28] sm:$0xff] %vm349_vm0, %v1769_v38  ;;  %356 = vst.msk [vmem:[#allocation2 + $0x30] sm:$0xff] %vm349_vm0, %v1769_v38 }
  0x28   : > { %1597 = vmatpush3.bf16.xpose.msra.mxu0 %v1672_v37  ;;  %v458_v37 = vunpack.c.2.s8 %v454_v25  ;;  %357 = vst.msk [vmem:[#allocation2 + $0x38] sm:$0xff] %vm349_vm0, %v1769_v38  ;;  %358 = vst.msk [vmem:[#allocation3] sm:$0xff] %vm349_vm0, %v1769_v38 }
  0x29   : > { %1598 = vmatprep.subr.bf16.mxu0 %v1674_v49  ;;  %1621 = vmatpush3.bf16.xpose.msra.mxu1 %v1675_v43  ;;  %359 = vst.msk [vmem:[#allocation3 + $0x8] sm:$0xff] %vm349_vm0, %v1769_v38  ;;  %360 = vst.msk [vmem:[#allocation3 + $0x10] sm:$0xff] %vm349_vm0, %v1769_v38 }
  0x2a   : > { %1622 = vmatprep.subr.bf16.mxu1 %v1677_v52  ;;  %361 = vst.msk [vmem:[#allocation3 + $0x18] sm:$0xff] %vm349_vm0, %v1769_v38  ;;  %362 = vst.msk [vmem:[#allocation3 + $0x20] sm:$0xff] %vm349_vm0, %v1769_v38  ;;  %v1963_v39 = vcvt.s32.f32 %v458_v37 }
  0x2b   : > { %444 = vadd.xlane.f32.xlu1 %v429_v50  ;;  %442 = vadd.xlane.f32.xlu0 %v428_v51  ;;  %363 = vst.msk [vmem:[#allocation3 + $0x28] sm:$0xff] %vm349_vm0, %v1769_v38  ;;  %364 = vst.msk [vmem:[#allocation3 + $0x30] sm:$0xff] %vm349_vm0, %v1769_v38 }
  0x2c   : > { %365 = vst.msk [vmem:[#allocation3 + $0x38] sm:$0xff] %vm349_vm0, %v1769_v38  ;;  %367 = vst.msk [vmem:[#allocation4 + $0x8] sm:$0xff] %vm349_vm0, %v1769_v38 }
  0x2d   : > { %368 = vst.msk [vmem:[#allocation4 + $0x10] sm:$0xff] %vm349_vm0, %v1769_v38  ;;  %369 = vst.msk [vmem:[#allocation4 + $0x18] sm:$0xff] %vm349_vm0, %v1769_v38 }
  0x2e   : > { %370 = vst.msk [vmem:[#allocation4 + $0x20] sm:$0xff] %vm349_vm0, %v1769_v38  ;;  %371 = vst.msk [vmem:[#allocation4 + $0x28] sm:$0xff] %vm349_vm0, %v1769_v38 }
  0x2f   : > { %372 = vst.msk [vmem:[#allocation4 + $0x30] sm:$0xff] %vm349_vm0, %v1769_v38  ;;  %373 = vst.msk [vmem:[#allocation4 + $0x38] sm:$0xff] %vm349_vm0, %v1769_v38 }
  0x30   : > { %1599 = vmatpush3.bf16.xpose.msra.mxu0 %v1674_v49 }
  0x31   : > { %1600 = vmatprep.subr.bf16.mxu0 %v1676_v53  ;;  %1623 = vmatpush3.bf16.xpose.msra.mxu1 %v1677_v52  ;;  %v1979_v52 = vld [vmem:[%s2252_s3] ss:$0 sm:$0xff] }
  0x32   : > { %1624 = vmatprep.subr.bf16.mxu1 %v1679_v54 }
  0x38   : > { %1601 = vmatpush3.bf16.xpose.msra.mxu0 %v1676_v53 }
  0x39   : > { %1602 = vmatprep.subr.bf16.mxu0 %v1678_v55  ;;  %1625 = vmatpush3.bf16.xpose.msra.mxu1 %v1679_v54 }
  0x3a   : > { %1626 = vmatprep.subr.bf16.mxu1 %v1681_v56 }
  0x40   : > { %1603 = vmatpush3.bf16.xpose.msra.mxu0 %v1678_v55 }
  0x41   : > { %1627 = vmatpush3.bf16.xpose.msra.mxu1 %v1681_v56 }
  0x47   : > { %1605 = vmatmul.mubr.bf16.vlgmr.msra.gmra.mrb[0].mxu0 %v1841_v3 }
  0x48   : > { %1608 = vmatprep.mubr.bf16.mxu0 %v1845_v8  ;;  %1629 = vmatmul.mubr.bf16.vlgmr.msra.gmra.mrb[0].mxu1 %v340_v30  ;;  %v459_v30 = vunpack.c.3.s8 %v454_v25 }
  0x49   : > { %1632 = vmatprep.mubr.bf16.mxu1 %v342_v36  ;;  %v1936_v36 = vcvt.s32.f32 %v463_v35 }
  0x4a   : > { %v1930_v32 = vcvt.s32.f32 %v459_v30 }
  0x4f   : > { %1609 = vmatmul.mubr.bf16.gmra.mrb[4].mxu0 %v1854_v17 }
  0x50   : > { %1633 = vmatmul.mubr.bf16.gmra.mrb[4].mxu1 %v344_v42  ;;  %v462_v42 = vunpack.c.2.s8 %v455_v31 }
  0x52   : > { %v1969_v43 = vcvt.s32.f32 %v462_v42 }
  0x9c   : > { %v403_v57 = vpop.xlane.xlu1 %402  ;;  %v399_v58 = vpop.xlane.xlu0 %398 }
  0x9d   : > { %416 = vst.msk [vmem:[#allocation5 + $0x10] sm:$0xff] %vm349_vm0, %v403_v57  ;;  %414 = vst.msk [vmem:[#allocation5] sm:$0xff] %vm349_vm0, %v399_v58 }
  0xa0   : > { %v405_v59 = vpop.xlane.xlu1 %404  ;;  %v401_v60 = vpop.xlane.xlu0 %400 }
  0xa1   : > { %417 = vst.msk [vmem:[#allocation5 + $0x18] sm:$0xff] %vm349_vm0, %v405_v59  ;;  %415 = vst.msk [vmem:[#allocation5 + $0x8] sm:$0xff] %vm349_vm0, %v401_v60 }
  0xa4   : > { %v409_v61 = vpop.xlane.xlu1 %408  ;;  %v637_v62 = vld [vmem:[#allocation5] sm:$0xff]  ;;  %v407_v63 = vpop.xlane.xlu0 %406  ;;  %v639_v3 = vld [vmem:[#allocation5 + $0x10] sm:$0xff] }
  0xa5   : > { %419 = vst.msk [vmem:[#allocation5 + $0x28] sm:$0xff] %vm349_vm0, %v409_v61  ;;  %648 = vperm.xlu0 %1662, %v637_v62   ;;  %418 = vst.msk [vmem:[#allocation5 + $0x20] sm:$0xff] %vm349_vm0, %v407_v63 }
  0xa8   : > { %v413_v0 = vpop.xlane.xlu1 %412  ;;  %v638_v1 = vld [vmem:[#allocation5 + $0x8] sm:$0xff]  ;;  %v411_v2 = vpop.xlane.xlu0 %410  ;;  %v640_v6 = vld [vmem:[#allocation5 + $0x18] sm:$0xff] }
  0xa9   : > { %421 = vst.msk [vmem:[#allocation5 + $0x38] sm:$0xff] %vm349_vm0, %v413_v0  ;;  %653 = vperm.xlu1 %1663, %v638_v1   ;;  %420 = vst.msk [vmem:[#allocation5 + $0x30] sm:$0xff] %vm349_vm0, %v411_v2 }
  0xac   : > { %v433_v4 = vpop.xlane.xlu1 %432  ;;  %v431_v5 = vpop.xlane.xlu0 %430  ;;  %v641_v9 = vld [vmem:[#allocation5 + $0x20] sm:$0xff]  ;;  %v642_v13 = vld [vmem:[#allocation5 + $0x28] sm:$0xff] }
  0xad   : > { %447 = vst.msk [vmem:[#allocation6 + $0x8] sm:$0xff] %vm349_vm0, %v433_v4  ;;  %658 = vperm.xlu1 %1663, %v639_v3   ;;  %446 = vst.msk [vmem:[#allocation6] sm:$0xff] %vm349_vm0, %v431_v5 }
  0xb0   : > { %v437_v7 = vpop.xlane.xlu1 %436  ;;  %v435_v8 = vpop.xlane.xlu0 %434  ;;  %v643_v17 = vld [vmem:[#allocation5 + $0x30] sm:$0xff]  ;;  %v644_v20 = vld [vmem:[#allocation5 + $0x38] sm:$0xff] }
  0xb1   : > { %449 = vst.msk [vmem:[#allocation6 + $0x18] sm:$0xff] %vm349_vm0, %v437_v7  ;;  %663 = vperm.xlu1 %1663, %v640_v6   ;;  %448 = vst.msk [vmem:[#allocation6 + $0x10] sm:$0xff] %vm349_vm0, %v435_v8 }
  0xb4   : > { %v441_v10 = vpop.xlane.xlu1 %440  ;;  %v985_v11 = vld [vmem:[#allocation6 + $0x8] sm:$0xff]  ;;  %v439_v12 = vpop.xlane.xlu0 %438  ;;  %v984_v21 = vld [vmem:[#allocation6] sm:$0xff] }
  0xb5   : > { %451 = vst.msk [vmem:[#allocation6 + $0x28] sm:$0xff] %vm349_vm0, %v441_v10  ;;  %1000 = vperm.xlu0 %1662, %v985_v11   ;;  %668 = vperm.xlu1 %1663, %v641_v9   ;;  %450 = vst.msk [vmem:[#allocation6 + $0x20] sm:$0xff] %vm349_vm0, %v439_v12 }
  0xb8   : > { %v445_v14 = vpop.xlane.xlu1 %444  ;;  %v987_v15 = vld [vmem:[#allocation6 + $0x18] sm:$0xff]  ;;  %v443_v16 = vpop.xlane.xlu0 %442  ;;  %v986_v22 = vld [vmem:[#allocation6 + $0x10] sm:$0xff] }
  0xb9   : > { %453 = vst.msk [vmem:[#allocation6 + $0x38] sm:$0xff] %vm349_vm0, %v445_v14  ;;  %1010 = vperm.xlu0 %1662, %v987_v15   ;;  %673 = vperm.xlu1 %1663, %v642_v13   ;;  %452 = vst.msk [vmem:[#allocation6 + $0x30] sm:$0xff] %vm349_vm0, %v443_v16  ;;  %v1994_v15 = vld [vmem:[%s2253_s4] ss:$0 sm:$0xff] }
  0xbc   : > { %v989_v18 = vld [vmem:[#allocation6 + $0x28] sm:$0xff]  ;;  %v988_v23 = vld [vmem:[#allocation6 + $0x20] sm:$0xff] }
  0xbd   : > { %1020 = vperm.xlu0 %1662, %v989_v18   ;;  %678 = vperm.xlu1 %1663, %v643_v17  }
  0xc0   : > { %v991_v19 = vld [vmem:[#allocation6 + $0x38] sm:$0xff]  ;;  %v990_v24 = vld [vmem:[#allocation6 + $0x30] sm:$0xff] }
  0xc1   : > { %1030 = vperm.xlu0 %1662, %v991_v19   ;;  %683 = vperm.xlu1 %1663, %v644_v20  }
  0xc5   : > { %995 = vperm.xlu1 %1663, %v984_v21  }
  0xc9   : > { %1005 = vperm.xlu1 %1663, %v986_v22  }
  0xcd   : > { %1015 = vperm.xlu1 %1663, %v988_v23  }
  0xd1   : > { %1025 = vperm.xlu1 %1663, %v990_v24  }
  0xe0   : > { %1175 = vadd.xlane.f32.xlu0 %v1924_v27 }
  0xe4   : > { %1177 = vadd.xlane.f32.xlu0 %v1927_v29 }
  0xe8   : > { %1181 = vadd.xlane.f32.xlu0 %v1930_v32 }
  0xec   : > { %1185 = vadd.xlane.f32.xlu0 %v1933_v34 }
  0xf0   : > { %1189 = vadd.xlane.f32.xlu0 %v1936_v36 }
  0xf5   : > { %1179 = vadd.xlane.f32.xlu1 %v1963_v39 }
  0xf9   : > { %1183 = vadd.xlane.f32.xlu1 %v1966_v41 }
  0xfd   : > { %1187 = vadd.xlane.f32.xlu1 %v1969_v43 }
 0x11a   : > { %v1606_v44 = vpop.f32.mrb[0].mxu0 }
 0x11b   : > { %v606_v45 = vpop.f32.mrb[1].mxu0  ;;  %v1972_v48 = vpop.f32.mrb[0].mxu1  ;;  %v702_v5 = vmul.f32 2.0, %v1606_v44 }
 0x11c   : > { %v1607_v46 = vpop.f32.mrb[2].mxu0  ;;  %v1974_v49 = vpop.f32.mrb[1].mxu1  ;;  %v700_v53 = vmul.f32 2.0, %v606_v45 }
 0x11d   : > { %v609_v47 = vpop.f32.mrb[3].mxu0  ;;  %v1631_v50 = vpop.f32.mrb[2].mxu1  ;;  %v703_v10 = vmul.f32 2.0, %v1607_v46 }
 0x11e   : > { %v956_v51 = vpop.f32.mrb[3].mxu1  ;;  %v701_v62 = vmul.f32 2.0, %v609_v47  ;;  %v1050_v23 = vmul.f32 2.0, %v1631_v50 }
 0x11f   : > { %v1048_v17 = vmul.f32 2.0, %v956_v51 }
 0x122   : > { %v1610_v54 = vpop.f32.mrb[4].mxu0 }
 0x123   : > { %v622_v56 = vpop.f32.mrb[5].mxu0  ;;  %v1982_v60 = vpop.f32.mrb[4].mxu1  ;;  %v706_v28 = vmul.f32 2.0, %v1610_v54 }
 0x124   : > { %v649_v55 = vpop.permute.xlu0 %648  ;;  %v1611_v58 = vpop.f32.mrb[6].mxu0  ;;  %v2001_v30 = vmul.f32 2.0, %v622_v56 }
 0x125   : > { %v692_v57 = vadd.f32 %v1979_v52, %v649_v55  ;;  %v625_v59 = vpop.f32.mrb[7].mxu0  ;;  %v1984_v63 = vpop.f32.mrb[5].mxu1  ;;  %v707_v45 = vmul.f32 2.0, %v1611_v58 }
 0x126   : > { %v1635_v1 = vpop.f32.mrb[6].mxu1  ;;  %v705_v26 = vmul.f32 2.0, %v625_v59 }
 0x127   : > { %v708_v61 = vsub.f32 %v692_v57, %v700_v53  ;;  %v972_v4 = vpop.f32.mrb[7].mxu1 }
 0x128   : > { %v654_v0 = vpop.permute.xlu1 %653  ;;  %v1052_v54 = vmul.f32 2.0, %v972_v4 }
 0x129   : > { %v716_v2 = vmax.f32 %v708_v61, 0.0  ;;  %v693_v3 = vadd.f32 %v1979_v52, %v654_v0 }
 0x12b   : > { %v709_v6 = vsub.f32 %v693_v3, %v701_v62  ;;  %1696 = vrsqrt.f32 %v716_v2  ;;  %vm726_vm1 = vcmp.eq.f32.partialorder %v716_v2, inf  ;;  %v729_v37 = vand.u32 2147483648, %v716_v2 }
 0x12c   : > { %v659_v7 = vpop.permute.xlu1 %658  ;;  %vm728_vm2 = vcmp.eq.f32.partialorder %v716_v2, 0.0 }
 0x12d   : > { %v717_v8 = vmax.f32 %v709_v6, 0.0  ;;  %v694_v9 = vadd.f32 %v1979_v52, %v659_v7 }
 0x12f   : > { %v710_v11 = vsub.f32 %v694_v9, %v702_v5  ;;  %1698 = vrsqrt.f32 %v717_v8  ;;  %vm733_vm3 = vcmp.eq.f32.partialorder %v717_v8, inf  ;;  %vm735_vm4 = vcmp.eq.f32.partialorder %v717_v8, 0.0 }
 0x130   : > { %v664_v12 = vpop.permute.xlu1 %663  ;;  %v736_v59 = vand.u32 2147483648, %v717_v8  ;;  %v1054_v5 = vmul.f32 2.0, %v1635_v1 }
 0x131   : > { %v1988_v13 = vmax.f32 %v710_v11, 0.0  ;;  %v695_v14 = vadd.f32 %v1979_v52, %v664_v12 }
 0x133   : > { %v711_v16 = vsub.f32 %v695_v14, %v703_v10  ;;  %1700 = vrsqrt.f32 %v1988_v13  ;;  %vm740_vm5 = vcmp.eq.f32.partialorder %v1988_v13, inf  ;;  %vm742_vm6 = vcmp.eq.f32.partialorder %v1988_v13, 0.0 }
 0x134   : > { %v669_v18 = vpop.permute.xlu1 %668  ;;  %v1001_v19 = vpop.permute.xlu0 %1000  ;;  %v743_v14 = vand.u32 2147483648, %v1988_v13 }
 0x135   : > { %v1697_v20 = vpop.eup %1696  ;;  %v1997_v21 = vmax.f32 %v711_v16, 0.0  ;;  %v1040_v22 = vadd.f32 %v1994_v15, %v1001_v19  ;;  %v696_v62 = vadd.f32 %v1979_v52, %v669_v18 }
 0x136   : > { %v725_v24 = vmul.f32 %v1697_v20, %v716_v2 }
 0x137   : > { %v1056_v25 = vsub.f32 %v1040_v22, %v1048_v17  ;;  %1702 = vrsqrt.f32 %v1997_v21  ;;  %v712_v16 = vsub.f32 %v696_v62, %v2001_v30  ;;  %vm747_vm7 = vcmp.eq.f32.partialorder %v1997_v21, inf }
 0x138   : > { %v674_v31 = vpop.permute.xlu1 %673  ;;  %v1011_v33 = vpop.permute.xlu0 %1010  ;;  %v727_v35 = vsel %vm726_vm1, %v716_v2, %v725_v24  ;;  %v750_v24 = vand.u32 2147483648, %v1997_v21  ;;  %vm749_vm8 = vcmp.eq.f32.partialorder %v1997_v21, 0.0  ;;  %v1047_v30 = vmul.f32 2.0, %v1974_v49 }
 0x139   : > { %v1699_v38 = vpop.eup %1698  ;;  %v2003_v40 = vmax.f32 %v1056_v25, 0.0  ;;  %v697_v42 = vadd.f32 %v1979_v52, %v674_v31  ;;  %v1042_v44 = vadd.f32 %v1994_v15, %v1011_v33  ;;  %v730_v46 = vsel %vm728_vm2, %v729_v37, %v727_v35 }
 0x13a   : > { %v732_v47 = vmul.f32 %v1699_v38, %v717_v8  ;;  %v780_v53 = vmul.f32 %v730_v46, %v1924_v27  ;;  %v2042_v37 = vmax.f32 %v712_v16, 0.0  ;;  %v1049_v49 = vmul.f32 2.0, %v1972_v48 }
 0x13b   : > { %v713_v50 = vsub.f32 %v697_v42, %v705_v26  ;;  %v1058_v51 = vsub.f32 %v1042_v44, %v1050_v23  ;;  %1704 = vrsqrt.f32 %v2003_v40  ;;  %vm1080_vm9 = vcmp.eq.f32.partialorder %v2003_v40, inf }
 0x13c   : > { %v679_v55 = vpop.permute.xlu1 %678  ;;  %v1021_v56 = vpop.permute.xlu0 %1020  ;;  %v734_v57 = vsel %vm733_vm3, %v717_v8, %v732_v47  ;;  %788 = vadd.xlane.f32.xlu1 %v780_v53  ;;  %vm1082_vm10 = vcmp.eq.f32.partialorder %v2003_v40, 0.0 }
 0x13d   : > { %v1701_v61 = vpop.eup %1700  ;;  %v2010_v0 = vmax.f32 %v1058_v51, 0.0  ;;  %v698_v58 = vadd.f32 %v1979_v52, %v679_v55  ;;  %v1044_v2 = vadd.f32 %v1994_v15, %v1021_v56  ;;  %v2014_v3 = vmax.f32 %v713_v50, 0.0 }
 0x13e   : > { %v737_v6 = vsel %vm735_vm4, %v736_v59, %v734_v57  ;;  %v739_v4 = vmul.f32 %v1701_v61, %v1988_v13  ;;  %v1051_v51 = vmul.f32 2.0, %v1984_v63 }
 0x13f   : > { %v714_v7 = vsub.f32 %v698_v58, %v706_v28  ;;  %v781_v9 = vmul.f32 %v737_v6, %v1927_v29  ;;  %1706 = vrsqrt.f32 %v2010_v0  ;;  %v1060_v8 = vsub.f32 %v1044_v2, %v1052_v54 }
 0x140   : > { %v684_v10 = vpop.permute.xlu1 %683  ;;  %v1031_v11 = vpop.permute.xlu0 %1030  ;;  %v741_v12 = vsel %vm740_vm5, %v1988_v13, %v739_v4  ;;  %1708 = vrsqrt.f32 %v2014_v3  ;;  %vm1094_vm11 = vcmp.eq.f32.partialorder %v2010_v0, inf  ;;  %vm1096_vm12 = vcmp.eq.f32.partialorder %v2010_v0, 0.0 }
 0x141   : > { %v1703_v1 = vpop.eup %1702  ;;  %v2024_v17 = vmax.f32 %v714_v7, 0.0  ;;  %v699_v18 = vadd.f32 %v1979_v52, %v684_v10  ;;  %790 = vadd.xlane.f32.xlu1 %v781_v9  ;;  %v1046_v19 = vadd.f32 %v1994_v15, %v1031_v11  ;;  %v744_v20 = vsel %vm742_vm6, %v743_v14, %v741_v12 }
 0x142   : > { %v746_v22 = vmul.f32 %v1703_v1, %v1997_v21  ;;  %v782_v13 = vmul.f32 %v744_v20, %v1963_v39  ;;  %v2034_v25 = vmax.f32 %v1060_v8, 0.0  ;;  %v1053_v11 = vmul.f32 2.0, %v1982_v60 }
 0x143   : > { %v715_v23 = vsub.f32 %v699_v18, %v707_v45  ;;  %1710 = vrsqrt.f32 %v2024_v17  ;;  %v1062_v38 = vsub.f32 %v1046_v19, %v1054_v5  ;;  %vm768_vm13 = vcmp.eq.f32.partialorder %v2024_v17, inf }
 0x144   : > { %v996_v52 = vpop.permute.xlu1 %995  ;;  %v748_v26 = vsel %vm747_vm7, %v1997_v21, %v746_v22  ;;  %792 = vadd.xlane.f32.xlu0 %v782_v13  ;;  %v1083_v21 = vand.u32 2147483648, %v2003_v40  ;;  %v771_v9 = vand.u32 2147483648, %v2024_v17  ;;  %vm770_vm14 = vcmp.eq.f32.partialorder %v2024_v17, 0.0 }
 0x145   : > { %v1705_v28 = vpop.eup %1704  ;;  %v2039_v31 = vmax.f32 %v715_v23, 0.0  ;;  %v1039_v33 = vadd.f32 %v1994_v15, %v996_v52  ;;  %v751_v35 = vsel %vm749_vm8, %v750_v24, %v748_v26  ;;  %v2057_v56 = vmax.f32 %v1062_v38, 0.0 }
 0x146   : > { %v783_v42 = vmul.f32 %v751_v35, %v1930_v32  ;;  %v1079_v44 = vmul.f32 %v1705_v28, %v2003_v40  ;;  %vm761_vm15 = vcmp.eq.f32.partialorder %v2014_v3, inf  ;;  %v764_v26 = vand.u32 2147483648, %v2014_v3 }
 0x147   : > { %v1055_v45 = vsub.f32 %v1039_v33, %v1047_v30  ;;  %1712 = vrsqrt.f32 %v2039_v31  ;;  %vm775_vm1 = vcmp.eq.f32.partialorder %v2039_v31, inf  ;;  %vm777_vm2 = vcmp.eq.f32.partialorder %v2039_v31, 0.0 }
 0x148   : > { %v1006_v46 = vpop.permute.xlu1 %1005  ;;  %794 = vadd.xlane.f32.xlu1 %v783_v42  ;;  %v1081_v47 = vsel %vm1080_vm9, %v2003_v40, %v1079_v44  ;;  %1714 = vrsqrt.f32 %v2034_v25  ;;  %v1097_v40 = vand.u32 2147483648, %v2010_v0  ;;  %vm763_vm3 = vcmp.eq.f32.partialorder %v2014_v3, 0.0 }
 0x149   : > { %v1707_v50 = vpop.eup %1706  ;;  %v2054_v53 = vmax.f32 %v1055_v45, 0.0  ;;  %v1041_v54 = vadd.f32 %v1994_v15, %v1006_v46  ;;  %v1084_v55 = vsel %vm1082_vm10, %v1083_v21, %v1081_v47  ;;  %1716 = vrsqrt.f32 %v2042_v37 }
 0x14a   : > { %v1128_v48 = vmul.f32 %v1084_v55, %v1927_v29  ;;  %v1093_v57 = vmul.f32 %v1707_v50, %v2010_v0  ;;  %v1709_v63 = vpop.eup %1708  ;;  %vm1108_vm4 = vcmp.eq.f32.partialorder %v2034_v25, inf  ;;  %v1111_v21 = vand.u32 2147483648, %v2034_v25 }
 0x14b   : > { %v1057_v59 = vsub.f32 %v1041_v54, %v1049_v49  ;;  %1718 = vrsqrt.f32 %v2054_v53  ;;  %v760_v10 = vmul.f32 %v1709_v63, %v2014_v3  ;;  %vm1073_vm5 = vcmp.eq.f32.partialorder %v2054_v53, inf }
 0x14c   : > { %v1016_v61 = vpop.permute.xlu1 %1015  ;;  %1137 = vadd.xlane.f32.xlu1 %v1128_v48  ;;  %v1095_v62 = vsel %vm1094_vm11, %v2010_v0, %v1093_v57  ;;  %1720 = vrsqrt.f32 %v2057_v56  ;;  %vm1075_vm6 = vcmp.eq.f32.partialorder %v2054_v53, 0.0  ;;  %vm754_vm7 = vcmp.eq.f32.partialorder %v2042_v37, inf }
 0x14d   : > { %v1711_v58 = vpop.eup %1710  ;;  %v2067_v29 = vmax.f32 %v1057_v59, 0.0  ;;  %v1043_v2 = vadd.f32 %v1994_v15, %v1016_v61  ;;  %v1098_v5 = vsel %vm1096_vm12, %v1097_v40, %v1095_v62  ;;  %vm1110_vm8 = vcmp.eq.f32.partialorder %v2034_v25, 0.0 }
 0x14e   : > { %v1130_v6 = vmul.f32 %v1098_v5, %v1930_v32  ;;  %v767_v4 = vmul.f32 %v1711_v58, %v2024_v17  ;;  %vm1122_vm10 = vcmp.eq.f32.partialorder %v2057_v56, inf  ;;  %v1125_v57 = vand.u32 2147483648, %v2057_v56 }
 0x14f   : > { %v1059_v7 = vsub.f32 %v1043_v2, %v1051_v51  ;;  %1722 = vrsqrt.f32 %v2067_v29  ;;  %vm1087_vm9 = vcmp.eq.f32.partialorder %v2067_v29, inf  ;;  %v1090_v51 = vand.u32 2147483648, %v2067_v29 }
 0x150   : > { %v1026_v0 = vpop.permute.xlu1 %1025  ;;  %1141 = vadd.xlane.f32.xlu1 %v1130_v6  ;;  %v769_v8 = vsel %vm768_vm13, %v2024_v17, %v767_v4  ;;  %v778_v17 = vand.u32 2147483648, %v2039_v31  ;;  %vm1089_vm11 = vcmp.eq.f32.partialorder %v2067_v29, 0.0  ;;  %vm756_vm12 = vcmp.eq.f32.partialorder %v2042_v37, 0.0 }
 0x151   : > { %v1713_v32 = vpop.eup %1712  ;;  %v2080_v12 = vmax.f32 %v1059_v7, 0.0  ;;  %v1045_v14 = vadd.f32 %v1994_v15, %v1026_v0  ;;  %v772_v1 = vsel %vm770_vm14, %v771_v9, %v769_v8  ;;  %v762_v15 = vsel %vm761_vm15, %v2014_v3, %v760_v10  ;;  %v1167_v0 = vld [vmem:[#allocation4] sm:$0xff] }
 0x152   : > { %v1715_v16 = vpop.eup %1714  ;;  %v786_v18 = vmul.f32 %v772_v1, %v1969_v43  ;;  %v774_v19 = vmul.f32 %v1713_v32, %v2039_v31  ;;  %v765_v33 = vsel %vm763_vm3, %v764_v26, %v762_v15  ;;  %vm1124_vm13 = vcmp.eq.f32.partialorder %v2057_v56, 0.0  ;;  %v1168_v32 = vld [vmem:[#allocation4 + $0x8] sm:$0xff] }
 0x153   : > { %v1061_v20 = vsub.f32 %v1045_v14, %v1053_v11  ;;  %v1717_v60 = vpop.eup %1716  ;;  %v1107_v23 = vmul.f32 %v1715_v16, %v2034_v25  ;;  %1724 = vrsqrt.f32 %v2080_v12  ;;  %v785_v47 = vmul.f32 %v765_v33, %v1933_v34  ;;  %v1170_v14 = vld [vmem:[#allocation4 + $0x18] sm:$0xff]  ;;  %v1172_v16 = vld [vmem:[#allocation4 + $0x28] sm:$0xff] }
 0x154   : > { %800 = vadd.xlane.f32.xlu0 %v786_v18  ;;  %v776_v22 = vsel %vm775_vm1, %v2039_v31, %v774_v19  ;;  %v1076_v31 = vand.u32 2147483648, %v2054_v53  ;;  %v753_v44 = vmul.f32 %v1717_v60, %v2042_v37  ;;  %vm1101_vm14 = vcmp.eq.f32.partialorder %v2080_v12, inf  ;;  %v1169_v60 = vld [vmem:[#allocation4 + $0x10] sm:$0xff] }
 0x155   : > { %v1719_v13 = vpop.eup %1718  ;;  %v2093_v24 = vmax.f32 %v1061_v20, 0.0  ;;  %v779_v52 = vsel %vm777_vm2, %v778_v17, %v776_v22  ;;  %v1109_v42 = vsel %vm1108_vm4, %v2034_v25, %v1107_v23  ;;  %v757_v25 = vand.u32 2147483648, %v2042_v37  ;;  %v1171_v23 = vld [vmem:[#allocation4 + $0x20] sm:$0xff] }
 0x156   : > { %v787_v28 = vmul.f32 %v779_v52, %v1936_v36  ;;  %v1072_v30 = vmul.f32 %v1719_v13, %v2054_v53  ;;  %v1721_v35 = vpop.eup %1720  ;;  %v1104_v5 = vand.u32 2147483648, %v2080_v12  ;;  %vm1103_vm15 = vcmp.eq.f32.partialorder %v2080_v12, 0.0  ;;  %v1173_v52 = vld [vmem:[#allocation4 + $0x30] sm:$0xff] }
 0x157   : > { %1726 = vrsqrt.f32 %v2093_v24  ;;  %v1121_v49 = vmul.f32 %v1721_v35, %v2057_v56  ;;  %vm1115_vm1 = vcmp.eq.f32.partialorder %v2093_v24, inf  ;;  %v1118_v4 = vand.u32 2147483648, %v2093_v24  ;;  %v472_v35 = vld [vmem:[#allocation2] sm:$0xff] }
 0x158   : > { %802 = vadd.xlane.f32.xlu1 %v787_v28  ;;  %v1074_v38 = vsel %vm1073_vm5, %v2054_v53, %v1072_v30  ;;  %v1112_v53 = vsel %vm1110_vm8, %v1111_v21, %v1109_v42  ;;  %vm1117_vm2 = vcmp.eq.f32.partialorder %v2093_v24, 0.0 }
 0x159   : > { %v1723_v3 = vpop.eup %1722  ;;  %v1077_v45 = vsel %vm1075_vm6, %v1076_v31, %v1074_v38  ;;  %v1123_v55 = vsel %vm1122_vm10, %v2057_v56, %v1121_v49  ;;  %v1132_v63 = vmul.f32 %v1112_v53, %v1933_v34 }
 0x15a   : > { %v1127_v46 = vmul.f32 %v1077_v45, %v1924_v27  ;;  %v1086_v50 = vmul.f32 %v1723_v3, %v2067_v29  ;;  %v755_v27 = vsel %vm754_vm7, %v2042_v37, %v753_v44  ;;  %v1126_v62 = vsel %vm1124_vm13, %v1125_v57, %v1123_v55  ;;  %v473_v45 = vld [vmem:[#allocation2 + $0x8] sm:$0xff]  ;;  %v475_v55 = vld [vmem:[#allocation2 + $0x18] sm:$0xff] }
 0x15b   : > { %v758_v61 = vsel %vm756_vm12, %v757_v25, %v755_v27  ;;  %v1134_v34 = vmul.f32 %v1126_v62, %v1936_v36 }
 0x15c   : > { %1135 = vadd.xlane.f32.xlu0 %v1127_v46  ;;  %798 = vadd.xlane.f32.xlu1 %v785_v47  ;;  %v1088_v54 = vsel %vm1087_vm9, %v2067_v29, %v1086_v50 }
 0x15d   : > { %v1091_v48 = vsel %vm1089_vm11, %v1090_v51, %v1088_v54  ;;  %v1725_v59 = vpop.eup %1724  ;;  %v474_v51 = vld [vmem:[#allocation2 + $0x10] sm:$0xff] }
 0x15e   : > { %v1129_v40 = vmul.f32 %v1091_v48, %v1963_v39  ;;  %v1100_v58 = vmul.f32 %v1725_v59, %v2080_v12  ;;  %v784_v39 = vmul.f32 %v758_v61, %v1966_v41  ;;  %v822_v61 = vld [vmem:[#allocation3 + $0x8] sm:$0xff] }
 0x160   : > { %1139 = vadd.xlane.f32.xlu0 %v1129_v40  ;;  %1145 = vadd.xlane.f32.xlu1 %v1132_v63  ;;  %v1102_v2 = vsel %vm1101_vm14, %v2080_v12, %v1100_v58 }
 0x161   : > { %v1727_v29 = vpop.eup %1726  ;;  %v1105_v56 = vsel %vm1103_vm15, %v1104_v5, %v1102_v2 }
 0x162   : > { %v1114_v37 = vmul.f32 %v1727_v29, %v2093_v24  ;;  %v1131_v7 = vmul.f32 %v1105_v56, %v1966_v41 }
 0x164   : > { %796 = vadd.xlane.f32.xlu0 %v784_v39  ;;  %1149 = vadd.xlane.f32.xlu1 %v1134_v34  ;;  %v1116_v6 = vsel %vm1115_vm1, %v2093_v24, %v1114_v37  ;;  %v824_v37 = vld [vmem:[#allocation3 + $0x18] sm:$0xff] }
 0x165   : > { %v1119_v9 = vsel %vm1117_vm2, %v1118_v4, %v1116_v6 }
 0x166   : > { %v1133_v36 = vmul.f32 %v1119_v9, %v1969_v43  ;;  %v1174_v43 = vld [vmem:[#allocation4 + $0x38] sm:$0xff] }
 0x168   : > { %1143 = vadd.xlane.f32.xlu0 %v1131_v7 }
 0x16c   : > { %1147 = vadd.xlane.f32.xlu0 %v1133_v36 }
 0x16d   : > { %v1176_v8 = vpop.xlane.xlu0 %1175 }
 0x16e   : > { %v1191_v10 = vadd.f32 %v1176_v8, %v1167_v0 }
 0x170   : > { %1199 = vst.msk [vmem:[#allocation4] sm:$0xff] %vm349_vm0, %v1191_v10  ;;  %v478_v10 = vld [vmem:[#allocation2 + $0x30] sm:$0xff] }
 0x171   : > { %v1178_v11 = vpop.xlane.xlu0 %1177 }
 0x172   : > { %v1192_v12 = vadd.f32 %v1178_v11, %v1168_v32 }
 0x174   : > { %1200 = vst.msk [vmem:[#allocation4 + $0x8] sm:$0xff] %vm349_vm0, %v1192_v12 }
 0x175   : > { %v1182_v1 = vpop.xlane.xlu0 %1181 }
 0x176   : > { %v1194_v41 = vadd.f32 %v1182_v1, %v1170_v14 }
 0x177   : > { %v2149_v30 = vld [vmem:[#allocation4] sm:$0xff] }
 0x178   : > { %1202 = vst.msk [vmem:[#allocation4 + $0x18] sm:$0xff] %vm349_vm0, %v1194_v41  ;;  %v1218_v31 = vmax.f32 %v2149_v30, 1.0  ;;  %vm1226_vm3 = vcmp.gt.f32.partialorder %v2149_v30, 0.0 }
 0x179   : > { %v1186_v18 = vpop.xlane.xlu0 %1185 }
 0x17a   : > { %v1196_v19 = vadd.f32 %v1186_v18, %v1172_v16  ;;  %1728 = vrcp.f32 %v1218_v31  ;;  %v479_v18 = vld [vmem:[#allocation2 + $0x38] sm:$0xff] }
 0x17b   : > { %v2152_v33 = vld [vmem:[#allocation4 + $0x8] sm:$0xff] }
 0x17c   : > { %1204 = vst.msk [vmem:[#allocation4 + $0x28] sm:$0xff] %vm349_vm0, %v1196_v19  ;;  %v1219_v38 = vmax.f32 %v2152_v33, 1.0  ;;  %vm1227_vm4 = vcmp.gt.f32.partialorder %v2152_v33, 0.0  ;;  %v823_v33 = vld [vmem:[#allocation3 + $0x10] sm:$0xff] }
 0x17d   : > { %v1190_v20 = vpop.xlane.xlu0 %1189 }
 0x17e   : > { %v1198_v17 = vadd.f32 %v1190_v20, %v1174_v43  ;;  %1730 = vrcp.f32 %v1219_v38 }
 0x17f   : > { %v2158_v49 = vld [vmem:[#allocation4 + $0x18] sm:$0xff] }
 0x180   : > { %1206 = vst.msk [vmem:[#allocation4 + $0x38] sm:$0xff] %vm349_vm0, %v1198_v17  ;;  %v1221_v50 = vmax.f32 %v2158_v49, 1.0  ;;  %vm1229_vm6 = vcmp.gt.f32.partialorder %v2158_v49, 0.0 }
 0x182   : > { %v1180_v22 = vpop.xlane.xlu1 %1179 }
 0x183   : > { %v1193_v15 = vadd.f32 %v1180_v22, %v1169_v60  ;;  %v2191_v16 = vld [vmem:[#allocation4 + $0x28] sm:$0xff] }
 0x184   : > { %v2163_v53 = vpop.eup %1728  ;;  %v1223_v17 = vmax.f32 %v2191_v16, 1.0  ;;  %vm1231_vm9 = vcmp.gt.f32.partialorder %v2191_v16, 0.0 }
 0x185   : > { %1201 = vst.msk [vmem:[#allocation4 + $0x10] sm:$0xff] %vm349_vm0, %v1193_v15  ;;  %v821_v15 = vld [vmem:[#allocation3] sm:$0xff] }
 0x186   : > { %v1184_v13 = vpop.xlane.xlu1 %1183 }
 0x187   : > { %v1195_v24 = vadd.f32 %v1184_v13, %v1171_v23  ;;  %v2180_v4 = vld [vmem:[#allocation4 + $0x38] sm:$0xff]  ;;  %v477_v23 = vld [vmem:[#allocation2 + $0x28] sm:$0xff] }
 0x188   : > { %v1731_v59 = vpop.eup %1730  ;;  %v1225_v11 = vmax.f32 %v2180_v4, 1.0  ;;  %vm1233_vm8 = vcmp.gt.f32.partialorder %v2180_v4, 0.0 }
 0x189   : > { %1203 = vst.msk [vmem:[#allocation4 + $0x20] sm:$0xff] %vm349_vm0, %v1195_v24 }
 0x18a   : > { %v1188_v26 = vpop.xlane.xlu1 %1187 }
 0x18b   : > { %v1197_v28 = vadd.f32 %v1188_v26, %v1173_v52 }
 0x18c   : > { %v2155_v42 = vld [vmem:[#allocation4 + $0x10] sm:$0xff] }
 0x18d   : > { %1205 = vst.msk [vmem:[#allocation4 + $0x30] sm:$0xff] %vm349_vm0, %v1197_v28  ;;  %v1220_v21 = vmax.f32 %v2155_v42, 1.0  ;;  %vm1228_vm5 = vcmp.gt.f32.partialorder %v2155_v42, 0.0 }
 0x18f   : > { %1732 = vrcp.f32 %v1220_v21 }
 0x190   : > { %1734 = vrcp.f32 %v1221_v50 }
 0x194   : > { %v2172_v58 = vld [vmem:[#allocation4 + $0x30] sm:$0xff] }
 0x195   : > { %v1224_v56 = vmax.f32 %v2172_v58, 1.0  ;;  %vm1232_vm7 = vcmp.gt.f32.partialorder %v2172_v58, 0.0 }
 0x197   : > { %1736 = vrcp.f32 %v1224_v56 }
 0x198   : > { %1738 = vrcp.f32 %v1225_v11 }
 0x199   : > { %v2174_v5 = vpop.eup %1732  ;;  %1740 = vrcp.f32 %v1223_v17 }
 0x19a   : > { %v1735_v7 = vpop.eup %1734 }
 0x1a1   : > { %v2198_v52 = vpop.eup %1736 }
 0x1c9   : > { %v789_v44 = vpop.xlane.xlu1 %788 }
 0x1ca   : > { %v804_v3 = vadd.f32 %v789_v44, %v472_v35  ;;  %v2202_v44 = vld [vmem:[#allocation4 + $0x20] sm:$0xff] }
 0x1cb   : > { %v1222_v49 = vmax.f32 %v2202_v44, 1.0  ;;  %vm1230_vm10 = vcmp.gt.f32.partialorder %v2202_v44, 0.0 }
 0x1cc   : > { %813 = vst.msk [vmem:[#allocation2] sm:$0xff] %vm349_vm0, %v804_v3  ;;  %v826_v3 = vld [vmem:[#allocation3 + $0x28] sm:$0xff] }
 0x1cd   : > { %1742 = vrcp.f32 %v1222_v49 }
 0x1ce   : > { %v791_v46 = vpop.xlane.xlu1 %790 }
 0x1cf   : > { %v805_v47 = vadd.f32 %v791_v46, %v473_v45  ;;  %v1739_v46 = vpop.eup %1738 }
 0x1d1   : > { %814 = vst.msk [vmem:[#allocation2 + $0x8] sm:$0xff] %vm349_vm0, %v805_v47  ;;  %v793_v54 = vpop.xlane.xlu0 %792 }
 0x1d2   : > { %v806_v27 = vadd.f32 %v793_v54, %v474_v51 }
 0x1d3   : > { %v1234_v48 = vld [vmem:[#allocation2] sm:$0xff] }
 0x1d4   : > { %815 = vst.msk [vmem:[#allocation2 + $0x10] sm:$0xff] %vm349_vm0, %v806_v27  ;;  %v1243_v57 = vmul.f32 %v2163_v53, %v1234_v48  ;;  %v828_v48 = vld [vmem:[#allocation3 + $0x38] sm:$0xff] }
 0x1d5   : > { %v795_v25 = vpop.xlane.xlu1 %794 }
 0x1d6   : > { %v807_v40 = vadd.f32 %v795_v25, %v475_v55  ;;  %v1258_v63 = vsel %vm1226_vm3, %v1243_v57, 0.0  ;;  %v476_v55 = vld [vmem:[#allocation2 + $0x20] sm:$0xff] }
 0x1d7   : > { %1268 = vperm.xlu0 %1662, %v1258_v63  }
 0x1d8   : > { %816 = vst.msk [vmem:[#allocation2 + $0x18] sm:$0xff] %vm349_vm0, %v807_v40  ;;  %v1235_v62 = vld [vmem:[#allocation2 + $0x8] sm:$0xff] }
 0x1d9   : > { %v1138_v29 = vpop.xlane.xlu1 %1137  ;;  %v1245_v2 = vmul.f32 %v1731_v59, %v1235_v62 }
 0x1da   : > { %v1152_v39 = vadd.f32 %v1138_v29, %v822_v61  ;;  %v1741_v29 = vpop.eup %1740 }
 0x1db   : > { %v1259_v34 = vsel %vm1227_vm4, %v1245_v2, 0.0  ;;  %v1236_v6 = vld [vmem:[#allocation2 + $0x10] sm:$0xff]  ;;  %v825_v2 = vld [vmem:[#allocation3 + $0x20] sm:$0xff] }
 0x1dc   : > { %1160 = vst.msk [vmem:[#allocation3 + $0x8] sm:$0xff] %vm349_vm0, %v1152_v39  ;;  %1273 = vperm.xlu1 %1663, %v1259_v34   ;;  %v1247_v36 = vmul.f32 %v2174_v5, %v1236_v6 }
 0x1dd   : > { %v1142_v9 = vpop.xlane.xlu1 %1141 }
 0x1de   : > { %v1154_v0 = vadd.f32 %v1142_v9, %v824_v37  ;;  %v1260_v8 = vsel %vm1228_vm5, %v1247_v36, 0.0 }
 0x1df   : > { %v1237_v32 = vld [vmem:[#allocation2 + $0x18] sm:$0xff] }
 0x1e0   : > { %1162 = vst.msk [vmem:[#allocation3 + $0x18] sm:$0xff] %vm349_vm0, %v1154_v0  ;;  %1278 = vperm.xlu1 %1663, %v1260_v8   ;;  %v1249_v12 = vmul.f32 %v1735_v7, %v1237_v32  ;;  %v827_v0 = vld [vmem:[#allocation3 + $0x30] sm:$0xff] }
 0x1e1   : > { %v801_v14 = vpop.xlane.xlu0 %800 }
 0x1e2   : > { %v810_v1 = vadd.f32 %v801_v14, %v478_v10  ;;  %v1261_v41 = vsel %vm1229_vm6, %v1249_v12, 0.0 }
 0x1e3   : > { %1283 = vperm.xlu0 %1662, %v1261_v41   ;;  %v1315_v19 = vld [vmem:[#allocation3 + $0x8] sm:$0xff]  ;;  %v1743_v41 = vpop.eup %1742 }
 0x1e4   : > { %819 = vst.msk [vmem:[#allocation2 + $0x30] sm:$0xff] %vm349_vm0, %v810_v1  ;;  %v1323_v43 = vmul.f32 %v1731_v59, %v1315_v19 }
 0x1e5   : > { %v803_v20 = vpop.xlane.xlu1 %802 }
 0x1e6   : > { %v811_v60 = vadd.f32 %v803_v20, %v479_v18  ;;  %v1331_v22 = vsel %vm1227_vm4, %v1323_v43, 0.0 }
 0x1e7   : > { %1345 = vperm.xlu0 %1662, %v1331_v22   ;;  %v1317_v13 = vld [vmem:[#allocation3 + $0x18] sm:$0xff] }
 0x1e8   : > { %820 = vst.msk [vmem:[#allocation2 + $0x38] sm:$0xff] %vm349_vm0, %v811_v60  ;;  %v1325_v24 = vmul.f32 %v1735_v7, %v1317_v13 }
 0x1e9   : > { %v1136_v26 = vpop.xlane.xlu0 %1135  ;;  %v799_v28 = vpop.xlane.xlu1 %798 }
 0x1ea   : > { %v1151_v31 = vadd.f32 %v1136_v26, %v821_v15  ;;  %v809_v35 = vadd.f32 %v799_v28, %v477_v23  ;;  %v1333_v38 = vsel %vm1229_vm6, %v1325_v24, 0.0 }
 0x1eb   : > { %1355 = vperm.xlu0 %1662, %v1333_v38   ;;  %v1240_v45 = vld [vmem:[#allocation2 + $0x30] sm:$0xff] }
 0x1ec   : > { %1159 = vst.msk [vmem:[#allocation3] sm:$0xff] %vm349_vm0, %v1151_v31  ;;  %818 = vst.msk [vmem:[#allocation2 + $0x28] sm:$0xff] %vm349_vm0, %v809_v35  ;;  %v1255_v21 = vmul.f32 %v2198_v52, %v1240_v45 }
 0x1ed   : > { %v1140_v47 = vpop.xlane.xlu0 %1139  ;;  %v1146_v50 = vpop.xlane.xlu1 %1145 }
 0x1ee   : > { %v1153_v51 = vadd.f32 %v1140_v47, %v823_v33  ;;  %v1156_v54 = vadd.f32 %v1146_v50, %v826_v3  ;;  %v1264_v27 = vsel %vm1232_vm7, %v1255_v21, 0.0 }
 0x1ef   : > { %1298 = vperm.xlu1 %1663, %v1264_v27   ;;  %v1241_v25 = vld [vmem:[#allocation2 + $0x38] sm:$0xff] }
 0x1f0   : > { %1161 = vst.msk [vmem:[#allocation3 + $0x10] sm:$0xff] %vm349_vm0, %v1153_v51  ;;  %1164 = vst.msk [vmem:[#allocation3 + $0x28] sm:$0xff] %vm349_vm0, %v1156_v54  ;;  %v1257_v57 = vmul.f32 %v1739_v46, %v1241_v25 }
 0x1f1   : > { %v797_v59 = vpop.xlane.xlu0 %796  ;;  %v1150_v40 = vpop.xlane.xlu1 %1149 }
 0x1f2   : > { %v808_v63 = vadd.f32 %v797_v59, %v476_v55  ;;  %v1158_v61 = vadd.f32 %v1150_v40, %v828_v48  ;;  %v1265_v62 = vsel %vm1233_vm8, %v1257_v57, 0.0 }
 0x1f3   : > { %1303 = vperm.xlu0 %1662, %v1265_v62   ;;  %v1314_v39 = vld [vmem:[#allocation3] sm:$0xff]  ;;  %v1239_v34 = vld [vmem:[#allocation2 + $0x28] sm:$0xff] }
 0x1f4   : > { %817 = vst.msk [vmem:[#allocation2 + $0x20] sm:$0xff] %vm349_vm0, %v808_v63  ;;  %1166 = vst.msk [vmem:[#allocation3 + $0x38] sm:$0xff] %vm349_vm0, %v1158_v61  ;;  %v1322_v37 = vmul.f32 %v2163_v53, %v1314_v39  ;;  %v1253_v56 = vmul.f32 %v1741_v29, %v1239_v34 }
 0x1f5   : > { %v1144_v6 = vpop.xlane.xlu0 %1143 }
 0x1f6   : > { %v1155_v7 = vadd.f32 %v1144_v6, %v825_v2  ;;  %v1330_v9 = vsel %vm1226_vm3, %v1322_v37, 0.0  ;;  %v1263_v36 = vsel %vm1231_vm9, %v1253_v56, 0.0 }
 0x1f7   : > { %1340 = vperm.xlu1 %1663, %v1330_v9   ;;  %1293 = vperm.xlu0 %1662, %v1263_v36   ;;  %v1316_v8 = vld [vmem:[#allocation3 + $0x10] sm:$0xff]  ;;  %v1319_v10 = vld [vmem:[#allocation3 + $0x28] sm:$0xff] }
 0x1f8   : > { %1163 = vst.msk [vmem:[#allocation3 + $0x20] sm:$0xff] %vm349_vm0, %v1155_v7  ;;  %v1324_v32 = vmul.f32 %v2174_v5, %v1316_v8  ;;  %v1327_v11 = vmul.f32 %v1741_v29, %v1319_v10 }
 0x1f9   : > { %v1148_v53 = vpop.xlane.xlu0 %1147 }
 0x1fa   : > { %v1157_v12 = vadd.f32 %v1148_v53, %v827_v0  ;;  %v1332_v14 = vsel %vm1228_vm5, %v1324_v32, 0.0  ;;  %v1335_v1 = vsel %vm1231_vm9, %v1327_v11, 0.0 }
 0x1fb   : > { %1350 = vperm.xlu1 %1663, %v1332_v14   ;;  %1365 = vperm.xlu0 %1662, %v1335_v1   ;;  %v1238_v30 = vld [vmem:[#allocation2 + $0x20] sm:$0xff]  ;;  %v1321_v16 = vld [vmem:[#allocation3 + $0x38] sm:$0xff] }
 0x1fc   : > { %1165 = vst.msk [vmem:[#allocation3 + $0x30] sm:$0xff] %vm349_vm0, %v1157_v12  ;;  %v1251_v18 = vmul.f32 %v1743_v41, %v1238_v30  ;;  %v1329_v19 = vmul.f32 %v1739_v46, %v1321_v16 }
 0x1fe   : > { %v1262_v5 = vsel %vm1230_vm10, %v1251_v18, 0.0  ;;  %v1337_v43 = vsel %vm1233_vm8, %v1329_v19, 0.0 }
 0x1ff   : > { %1288 = vperm.xlu1 %1663, %v1262_v5   ;;  %1375 = vperm.xlu0 %1662, %v1337_v43   ;;  %v1318_v42 = vld [vmem:[#allocation3 + $0x20] sm:$0xff] }
 0x200   : > { %v1326_v20 = vmul.f32 %v1743_v41, %v1318_v42 }
 0x202   : > { %v1334_v17 = vsel %vm1230_vm10, %v1326_v20, 0.0 }
 0x203   : > { %1360 = vperm.xlu1 %1663, %v1334_v17   ;;  %v1320_v60 = vld [vmem:[#allocation3 + $0x30] sm:$0xff] }
 0x204   : > { %v1328_v22 = vmul.f32 %v2198_v52, %v1320_v60 }
 0x206   : > { %v1336_v15 = vsel %vm1232_vm7, %v1328_v22, 0.0 }
 0x207   : > { %1370 = vperm.xlu1 %1663, %v1336_v15  }
 0x256   : > { %v1269_v4 = vpop.permute.xlu0 %1268 }
 0x257   : > { %1306 = vst [vmem:[%s312_s15] sm:$0xff] %v1269_v4 }
 0x25b   : > { %v1274_v23 = vpop.permute.xlu1 %1273 }
 0x25c   : > { %1307 = vst [vmem:[%s312_s15 + $0x8] sm:$0xff] %v1274_v23 }
 0x25f   : > { %v1279_v13 = vpop.permute.xlu1 %1278 }
 0x260   : > { %1308 = vst [vmem:[%s312_s15 + $0x10] sm:$0xff] %v1279_v13 }
 0x262   : > { %v1284_v24 = vpop.permute.xlu0 %1283 }
 0x263   : > { %1309 = vst [vmem:[%s312_s15 + $0x18] sm:$0xff] %v1284_v24 }
 0x266   : > { %v1346_v58 = vpop.permute.xlu0 %1345 }
 0x267   : > { %1379 = vst [vmem:[%s318_s18 + $0x8] sm:$0xff] %v1346_v58 }
 0x26a   : > { %v1356_v52 = vpop.permute.xlu0 %1355 }
 0x26b   : > { %1381 = vst [vmem:[%s318_s18 + $0x18] sm:$0xff] %v1356_v52 }
 0x26e   : > { %v1299_v26 = vpop.permute.xlu1 %1298 }
 0x26f   : > { %1312 = vst [vmem:[%s312_s15 + $0x30] sm:$0xff] %v1299_v26 }
 0x272   : > { %v1304_v28 = vpop.permute.xlu0 %1303 }
 0x273   : > { %1313 = vst [vmem:[%s312_s15 + $0x38] sm:$0xff] %v1304_v28 }
 0x276   : > { %v1294_v31 = vpop.permute.xlu0 %1293  ;;  %v1341_v35 = vpop.permute.xlu1 %1340 }
 0x277   : > { %1311 = vst [vmem:[%s312_s15 + $0x28] sm:$0xff] %v1294_v31  ;;  %1378 = vst [vmem:[%s318_s18] sm:$0xff] %v1341_v35 }
 0x27a   : > { %v1366_v38 = vpop.permute.xlu0 %1365  ;;  %v1351_v44 = vpop.permute.xlu1 %1350 }
 0x27b   : > { %1383 = vst [vmem:[%s318_s18 + $0x28] sm:$0xff] %v1366_v38  ;;  %1380 = vst [vmem:[%s318_s18 + $0x10] sm:$0xff] %v1351_v44 }
 0x27e   : > { %v1376_v33 = vpop.permute.xlu0 %1375  ;;  %v1289_v3 = vpop.permute.xlu1 %1288 }
 0x27f   : > { %1385 = vst [vmem:[%s318_s18 + $0x38] sm:$0xff] %v1376_v33  ;;  %1310 = vst [vmem:[%s312_s15 + $0x20] sm:$0xff] %v1289_v3 }
 0x282   : > { %v1361_v45 = vpop.permute.xlu1 %1360 }
 0x283   : > { %1382 = vst [vmem:[%s318_s18 + $0x20] sm:$0xff] %v1361_v45 }
 0x286   : > { %v1371_v21 = vpop.permute.xlu1 %1370 }
 0x287   : > { %1384 = vst [vmem:[%s318_s18 + $0x30] sm:$0xff] %v1371_v21 }
 0x288 PF: > { %s17_s23 = sadd.s32 1, %s1766_s23   ;;  %s2256_s21 = smov %s1762_s22 }
 0x289   : > { %p14_p6 = scmp.ge.s32.totalorder %s17_s23, 4   ;;  %s2257_s22 = smov %s2259_s24 }
 0x28b   :  { %16 = sbr.rel (!%p14_p6) target bundleno = 2 (0x2), region = 100 }

// kernel: adone_forward.2
= control target key start
LH: loop header
LB: loop body
LE: loop exit
PB: predicated region body
PF: predicated region fallthrough
CT: control target
= control target key end

     0   :  { %s3910_s6 = smov 1   ;;  %s3911_s10 = smov 2   ;;  %s4330_s0 = inlined_call_operand.smem [shape: u32[30], index: -1, kind: input, shape index: {}] }
   0x1   :  { %s3948_s5 = sld [smem:[%s4330_s0]]   ;;  %s3912_s14 = smov 3  }
   0x2   :  { %s3953_s9 = sld [smem:[%s4330_s0 + %s3910_s6]]   ;;  %s3913_s18 = smov 4  }
   0x3   :  { %s3958_s13 = sld [smem:[%s4330_s0 + %s3911_s10]]   ;;  %s3914_s22 = smov 5  }
   0x4   :  { %s3963_s17 = sld [smem:[%s4330_s0 + %s3912_s14]]   ;;  %s3915_s26 = smov 6  }
   0x5   :  { %s3968_s21 = sld [smem:[%s4330_s0 + %s3913_s18]]   ;;  %s3916_s30 = smov 7  }
   0x6   :  { %s3973_s25 = sld [smem:[%s4330_s0 + %s3914_s22]]   ;;  %s3917_s4 = smov 8  }
   0x7   :  { %s3978_s29 = sld [smem:[%s4330_s0 + %s3915_s26]]   ;;  %s3918_s10 = smov 9  }
   0x8   :  { %s3983_s3 = sld [smem:[%s4330_s0 + %s3916_s30]]   ;;  %s3919_s15 = smov 10  }
   0x9   :  { %s3988_s8 = sld [smem:[%s4330_s0 + %s3917_s4]]   ;;  %s3920_s20 = smov 11  }
   0xa   :  { %s3993_s14 = sld [smem:[%s4330_s0 + %s3918_s10]]   ;;  %s3921_s26 = smov 12  }
   0xb   :  { %s3998_s19 = sld [smem:[%s4330_s0 + %s3919_s15]]   ;;  %s3922_s1 = smov 13  }
   0xc   :  { %s4003_s24 = sld [smem:[%s4330_s0 + %s3920_s20]]   ;;  %s3923_s7 = smov 14  }
   0xd   :  { %s4008_s30 = sld [smem:[%s4330_s0 + %s3921_s26]]   ;;  %s3924_s15 = smov 15  }
   0xe   :  { %s4013_s6 = sld [smem:[%s4330_s0 + %s3922_s1]]   ;;  %s3925_s22 = smov 16  }
   0xf   :  { %s4018_s12 = sld [smem:[%s4330_s0 + %s3923_s7]]   ;;  %s3926_s28 = smov 17  }
  0x10   :  { %4334 = sst [smem:[#allocation3_spill]] %s3993_s14  ;;  %s3927_s7 = smov 18  }
  0x11   :  { %s4023_s20 = sld [smem:[%s4330_s0 + %s3924_s15]]   ;;  %s3928_s15 = smov 19  }
  0x12   :  { %4335 = sst [smem:[#allocation4_spill]] %s4003_s24  ;;  %s3931_s10 = smov 22  }
  0x13   :  { %s4028_s27 = sld [smem:[%s4330_s0 + %s3925_s22]]   ;;  %s3929_s22 = smov 20  }
  0x14   :  { %4336 = sst [smem:[#allocation5_spill]] %s4013_s6  ;;  %s3932_s16 = smov 23  }
  0x15   :  { %4337 = sst [smem:[#allocation6_spill]] %s4018_s12  ;;  %s3933_s23 = smov 24  }
  0x16   :  { %s4033_s4 = sld [smem:[%s4330_s0 + %s3926_s28]]   ;;  %s3930_s28 = smov 21  }
  0x17   :  { %4338 = sst [smem:[#allocation7_spill]] %s4023_s20  ;;  %s3934_s1 = smov 25  }
  0x18   :  { %s4038_s6 = sld [smem:[%s4330_s0 + %s3927_s7]]   ;;  %s4093_s7 = smov 0  }
  0x19   :  { %4339 = sst [smem:[#allocation8_spill]] %s4028_s27 }
  0x1a   :  { %s4043_s20 = sld [smem:[%s4330_s0 + %s3928_s15]]  }
  0x1b   :  { %s4048_s14 = sld [smem:[%s4330_s0 + %s3929_s22]]  }
  0x1c   :  { %4340 = sst [smem:[#allocation9_spill]] %s4033_s4 }
  0x1d   :  { %s3131_s4 = sld [smem:[%s4330_s0 + %s3930_s28]]  }
  0x1e   :  { %4341 = sst [smem:[#allocation10_spill]] %s4038_s6 }
  0x1f   :  { %s4056_s27 = sld [smem:[%s4330_s0 + %s3931_s10]]   ;;  %s3935_s10 = smov 26  }
  0x20   :  { %4342 = sst [smem:[#allocation11_spill]] %s4043_s20 }
  0x21   :  { %4343 = sst [smem:[#allocation12_spill]] %s4048_s14 }
  0x22   :  { %s4061_s20 = sld [smem:[%s4330_s0 + %s3932_s16]]   ;;  %s3936_s16 = smov 27  }
  0x23   :  { %s4066_s14 = sld [smem:[%s4330_s0 + %s3933_s23]]   ;;  %v65_v0 = vstv %s3131_s4  ;;  %s3937_s23 = smov 28  }
  0x24   :  { %s4071_s6 = sld [smem:[%s4330_s0 + %s3934_s1]]   ;;  %66 = vst [vmem:[#allocation2] sm:$0x1] %v65_v0  ;;  %s3938_s1 = smov 29  }
  0x25   :  { %s4076_s12 = sld [smem:[%s4330_s0 + %s3935_s10]]  }
  0x26   :  { %s4081_s24 = sld [smem:[%s4330_s0 + %s3936_s16]]  }
  0x27   :  { %s4086_s28 = sld [smem:[%s4330_s0 + %s3937_s23]]  }
  0x28   :  { %s4091_s10 = sld [smem:[%s4330_s0 + %s3938_s1]]  }
  0x2a   :  { %4344 = sst [smem:[#allocation13_spill]] %s4071_s6 }
  0x2b LB: > { %s3140_s4 = sadd.s32 4294967295, %s3908_s7   ;;  %p3144_p0 = scmp.ge.s32.totalorder %s3908_s7, 1  ;;  %s3908_s7 = sphi %s4093_s7, %s72_s7  }
  0x2c   : > { %p846_p1 = scmp.lt.s32.totalorder %s3908_s7, 3 }
  0x2e   : > { %p847_p2 = pnand %p3144_p0, %p846_p1 }
  0x2f   : > { %v3790_v1 = vld [vmem:[%s3958_s13] sm:$0xff] (!%p847_p2)   ;;  %s3145_s0 = sshll.u32 (!%p847_p2), %s3140_s4, 3  ;;  %v3791_v2 = vld [vmem:[%s3958_s13 + $0x8] sm:$0xff] (!%p847_p2)   ;;  %v3792_v3 = vld [vmem:[%s3958_s13 + $0x10] sm:$0xff] (!%p847_p2)   ;;  %s4345_s22 = sld [smem:[#allocation4_spill]] (!%p847_p2) }
  0x30   : > { %850 = sbr.rel (%p847_p2) target bundleno = 1574 (0x626), region = 108  ;;  %p963_p3 = scmp.lt.s32.totalorder (!%p847_p2), %s3145_s0, 15  ;;  %3526 = vmatprep.subr.bf16.mxu1 (!%p847_p2), %v3790_v1  ;;  %v3793_v4 = vld [vmem:[%s3958_s13 + $0x18] sm:$0xff] (!%p847_p2)   ;;  %v3794_v6 = vld [vmem:[%s3958_s13 + $0x20] sm:$0xff] (!%p847_p2)   ;;  %v3795_v7 = vld [vmem:[%s3958_s13 + $0x28] sm:$0xff] (!%p847_p2)  }
  0x31   : > { %3527 = vmatpush3.bf16.msra.mxu1 (!%p847_p2), %v3790_v1  ;;  %v3796_v8 = vld [vmem:[%s3958_s13 + $0x30] sm:$0xff] (!%p847_p2)   ;;  %v3797_v9 = vld [vmem:[%s3958_s13 + $0x38] sm:$0xff] (!%p847_p2)   ;;  %v3802_v10 = vld [vmem:[%s3968_s21] sm:$0xff] (!%p847_p2)   ;;  %s4346_s26 = sld [smem:[#allocation6_spill]] (!%p847_p2)  ;;  %s4347_s1 = sld [smem:[#allocation10_spill]] (!%p847_p2) }
  0x32   : > { %3528 = vmatprep.subr.bf16.mxu1 (!%p847_p2), %v3791_v2  ;;  %v3803_v13 = vld [vmem:[%s3968_s21 + $0x8] sm:$0xff] (!%p847_p2)   ;;  %v3804_v14 = vld [vmem:[%s3968_s21 + $0x10] sm:$0xff] (!%p847_p2)   ;;  %v3805_v16 = vld [vmem:[%s3968_s21 + $0x18] sm:$0xff] (!%p847_p2)   ;;  %s4348_s2 = sld [smem:[#allocation8_spill]] (!%p847_p2)  ;;  %s4349_s4 = sld [smem:[#allocation3_spill]] (!%p847_p2) }
  0x33   : > { %v3806_v17 = vld [vmem:[%s3968_s21 + $0x20] sm:$0xff] (!%p847_p2)   ;;  %v3807_v18 = vld [vmem:[%s3968_s21 + $0x28] sm:$0xff] (!%p847_p2)   ;;  %v3808_v19 = vld [vmem:[%s3968_s21 + $0x30] sm:$0xff] (!%p847_p2)  }
  0x34   : > { %v3809_v20 = vld [vmem:[%s3968_s21 + $0x38] sm:$0xff] (!%p847_p2)   ;;  %v3810_v21 = vld [vmem:[%s3978_s29] sm:$0xff] (!%p847_p2)   ;;  %v3811_v22 = vld [vmem:[%s3978_s29 + $0x8] sm:$0xff] (!%p847_p2)  }
  0x35   : > { %3529 = vmatpush3.bf16.msra.mxu1 (!%p847_p2), %v3791_v2  ;;  %3574 = vmatprep.subr.bf16.mxu0 (!%p847_p2), %v3810_v21  ;;  %v3812_v23 = vld [vmem:[%s3978_s29 + $0x10] sm:$0xff] (!%p847_p2)   ;;  %v3813_v24 = vld [vmem:[%s3978_s29 + $0x18] sm:$0xff] (!%p847_p2)   ;;  %v3814_v25 = vld [vmem:[%s3978_s29 + $0x20] sm:$0xff] (!%p847_p2)  }
  0x36   : > { %3530 = vmatprep.subr.bf16.mxu1 (!%p847_p2), %v3792_v3  ;;  %3575 = vmatpush3.bf16.msra.mxu0 (!%p847_p2), %v3810_v21  ;;  %v3815_v26 = vld [vmem:[%s3978_s29 + $0x28] sm:$0xff] (!%p847_p2)   ;;  %v3165_v27 = vld [vmem:[%s3963_s17] ss:$0 sm:$0xff] (!%p847_p2)  ;;  %v3816_v56 = vld [vmem:[%s3978_s29 + $0x30] sm:$0xff] (!%p847_p2)  }
  0x37   : > { %s4357_s0 = smov (!%p963_p3, %s3145_s0), 15  ;;  %3576 = vmatprep.subr.bf16.mxu0 %v3811_v22  ;;  %v3817_v57 = vld [vmem:[%s3978_s29 + $0x38] sm:$0xff]   ;;  %v3818_v58 = vld [vmem:[%s3998_s19] sm:$0xff]   ;;  %v3831_v60 = vld [vmem:[%s3988_s8 + $0x8] sm:$0xff]  }
  0x38   : > { %s4107_s6 = sshll.u32 %s4357_s0, 2  ;;  %v3830_v59 = vld [vmem:[%s3988_s8] sm:$0xff]   ;;  %v3832_v61 = vld [vmem:[%s3988_s8 + $0x10] sm:$0xff]   ;;  %v3833_v62 = vld [vmem:[%s3988_s8 + $0x18] sm:$0xff]   ;;  %s4146_s15 = sshll.u32 %s4357_s0, 3 }
  0x39   : > { %s966_s11 = scalar_lea.vmem %s3948_s5, %s4107_s6  ;;  %3531 = vmatpush3.bf16.msra.mxu1 %v3792_v3  ;;  %s4136_s16 = scalar_lea.vmem %s3953_s9, %s4107_s6  ;;  %v3834_v63 = vld [vmem:[%s3988_s8 + $0x20] sm:$0xff]   ;;  %v3835_v0 = vld [vmem:[%s3988_s8 + $0x28] sm:$0xff]  }
  0x3a   : > { %v3798_v5 = vld [vmem:[%s966_s11] sm:$0xff]   ;;  %3532 = vmatprep.subr.bf16.mxu1 %v3793_v4  ;;  %v3799_v11 = vld [vmem:[%s966_s11 + $0x8] sm:$0xff]   ;;  %v3800_v12 = vld [vmem:[%s966_s11 + $0x10] sm:$0xff]   ;;  %3577 = vmatpush3.bf16.msra.mxu0 %v3811_v22  ;;  %s4150_s18 = scalar_lea.vmem %s4056_s27, %s4146_s15  ;;  %s4156_s23 = scalar_lea.vmem %s4061_s20, %s4107_s6 }
  0x3b   : > { %3542 = vmatprep.mubr.bf16.mxu1 %v3798_v5  ;;  %v3801_v15 = vld [vmem:[%s966_s11 + $0x18] sm:$0xff]   ;;  %3578 = vmatprep.subr.bf16.mxu0 %v3812_v23  ;;  %v3178_v1 = vld [vmem:[%s3973_s25] ss:$0 sm:$0xff]  ;;  %s990_s0 = scalar_lea.vmem %s4066_s14, %s4107_s6  ;;  %s4350_s11 = sld [smem:[#allocation5_spill]] }
  0x3d   : > { %3533 = vmatpush3.bf16.msra.mxu1 %v3793_v4 }
  0x3e   : > { %3534 = vmatprep.subr.bf16.mxu1 %v3794_v6  ;;  %3579 = vmatpush3.bf16.msra.mxu0 %v3812_v23 }
  0x3f   : > { %3580 = vmatprep.subr.bf16.mxu0 %v3813_v24 }
  0x41   : > { %3535 = vmatpush3.bf16.msra.mxu1 %v3794_v6 }
  0x42   : > { %3536 = vmatprep.subr.bf16.mxu1 %v3795_v7  ;;  %3581 = vmatpush3.bf16.msra.mxu0 %v3813_v24 }
  0x43   : > { %3582 = vmatprep.subr.bf16.mxu0 %v3814_v25 }
  0x45   : > { %3537 = vmatpush3.bf16.msra.mxu1 %v3795_v7 }
  0x46   : > { %3538 = vmatprep.subr.bf16.mxu1 %v3796_v8  ;;  %3583 = vmatpush3.bf16.msra.mxu0 %v3814_v25 }
  0x47   : > { %3584 = vmatprep.subr.bf16.mxu0 %v3815_v26 }
  0x49   : > { %3539 = vmatpush3.bf16.msra.mxu1 %v3796_v8 }
  0x4a   : > { %3540 = vmatprep.subr.bf16.mxu1 %v3797_v9  ;;  %3585 = vmatpush3.bf16.msra.mxu0 %v3815_v26 }
  0x4b   : > { %3586 = vmatprep.subr.bf16.mxu0 %v3816_v56 }
  0x4d   : > { %3541 = vmatpush3.bf16.msra.mxu1 %v3797_v9 }
  0x4e   : > { %3550 = vmatprep.subr.bf16.mxu1 %v3802_v10  ;;  %3587 = vmatpush3.bf16.msra.mxu0 %v3816_v56 }
  0x4f   : > { %3588 = vmatprep.subr.bf16.mxu0 %v3817_v57 }
  0x50   : > { %3543 = vmatmul.mubr.bf16.vlgmr.msra.gmra.mrb[0].mxu1 %v3799_v11 }
  0x51   : > { %3546 = vmatprep.mubr.bf16.mxu1 %v3800_v12  ;;  %3551 = vmatpush3.bf16.msra.mxu1 %v3802_v10 }
  0x52   : > { %3552 = vmatprep.subr.bf16.mxu1 %v3803_v13  ;;  %3589 = vmatpush3.bf16.msra.mxu0 %v3817_v57 }
  0x53   : > { %3622 = vmatprep.subr.bf16.mxu0 %v3818_v58 }
  0x55   : > { %3553 = vmatpush3.bf16.msra.mxu1 %v3803_v13 }
  0x56   : > { %3554 = vmatprep.subr.bf16.mxu1 %v3804_v14 }
  0x58   : > { %3547 = vmatmul.mubr.bf16.gmra.mrb[4].mxu1 %v3801_v15 }
  0x59   : > { %3555 = vmatpush3.bf16.msra.mxu1 %v3804_v14 }
  0x5a   : > { %3556 = vmatprep.subr.bf16.mxu1 %v3805_v16 }
  0x5d   : > { %3557 = vmatpush3.bf16.msra.mxu1 %v3805_v16 }
  0x5e   : > { %3558 = vmatprep.subr.bf16.mxu1 %v3806_v17 }
  0x61   : > { %3559 = vmatpush3.bf16.msra.mxu1 %v3806_v17 }
  0x62   : > { %3560 = vmatprep.subr.bf16.mxu1 %v3807_v18 }
  0x65   : > { %3561 = vmatpush3.bf16.msra.mxu1 %v3807_v18 }
  0x66   : > { %3562 = vmatprep.subr.bf16.mxu1 %v3808_v19 }
  0x69   : > { %3563 = vmatpush3.bf16.msra.mxu1 %v3808_v19  ;;  %v3819_v19 = vld [vmem:[%s3998_s19 + $0x8] sm:$0xff]  }
  0x6a   : > { %3564 = vmatprep.subr.bf16.mxu1 %v3809_v20 }
  0x6d   : > { %3565 = vmatpush3.bf16.msra.mxu1 %v3809_v20 }
  0x6e   : > { %3598 = vmatprep.subr.bf16.mxu1 %v3830_v59 }
 0x123   : > { %v3544_v28 = vpop.f32.mrb[0].mxu1 }
 0x124   : > { %v1177_v29 = vadd.f32 %v3544_v28, %v3165_v27  ;;  %v1168_v30 = vpop.f32.mrb[1].mxu1  ;;  %v3820_v28 = vld [vmem:[%s3998_s19 + $0x10] sm:$0xff]  }
 0x125   : > { %v1169_v31 = vadd.f32 %v3165_v27, %v1168_v30  ;;  %v3545_v32 = vpop.f32.mrb[2].mxu1 }
 0x126   : > { %v1180_v33 = vadd.f32 %v3545_v32, %v3165_v27  ;;  %v1171_v34 = vpop.f32.mrb[3].mxu1  ;;  %v1201_v36 = vmax.f32 %v1177_v29, 0.0  ;;  %v3826_v32 = vld [vmem:[%s4136_s16] sm:$0xff]  }
 0x127   : > { %v1172_v35 = vadd.f32 %v3165_v27, %v1171_v34  ;;  %v1199_v38 = vmax.f32 %v1169_v31, 0.0  ;;  %v3822_v34 = vld [vmem:[%s3998_s19 + $0x20] sm:$0xff]  }
 0x128   : > { %v1202_v37 = vmax.f32 %v1180_v33, 0.0  ;;  %v3821_v33 = vld [vmem:[%s3998_s19 + $0x18] sm:$0xff]  }
 0x129   : > { %v1200_v39 = vmax.f32 %v1172_v35, 0.0  ;;  %v3823_v35 = vld [vmem:[%s3998_s19 + $0x28] sm:$0xff]  }
 0x12a   : > { %v1208_v40 = vpack.c.bf16 %v1202_v37, %v1201_v36  ;;  %v3824_v36 = vld [vmem:[%s3998_s19 + $0x30] sm:$0xff]   ;;  %v3825_v37 = vld [vmem:[%s3998_s19 + $0x38] sm:$0xff]  }
 0x12b   : > { %v1207_v41 = vpack.c.bf16 %v1200_v39, %v1199_v38  ;;  %v3548_v42 = vpop.f32.mrb[4].mxu1  ;;  %v3827_v38 = vld [vmem:[%s4136_s16 + $0x8] sm:$0xff]   ;;  %v3828_v39 = vld [vmem:[%s4136_s16 + $0x10] sm:$0xff]  }
 0x12c   : > { %v1193_v43 = vadd.f32 %v3548_v42, %v3165_v27  ;;  %v1184_v44 = vpop.f32.mrb[5].mxu1  ;;  %v3837_v42 = vld [vmem:[%s3988_s8 + $0x38] sm:$0xff]  }
 0x12d   : > { %v1185_v45 = vadd.f32 %v3165_v27, %v1184_v44  ;;  %v3549_v46 = vpop.f32.mrb[6].mxu1  ;;  %3566 = vmatprep.mubr.bf16.mxu1 %v1207_v41  ;;  %v3836_v41 = vld [vmem:[%s3988_s8 + $0x30] sm:$0xff]   ;;  %v3187_v44 = vld [vmem:[%s3983_s3] ss:$0 sm:$0xff] }
 0x12e   : > { %v1205_v47 = vmax.f32 %v1193_v43, 0.0  ;;  %v1196_v48 = vadd.f32 %v3549_v46, %v3165_v27  ;;  %v1187_v49 = vpop.f32.mrb[7].mxu1  ;;  %3567 = vmatmul.mubr.bf16.vlgmr.msra.gmra.mrb[8].mxu1 %v1208_v40  ;;  %v3829_v40 = vld [vmem:[%s4136_s16 + $0x18] sm:$0xff]   ;;  %v3838_v43 = vld [vmem:[%s4008_s30] sm:$0xff]   ;;  %s4351_s16 = sld [smem:[#allocation13_spill]] }
 0x12f   : > { %v1203_v50 = vmax.f32 %v1185_v45, 0.0  ;;  %v1188_v51 = vadd.f32 %v3165_v27, %v1187_v49  ;;  %3599 = vmatpush3.bf16.msra.mxu1 %v3830_v59 }
 0x130   : > { %v1206_v52 = vmax.f32 %v1196_v48, 0.0  ;;  %3600 = vmatprep.subr.bf16.mxu1 %v3831_v60 }
 0x131   : > { %v1204_v53 = vmax.f32 %v1188_v51, 0.0 }
 0x132   : > { %v1210_v54 = vpack.c.bf16 %v1206_v52, %v1205_v47 }
 0x133   : > { %v1209_v55 = vpack.c.bf16 %v1204_v53, %v1203_v50  ;;  %3601 = vmatpush3.bf16.msra.mxu1 %v3831_v60 }
 0x134   : > { %3602 = vmatprep.subr.bf16.mxu1 %v3832_v61 }
 0x135   : > { %3570 = vmatprep.mubr.bf16.mxu1 %v1209_v55 }
 0x136   : > { %3571 = vmatmul.mubr.bf16.gmra.mrb[12].mxu1 %v1210_v54 }
 0x137   : > { %3603 = vmatpush3.bf16.msra.mxu1 %v3832_v61 }
 0x138   : > { %3604 = vmatprep.subr.bf16.mxu1 %v3833_v62 }
 0x13b   : > { %3605 = vmatpush3.bf16.msra.mxu1 %v3833_v62  ;;  %v3839_v62 = vld [vmem:[%s4008_s30 + $0x8] sm:$0xff]  }
 0x13c   : > { %3606 = vmatprep.subr.bf16.mxu1 %v3834_v63 }
 0x13f   : > { %3607 = vmatpush3.bf16.msra.mxu1 %v3834_v63 }
 0x140   : > { %3608 = vmatprep.subr.bf16.mxu1 %v3835_v0 }
 0x143   : > { %3609 = vmatpush3.bf16.msra.mxu1 %v3835_v0 }
 0x144   : > { %3610 = vmatprep.subr.bf16.mxu1 %v3836_v41 }
 0x147   : > { %3611 = vmatpush3.bf16.msra.mxu1 %v3836_v41 }
 0x148   : > { %3612 = vmatprep.subr.bf16.mxu1 %v3837_v42 }
 0x14b   : > { %3613 = vmatpush3.bf16.msra.mxu1 %v3837_v42 }
 0x14c   : > { %3646 = vmatprep.subr.bf16.mxu1 %v3838_v43 }
 0x201   : > { %v3568_v2 = vpop.f32.mrb[8].mxu1 }
 0x202   : > { %v1325_v3 = vadd.f32 %v3568_v2, %v3178_v1  ;;  %v1316_v4 = vpop.f32.mrb[9].mxu1 }
 0x203   : > { %v1317_v5 = vadd.f32 %v3178_v1, %v1316_v4  ;;  %v3569_v6 = vpop.f32.mrb[10].mxu1 }
 0x204   : > { %v1349_v7 = vmax.f32 %v1325_v3, 0.0  ;;  %v1328_v8 = vadd.f32 %v3569_v6, %v3178_v1  ;;  %v1319_v9 = vpop.f32.mrb[11].mxu1 }
 0x205   : > { %v1347_v10 = vmax.f32 %v1317_v5, 0.0  ;;  %v1320_v11 = vadd.f32 %v3178_v1, %v1319_v9 }
 0x206   : > { %2543 = vst [vmem:[%s4150_s18 + $0x10] sm:$0xff] %v1349_v7  ;;  %v1350_v12 = vmax.f32 %v1328_v8, 0.0 }
 0x207   : > { %2541 = vst [vmem:[%s4150_s18] sm:$0xff] %v1347_v10  ;;  %v1348_v13 = vmax.f32 %v1320_v11, 0.0  ;;  %v3841_v11 = vld [vmem:[%s4008_s30 + $0x18] sm:$0xff]  }
 0x208   : > { %v4158_v14 = vpack.c.bf16 %v1350_v12, %v1349_v7  ;;  %2544 = vst [vmem:[%s4150_s18 + $0x18] sm:$0xff] %v1350_v12  ;;  %v3840_v7 = vld [vmem:[%s4008_s30 + $0x10] sm:$0xff]   ;;  %v3842_v12 = vld [vmem:[%s4008_s30 + $0x20] sm:$0xff]  }
 0x209   : > { %v4161_v15 = vpack.c.bf16 %v1348_v13, %v1347_v10  ;;  %2542 = vst [vmem:[%s4150_s18 + $0x8] sm:$0xff] %v1348_v13  ;;  %v3572_v16 = vpop.f32.mrb[12].mxu1  ;;  %v3843_v13 = vld [vmem:[%s4008_s30 + $0x28] sm:$0xff]  }
 0x20a   : > { %3402 = vst [vmem:[%s4156_s23 + $0x8] sm:$0xff] %v4158_v14   ;;  %v1341_v17 = vadd.f32 %v3572_v16, %v3178_v1  ;;  %v1332_v18 = vpop.f32.mrb[13].mxu1  ;;  %v3844_v16 = vld [vmem:[%s4008_s30 + $0x30] sm:$0xff]  }
 0x20b   : > { %3326 = vst [vmem:[%s4156_s23] sm:$0xff] %v4161_v15   ;;  %v1333_v20 = vadd.f32 %v3178_v1, %v1332_v18  ;;  %v3573_v21 = vpop.f32.mrb[14].mxu1  ;;  %3590 = vmatprep.mubr.bf16.mxu0 %v4161_v15 }
 0x20c   : > { %v1353_v22 = vmax.f32 %v1341_v17, 0.0  ;;  %v1344_v23 = vadd.f32 %v3573_v21, %v3178_v1  ;;  %v1335_v24 = vpop.f32.mrb[15].mxu1  ;;  %3591 = vmatmul.mubr.bf16.vlgmr.msra.gmra.mrb[0].mxu0 %v4158_v14  ;;  %v3205_v17 = vld [vmem:[%s4345_s22] ss:$0 sm:$0xff]  ;;  %v3845_v21 = vld [vmem:[%s4008_s30 + $0x38] sm:$0xff]   ;;  %s4352_s22 = sld [smem:[#allocation7_spill]] }
 0x20d   : > { %v1351_v25 = vmax.f32 %v1333_v20, 0.0  ;;  %v1336_v26 = vadd.f32 %v3178_v1, %v1335_v24  ;;  %3623 = vmatpush3.bf16.msra.mxu0 %v3818_v58 }
 0x20e   : > { %2547 = vst [vmem:[%s4150_s18 + $0x30] sm:$0xff] %v1353_v22  ;;  %v1354_v27 = vmax.f32 %v1344_v23, 0.0  ;;  %3624 = vmatprep.subr.bf16.mxu0 %v3819_v19 }
 0x20f   : > { %2545 = vst [vmem:[%s4150_s18 + $0x20] sm:$0xff] %v1351_v25  ;;  %v1352_v29 = vmax.f32 %v1336_v26, 0.0 }
 0x210   : > { %v4174_v30 = vpack.c.bf16 %v1354_v27, %v1353_v22  ;;  %2548 = vst [vmem:[%s4150_s18 + $0x38] sm:$0xff] %v1354_v27 }
 0x211   : > { %v4177_v31 = vpack.c.bf16 %v1352_v29, %v1351_v25  ;;  %2546 = vst [vmem:[%s4150_s18 + $0x28] sm:$0xff] %v1352_v29  ;;  %3625 = vmatpush3.bf16.msra.mxu0 %v3819_v19  ;;  %s4231_s18 = scalar_lea.vmem %s4351_s16, %s4146_s15  ;;  %s1008_s16 = scalar_lea.vmem %s4081_s24, %s4107_s6 }
 0x212   : > { %3404 = vst [vmem:[%s4156_s23 + $0x18] sm:$0xff] %v4174_v30   ;;  %3626 = vmatprep.subr.bf16.mxu0 %v3820_v28 }
 0x213   : > { %3403 = vst [vmem:[%s4156_s23 + $0x10] sm:$0xff] %v4177_v31   ;;  %3594 = vmatprep.mubr.bf16.mxu0 %v4177_v31  ;;  %s4237_s23 = scalar_lea.vmem %s4076_s12, %s4107_s6  ;;  %s1014_s6 = scalar_lea.vmem %s4086_s28, %s4146_s15 }
 0x214   : > { %3595 = vmatmul.mubr.bf16.gmra.mrb[4].mxu0 %v4174_v30 }
 0x215   : > { %3627 = vmatpush3.bf16.msra.mxu0 %v3820_v28  ;;  %3638 = vmatprep.mubr.bf16.mxu0 %v3826_v32 }
 0x216   : > { %3628 = vmatprep.subr.bf16.mxu0 %v3821_v33 }
 0x219   : > { %3629 = vmatpush3.bf16.msra.mxu0 %v3821_v33 }
 0x21a   : > { %3630 = vmatprep.subr.bf16.mxu0 %v3822_v34 }
 0x21d   : > { %3631 = vmatpush3.bf16.msra.mxu0 %v3822_v34 }
 0x21e   : > { %3632 = vmatprep.subr.bf16.mxu0 %v3823_v35 }
 0x221   : > { %3633 = vmatpush3.bf16.msra.mxu0 %v3823_v35 }
 0x222   : > { %3634 = vmatprep.subr.bf16.mxu0 %v3824_v36 }
 0x225   : > { %3635 = vmatpush3.bf16.msra.mxu0 %v3824_v36 }
 0x226   : > { %3636 = vmatprep.subr.bf16.mxu0 %v3825_v37 }
 0x229   : > { %3637 = vmatpush3.bf16.msra.mxu0 %v3825_v37 }
 0x22c   : > { %3639 = vmatmul.mubr.bf16.vlgmr.msra.gmra.mrb[8].mxu0 %v3827_v38 }
 0x22d   : > { %3642 = vmatprep.mubr.bf16.mxu0 %v3828_v39 }
 0x234   : > { %3643 = vmatmul.mubr.bf16.gmra.mrb[12].mxu0 %v3829_v40 }
 0x2df   : > { %v3592_v45 = vpop.f32.mrb[0].mxu0 }
 0x2e0   : > { %v1473_v46 = vadd.f32 %v3592_v45, %v3187_v44  ;;  %v1464_v47 = vpop.f32.mrb[1].mxu0 }
 0x2e1   : > { %v1465_v48 = vadd.f32 %v3187_v44, %v1464_v47  ;;  %v3593_v49 = vpop.f32.mrb[2].mxu0 }
 0x2e2   : > { %v1476_v50 = vadd.f32 %v3593_v49, %v3187_v44  ;;  %v1467_v51 = vpop.f32.mrb[3].mxu0  ;;  %v1497_v53 = vmax.f32 %v1473_v46, 0.0  ;;  %v3846_v49 = vld [vmem:[%s4346_s26] sm:$0xff]  }
 0x2e3   : > { %v1468_v52 = vadd.f32 %v3187_v44, %v1467_v51  ;;  %v1495_v55 = vmax.f32 %v1465_v48, 0.0  ;;  %3670 = vmatprep.subr.bf16.mxu0 %v3846_v49  ;;  %v3848_v51 = vld [vmem:[%s4346_s26 + $0x10] sm:$0xff]  }
 0x2e4   : > { %v1498_v54 = vmax.f32 %v1476_v50, 0.0  ;;  %3671 = vmatpush3.bf16.msra.mxu0 %v3846_v49  ;;  %v3847_v50 = vld [vmem:[%s4346_s26 + $0x8] sm:$0xff]  }
 0x2e5   : > { %v1496_v56 = vmax.f32 %v1468_v52, 0.0  ;;  %3672 = vmatprep.subr.bf16.mxu0 %v3847_v50  ;;  %v3849_v52 = vld [vmem:[%s4346_s26 + $0x18] sm:$0xff]  }
 0x2e6   : > { %v1504_v57 = vpack.c.bf16 %v1498_v54, %v1497_v53  ;;  %v3850_v53 = vld [vmem:[%s4346_s26 + $0x20] sm:$0xff]   ;;  %v3851_v54 = vld [vmem:[%s4346_s26 + $0x28] sm:$0xff]  }
 0x2e7   : > { %v1503_v58 = vpack.c.bf16 %v1496_v56, %v1495_v55  ;;  %v3596_v59 = vpop.f32.mrb[4].mxu0  ;;  %v3852_v55 = vld [vmem:[%s4346_s26 + $0x30] sm:$0xff]   ;;  %v3853_v56 = vld [vmem:[%s4346_s26 + $0x38] sm:$0xff]  }
 0x2e8   : > { %v1489_v60 = vadd.f32 %v3596_v59, %v3187_v44  ;;  %v1480_v61 = vpop.f32.mrb[5].mxu0  ;;  %3673 = vmatpush3.bf16.msra.mxu0 %v3847_v50  ;;  %v3863_v59 = vld [vmem:[%s4348_s2 + $0x8] sm:$0xff]  }
 0x2e9   : > { %v1481_v63 = vadd.f32 %v3187_v44, %v1480_v61  ;;  %v3597_v0 = vpop.f32.mrb[6].mxu0  ;;  %3614 = vmatprep.mubr.bf16.mxu1 %v1503_v58  ;;  %3674 = vmatprep.subr.bf16.mxu0 %v3848_v51  ;;  %v3862_v58 = vld [vmem:[%s4348_s2] sm:$0xff]   ;;  %v3865_v61 = vld [vmem:[%s4348_s2 + $0x18] sm:$0xff]  }
 0x2ea   : > { %v1501_v1 = vmax.f32 %v1489_v60, 0.0  ;;  %v1492_v2 = vadd.f32 %v3597_v0, %v3187_v44  ;;  %v1483_v3 = vpop.f32.mrb[7].mxu0  ;;  %3615 = vmatmul.mubr.bf16.vlgmr.msra.gmra.mrb[16].mxu1 %v1504_v57  ;;  %v4216_v57 = vld [vmem:[%s4347_s1] sm:$0xff]   ;;  %v3864_v60 = vld [vmem:[%s4348_s2 + $0x10] sm:$0xff]  }
 0x2eb   : > { %v1499_v4 = vmax.f32 %v1481_v63, 0.0  ;;  %v1484_v5 = vadd.f32 %v3187_v44, %v1483_v3  ;;  %3647 = vmatpush3.bf16.msra.mxu1 %v3838_v43  ;;  %v3867_v63 = vld [vmem:[%s4348_s2 + $0x28] sm:$0xff]   ;;  %v3196_v0 = vld [vmem:[%s4349_s4] ss:$0 sm:$0xff]  ;;  %s4353_s4 = sld [smem:[#allocation11_spill]] }
 0x2ec   : > { %v1502_v6 = vmax.f32 %v1492_v2, 0.0  ;;  %3648 = vmatprep.subr.bf16.mxu1 %v3839_v62  ;;  %3675 = vmatpush3.bf16.msra.mxu0 %v3848_v51  ;;  %v3855_v51 = vld [vmem:[%s4347_s1 + $0x8] sm:$0xff]  }
 0x2ed   : > { %v1500_v8 = vmax.f32 %v1484_v5, 0.0  ;;  %3676 = vmatprep.subr.bf16.mxu0 %v3849_v52 }
 0x2ee   : > { %v1506_v9 = vpack.c.bf16 %v1502_v6, %v1501_v1 }
 0x2ef   : > { %v1505_v10 = vpack.c.bf16 %v1500_v8, %v1499_v4  ;;  %3649 = vmatpush3.bf16.msra.mxu1 %v3839_v62  ;;  %v3866_v62 = vld [vmem:[%s4348_s2 + $0x20] sm:$0xff]  }
 0x2f0   : > { %3650 = vmatprep.subr.bf16.mxu1 %v3840_v7  ;;  %3677 = vmatpush3.bf16.msra.mxu0 %v3849_v52 }
 0x2f1   : > { %3618 = vmatprep.mubr.bf16.mxu1 %v1505_v10  ;;  %3678 = vmatprep.subr.bf16.mxu0 %v3850_v53 }
 0x2f2   : > { %3619 = vmatmul.mubr.bf16.gmra.mrb[20].mxu1 %v1506_v9 }
 0x2f3   : > { %3651 = vmatpush3.bf16.msra.mxu1 %v3840_v7 }
 0x2f4   : > { %3652 = vmatprep.subr.bf16.mxu1 %v3841_v11  ;;  %3679 = vmatpush3.bf16.msra.mxu0 %v3850_v53 }
 0x2f5   : > { %3680 = vmatprep.subr.bf16.mxu0 %v3851_v54 }
 0x2f7   : > { %3653 = vmatpush3.bf16.msra.mxu1 %v3841_v11 }
 0x2f8   : > { %3654 = vmatprep.subr.bf16.mxu1 %v3842_v12  ;;  %3681 = vmatpush3.bf16.msra.mxu0 %v3851_v54 }
 0x2f9   : > { %3682 = vmatprep.subr.bf16.mxu0 %v3852_v55 }
 0x2fb   : > { %3655 = vmatpush3.bf16.msra.mxu1 %v3842_v12 }
 0x2fc   : > { %3656 = vmatprep.subr.bf16.mxu1 %v3843_v13  ;;  %3683 = vmatpush3.bf16.msra.mxu0 %v3852_v55 }
 0x2fd   : > { %3684 = vmatprep.subr.bf16.mxu0 %v3853_v56 }
 0x2ff   : > { %v3640_v18 = vpop.f32.mrb[8].mxu0  ;;  %3657 = vmatpush3.bf16.msra.mxu1 %v3843_v13 }
 0x300   : > { %v1789_v19 = vadd.f32 %v3640_v18, %v3205_v17  ;;  %v1780_v20 = vpop.f32.mrb[9].mxu0  ;;  %3658 = vmatprep.subr.bf16.mxu1 %v3844_v16  ;;  %3685 = vmatpush3.bf16.msra.mxu0 %v3853_v56 }
 0x301   : > { %v1781_v22 = vadd.f32 %v3205_v17, %v1780_v20  ;;  %v3641_v23 = vpop.f32.mrb[10].mxu0  ;;  %3718 = vmatprep.subr.bf16.mxu0 %v4216_v57 }
 0x302   : > { %v1792_v24 = vadd.f32 %v3641_v23, %v3205_v17  ;;  %v1783_v25 = vpop.f32.mrb[11].mxu0  ;;  %v1813_v27 = vmax.f32 %v1789_v19, 0.0 }
 0x303   : > { %v1784_v26 = vadd.f32 %v3205_v17, %v1783_v25  ;;  %3659 = vmatpush3.bf16.msra.mxu1 %v3844_v16  ;;  %v1811_v29 = vmax.f32 %v1781_v22, 0.0 }
 0x304   : > { %v1814_v28 = vmax.f32 %v1792_v24, 0.0  ;;  %3660 = vmatprep.subr.bf16.mxu1 %v3845_v21 }
 0x305   : > { %v1812_v32 = vmax.f32 %v1784_v26, 0.0 }
 0x306   : > { %v1820_v33 = vpack.c.bf16 %v1814_v28, %v1813_v27 }
 0x307   : > { %v1819_v34 = vpack.c.bf16 %v1812_v32, %v1811_v29  ;;  %v3644_v35 = vpop.f32.mrb[12].mxu0  ;;  %3661 = vmatpush3.bf16.msra.mxu1 %v3845_v21 }
 0x308   : > { %v1805_v36 = vadd.f32 %v3644_v35, %v3205_v17  ;;  %v1796_v37 = vpop.f32.mrb[13].mxu0  ;;  %3694 = vmatprep.subr.bf16.mxu1 %v3862_v58 }
 0x309   : > { %v1797_v38 = vadd.f32 %v3205_v17, %v1796_v37  ;;  %v3645_v39 = vpop.f32.mrb[14].mxu0  ;;  %3662 = vmatprep.mubr.bf16.mxu1 %v1819_v34 }
 0x30a   : > { %v1817_v40 = vmax.f32 %v1805_v36, 0.0  ;;  %v1808_v41 = vadd.f32 %v3645_v39, %v3205_v17  ;;  %v1799_v42 = vpop.f32.mrb[15].mxu0  ;;  %3663 = vmatmul.mubr.bf16.vlgmr.msra.gmra.mrb[24].mxu1 %v1820_v33  ;;  %v3218_v33 = vld [vmem:[%s4350_s11] ss:$0 sm:$0xff]  ;;  %s4355_s11 = sld [smem:[#allocation9_spill]] }
 0x30b   : > { %v1815_v43 = vmax.f32 %v1797_v38, 0.0  ;;  %v1800_v44 = vadd.f32 %v3205_v17, %v1799_v42  ;;  %3695 = vmatpush3.bf16.msra.mxu1 %v3862_v58 }
 0x30c   : > { %v1818_v45 = vmax.f32 %v1808_v41, 0.0  ;;  %3696 = vmatprep.subr.bf16.mxu1 %v3863_v59 }
 0x30d   : > { %v1816_v46 = vmax.f32 %v1800_v44, 0.0 }
 0x30e   : > { %v1822_v47 = vpack.c.bf16 %v1818_v45, %v1817_v40 }
 0x30f   : > { %v1821_v48 = vpack.c.bf16 %v1816_v46, %v1815_v43  ;;  %3697 = vmatpush3.bf16.msra.mxu1 %v3863_v59 }
 0x310   : > { %3698 = vmatprep.subr.bf16.mxu1 %v3864_v60 }
 0x311   : > { %3666 = vmatprep.mubr.bf16.mxu1 %v1821_v48 }
 0x312   : > { %3667 = vmatmul.mubr.bf16.gmra.mrb[28].mxu1 %v1822_v47 }
 0x313   : > { %3699 = vmatpush3.bf16.msra.mxu1 %v3864_v60 }
 0x314   : > { %3700 = vmatprep.subr.bf16.mxu1 %v3865_v61 }
 0x317   : > { %3701 = vmatpush3.bf16.msra.mxu1 %v3865_v61  ;;  %v3856_v61 = vld [vmem:[%s4347_s1 + $0x10] sm:$0xff]  }
 0x318   : > { %3702 = vmatprep.subr.bf16.mxu1 %v3866_v62 }
 0x31b   : > { %3703 = vmatpush3.bf16.msra.mxu1 %v3866_v62 }
 0x31c   : > { %3704 = vmatprep.subr.bf16.mxu1 %v3867_v63 }
 0x31f   : > { %3705 = vmatpush3.bf16.msra.mxu1 %v3867_v63 }
 0x3bd   : > { %v3616_v1 = vpop.f32.mrb[16].mxu1 }
 0x3be   : > { %v1621_v2 = vadd.f32 %v3616_v1, %v3196_v0  ;;  %v1612_v3 = vpop.f32.mrb[17].mxu1  ;;  %v3857_v1 = vld [vmem:[%s4347_s1 + $0x18] sm:$0xff]  }
 0x3bf   : > { %v1613_v4 = vadd.f32 %v3196_v0, %v1612_v3  ;;  %v3617_v5 = vpop.f32.mrb[18].mxu1  ;;  %v3860_v3 = vld [vmem:[%s4347_s1 + $0x30] sm:$0xff]  }
 0x3c0   : > { %v1624_v6 = vadd.f32 %v3617_v5, %v3196_v0  ;;  %v1615_v7 = vpop.f32.mrb[19].mxu1  ;;  %v1645_v9 = vmax.f32 %v1621_v2, 0.0  ;;  %v3859_v2 = vld [vmem:[%s4347_s1 + $0x28] sm:$0xff]   ;;  %v3868_v5 = vld [vmem:[%s4348_s2 + $0x30] sm:$0xff]  }
 0x3c1   : > { %v1616_v8 = vadd.f32 %v3196_v0, %v1615_v7  ;;  %v1643_v11 = vmax.f32 %v1613_v4, 0.0  ;;  %v3861_v4 = vld [vmem:[%s4347_s1 + $0x38] sm:$0xff]   ;;  %3706 = vmatprep.subr.bf16.mxu1 %v3868_v5  ;;  %v3227_v7 = vld [vmem:[%s4352_s22] ss:$0 sm:$0xff] }
 0x3c2   : > { %v1646_v10 = vmax.f32 %v1624_v6, 0.0  ;;  %3707 = vmatpush3.bf16.msra.mxu1 %v3868_v5  ;;  %v3869_v6 = vld [vmem:[%s4348_s2 + $0x38] sm:$0xff]  }
 0x3c3   : > { %v1644_v12 = vmax.f32 %v1616_v8, 0.0  ;;  %3708 = vmatprep.subr.bf16.mxu1 %v3869_v6 }
 0x3c4   : > { %v3350_v13 = vpack.c.bf16 %v1646_v10, %v1645_v9 }
 0x3c5   : > { %v3345_v16 = vpack.c.bf16 %v1644_v12, %v1643_v11  ;;  %v3620_v17 = vpop.f32.mrb[20].mxu1 }
 0x3c6   : > { %3405 = vst [vmem:[%s990_s0 + $0x8] sm:$0xff] %v3350_v13   ;;  %v1637_v18 = vadd.f32 %v3620_v17, %v3196_v0  ;;  %v1628_v19 = vpop.f32.mrb[21].mxu1  ;;  %3709 = vmatpush3.bf16.msra.mxu1 %v3869_v6 }
 0x3c7   : > { %3346 = vst [vmem:[%s990_s0] sm:$0xff] %v3345_v16   ;;  %v1629_v20 = vadd.f32 %v3196_v0, %v1628_v19  ;;  %v3621_v21 = vpop.f32.mrb[22].mxu1 }
 0x3c8   : > { %v1649_v22 = vmax.f32 %v1637_v18, 0.0  ;;  %v1640_v23 = vadd.f32 %v3621_v21, %v3196_v0  ;;  %v1631_v24 = vpop.f32.mrb[23].mxu1 }
 0x3c9   : > { %v1647_v25 = vmax.f32 %v1629_v20, 0.0  ;;  %v1632_v26 = vadd.f32 %v3196_v0, %v1631_v24 }
 0x3ca   : > { %v1650_v27 = vmax.f32 %v1640_v23, 0.0 }
 0x3cb   : > { %v1648_v28 = vmax.f32 %v1632_v26, 0.0 }
 0x3cc   : > { %v3360_v29 = vpack.c.bf16 %v1650_v27, %v1649_v22 }
 0x3cd   : > { %v3355_v32 = vpack.c.bf16 %v1648_v28, %v1647_v25 }
 0x3ce   : > { %3407 = vst [vmem:[%s990_s0 + $0x18] sm:$0xff] %v3360_v29  }
 0x3cf   : > { %3406 = vst [vmem:[%s990_s0 + $0x10] sm:$0xff] %v3355_v32   ;;  %s4354_s0 = sld [smem:[#allocation12_spill]] }
 0x3dd   : > { %v3664_v34 = vpop.f32.mrb[24].mxu1 }
 0x3de   : > { %v1937_v35 = vadd.f32 %v3664_v34, %v3218_v33  ;;  %v1928_v36 = vpop.f32.mrb[25].mxu1 }
 0x3df   : > { %v1929_v37 = vadd.f32 %v3218_v33, %v1928_v36  ;;  %v3665_v38 = vpop.f32.mrb[26].mxu1  ;;  %v4265_v36 = vld [vmem:[%s4353_s4] ss:$0 sm:$0xff] }
 0x3e0   : > { %v1961_v39 = vmax.f32 %v1937_v35, 0.0  ;;  %v1940_v40 = vadd.f32 %v3665_v38, %v3218_v33  ;;  %v1931_v41 = vpop.f32.mrb[27].mxu1 }
 0x3e1   : > { %v1959_v42 = vmax.f32 %v1929_v37, 0.0  ;;  %v1932_v43 = vadd.f32 %v3218_v33, %v1931_v41 }
 0x3e2   : > { %2627 = vst [vmem:[%s4231_s18 + $0x10] sm:$0xff] %v1961_v39  ;;  %v1962_v44 = vmax.f32 %v1940_v40, 0.0 }
 0x3e3   : > { %2625 = vst [vmem:[%s4231_s18] sm:$0xff] %v1959_v42  ;;  %v1960_v45 = vmax.f32 %v1932_v43, 0.0 }
 0x3e4   : > { %v1968_v46 = vpack.c.bf16 %v1962_v44, %v1961_v39  ;;  %2628 = vst [vmem:[%s4231_s18 + $0x18] sm:$0xff] %v1962_v44 }
 0x3e5   : > { %v1967_v47 = vpack.c.bf16 %v1960_v45, %v1959_v42  ;;  %2626 = vst [vmem:[%s4231_s18 + $0x8] sm:$0xff] %v1960_v45  ;;  %v3668_v48 = vpop.f32.mrb[28].mxu1  ;;  %v4270_v42 = vld [vmem:[%s4354_s0] ss:$0 sm:$0xff] }
 0x3e6   : > { %3408 = vst [vmem:[%s4237_s23 + $0x8] sm:$0xff] %v1968_v46   ;;  %v1953_v49 = vadd.f32 %v3668_v48, %v3218_v33  ;;  %v1944_v50 = vpop.f32.mrb[29].mxu1 }
 0x3e7   : > { %3366 = vst [vmem:[%s4237_s23] sm:$0xff] %v1967_v47   ;;  %v1945_v52 = vadd.f32 %v3218_v33, %v1944_v50  ;;  %v3669_v53 = vpop.f32.mrb[30].mxu1  ;;  %3686 = vmatprep.mubr.bf16.mxu0 %v1967_v47 }
 0x3e8   : > { %v1965_v54 = vmax.f32 %v1953_v49, 0.0  ;;  %v1956_v55 = vadd.f32 %v3669_v53, %v3218_v33  ;;  %v1947_v56 = vpop.f32.mrb[31].mxu1  ;;  %3687 = vmatmul.mubr.bf16.vlgmr.msra.gmra.mrb[16].mxu0 %v1968_v46 }
 0x3e9   : > { %v1963_v58 = vmax.f32 %v1945_v52, 0.0  ;;  %v1948_v59 = vadd.f32 %v3218_v33, %v1947_v56  ;;  %3719 = vmatpush3.bf16.msra.mxu0 %v4216_v57  ;;  %v3858_v57 = vld [vmem:[%s4347_s1 + $0x20] sm:$0xff]  }
 0x3ea   : > { %2631 = vst [vmem:[%s4231_s18 + $0x30] sm:$0xff] %v1965_v54  ;;  %v1966_v60 = vmax.f32 %v1956_v55, 0.0  ;;  %3720 = vmatprep.subr.bf16.mxu0 %v3855_v51 }
 0x3eb   : > { %2629 = vst [vmem:[%s4231_s18 + $0x20] sm:$0xff] %v1963_v58  ;;  %v1964_v62 = vmax.f32 %v1948_v59, 0.0 }
 0x3ec   : > { %v1970_v63 = vpack.c.bf16 %v1966_v60, %v1965_v54  ;;  %2632 = vst [vmem:[%s4231_s18 + $0x38] sm:$0xff] %v1966_v60 }
 0x3ed   : > { %v1969_v0 = vpack.c.bf16 %v1964_v62, %v1963_v58  ;;  %2630 = vst [vmem:[%s4231_s18 + $0x28] sm:$0xff] %v1964_v62  ;;  %3721 = vmatpush3.bf16.msra.mxu0 %v3855_v51  ;;  %s1020_s18 = scalar_lea.vmem %s4091_s10, %s4146_s15 }
 0x3ee   : > { %3410 = vst [vmem:[%s4237_s23 + $0x18] sm:$0xff] %v1970_v63   ;;  %3722 = vmatprep.subr.bf16.mxu0 %v3856_v61 }
 0x3ef   : > { %3409 = vst [vmem:[%s4237_s23 + $0x10] sm:$0xff] %v1969_v0   ;;  %3690 = vmatprep.mubr.bf16.mxu0 %v1969_v0 }
 0x3f0   : > { %3691 = vmatmul.mubr.bf16.gmra.mrb[20].mxu0 %v1970_v63 }
 0x3f1   : > { %3723 = vmatpush3.bf16.msra.mxu0 %v3856_v61  ;;  %3734 = vmatprep.mubr.bf16.mxu0 %v1967_v47 }
 0x3f2   : > { %3724 = vmatprep.subr.bf16.mxu0 %v3857_v1 }
 0x3f5   : > { %3725 = vmatpush3.bf16.msra.mxu0 %v3857_v1 }
 0x3f6   : > { %3726 = vmatprep.subr.bf16.mxu0 %v3858_v57 }
 0x3f9   : > { %3727 = vmatpush3.bf16.msra.mxu0 %v3858_v57 }
 0x3fa   : > { %3728 = vmatprep.subr.bf16.mxu0 %v3859_v2 }
 0x3fd   : > { %3729 = vmatpush3.bf16.msra.mxu0 %v3859_v2 }
 0x3fe   : > { %3730 = vmatprep.subr.bf16.mxu0 %v3860_v3 }
 0x401   : > { %3731 = vmatpush3.bf16.msra.mxu0 %v3860_v3 }
 0x402   : > { %3732 = vmatprep.subr.bf16.mxu0 %v3861_v4 }
 0x405   : > { %3733 = vmatpush3.bf16.msra.mxu0 %v3861_v4 }
 0x408   : > { %3735 = vmatmul.mubr.bf16.vlgmr.msra.gmra.mrb[24].mxu0 %v1968_v46 }
 0x409   : > { %3738 = vmatprep.mubr.bf16.mxu0 %v1969_v0 }
 0x410   : > { %3739 = vmatmul.mubr.bf16.gmra.mrb[28].mxu0 %v1970_v63 }
 0x411   : > { %3742 = vmatprep.mubr.bf16.mxu0 %v4161_v15 }
 0x418   : > { %3743 = vmatmul.mubr.bf16.gmra.mrb[32].mxu0 %v4158_v14 }
 0x419   : > { %3746 = vmatprep.mubr.bf16.mxu0 %v4177_v31 }
 0x420   : > { %3747 = vmatmul.mubr.bf16.gmra.mrb[36].mxu0 %v4174_v30 }
 0x4bb   : > { %v3688_v8 = vpop.f32.mrb[16].mxu0 }
 0x4bc   : > { %v2085_v9 = vadd.f32 %v3688_v8, %v3227_v7  ;;  %v2076_v10 = vpop.f32.mrb[17].mxu0 }
 0x4bd   : > { %v2077_v11 = vadd.f32 %v3227_v7, %v2076_v10  ;;  %v3689_v12 = vpop.f32.mrb[18].mxu0 }
 0x4be   : > { %v2088_v13 = vadd.f32 %v3689_v12, %v3227_v7  ;;  %v2079_v15 = vpop.f32.mrb[19].mxu0  ;;  %v2109_v14 = vmax.f32 %v2085_v9, 0.0 }
 0x4bf   : > { %v2080_v16 = vadd.f32 %v3227_v7, %v2079_v15  ;;  %v2107_v31 = vmax.f32 %v2077_v11, 0.0 }
 0x4c0   : > { %v2110_v17 = vmax.f32 %v2088_v13, 0.0 }
 0x4c1   : > { %v2108_v18 = vmax.f32 %v2080_v16, 0.0 }
 0x4c2   : > { %v2116_v30 = vpack.c.bf16 %v2110_v17, %v2109_v14 }
 0x4c3   : > { %v2115_v19 = vpack.c.bf16 %v2108_v18, %v2107_v31  ;;  %v3692_v20 = vpop.f32.mrb[20].mxu0 }
 0x4c4   : > { %v2101_v21 = vadd.f32 %v3692_v20, %v3227_v7  ;;  %v2092_v22 = vpop.f32.mrb[21].mxu0 }
 0x4c5   : > { %v2093_v23 = vadd.f32 %v3227_v7, %v2092_v22  ;;  %v3693_v24 = vpop.f32.mrb[22].mxu0  ;;  %3710 = vmatprep.mubr.bf16.mxu1 %v2115_v19 }
 0x4c6   : > { %v2113_v25 = vmax.f32 %v2101_v21, 0.0  ;;  %v2104_v26 = vadd.f32 %v3693_v24, %v3227_v7  ;;  %v2095_v27 = vpop.f32.mrb[23].mxu0  ;;  %3711 = vmatmul.mubr.bf16.vlgmr.msra.gmra.mrb[32].mxu1 %v2116_v30 }
 0x4c7   : > { %v2111_v28 = vmax.f32 %v2093_v23, 0.0  ;;  %v2096_v29 = vadd.f32 %v3227_v7, %v2095_v27 }
 0x4c8   : > { %v2114_v32 = vmax.f32 %v2104_v26, 0.0 }
 0x4c9   : > { %v2112_v33 = vmax.f32 %v2096_v29, 0.0 }
 0x4ca   : > { %v2118_v34 = vpack.c.bf16 %v2114_v32, %v2113_v25 }
 0x4cb   : > { %v2117_v35 = vpack.c.bf16 %v2112_v33, %v2111_v28 }
 0x4cd   : > { %3714 = vmatprep.mubr.bf16.mxu1 %v2117_v35 }
 0x4ce   : > { %3715 = vmatmul.mubr.bf16.gmra.mrb[36].mxu1 %v2118_v34 }
 0x4db   : > { %v3736_v37 = vpop.f32.mrb[24].mxu0 }
 0x4dc   : > { %v2377_v38 = vadd.f32 %v3736_v37, %v4265_v36  ;;  %v2368_v39 = vpop.f32.mrb[25].mxu0  ;;  %v3939_v37 = vmov 0  }
 0x4dd   : > { %v2369_v40 = vadd.f32 %v4265_v36, %v2368_v39  ;;  %v3737_v41 = vpop.f32.mrb[26].mxu0  ;;  %3788 = vset.pattern.permute.xlu1 %v3939_v37  ;;  %3789 = vset.pattern.permute.xlu0 %v3939_v37 }
 0x4de   : > { %v2433_v43 = vmax.f32 %v2377_v38, 0.0  ;;  %v2380_v44 = vadd.f32 %v3737_v41, %v4265_v36  ;;  %v2371_v45 = vpop.f32.mrb[27].mxu0 }
 0x4df   : > { %v2431_v46 = vmax.f32 %v2369_v40, 0.0  ;;  %v2372_v47 = vadd.f32 %v4265_v36, %v2371_v45 }
 0x4e0   : > { %v2434_v48 = vmax.f32 %v2380_v44, 0.0  ;;  %v2456_v49 = vmul.f32 %v4270_v42, %v2433_v43 }
 0x4e1   : > { %v2432_v50 = vmax.f32 %v2372_v47, 0.0  ;;  %v2454_v51 = vmul.f32 %v4270_v42, %v2431_v46 }
 0x4e2   : > { %2474 = vadd.xlane.f32.xlu1 %v2456_v49  ;;  %v2457_v55 = vmul.f32 %v4270_v42, %v2434_v48 }
 0x4e3   : > { %v3740_v52 = vpop.f32.mrb[28].mxu0  ;;  %2470 = vadd.xlane.f32.xlu0 %v2454_v51  ;;  %v2455_v59 = vmul.f32 %v4270_v42, %v2432_v50 }
 0x4e4   : > { %v2393_v53 = vadd.f32 %v3740_v52, %v4265_v36  ;;  %v2384_v54 = vpop.f32.mrb[29].mxu0 }
 0x4e5   : > { %v2385_v56 = vadd.f32 %v4265_v36, %v2384_v54  ;;  %v3741_v58 = vpop.f32.mrb[30].mxu0 }
 0x4e6   : > { %v2437_v60 = vmax.f32 %v2393_v53, 0.0  ;;  %v2396_v61 = vadd.f32 %v3741_v58, %v4265_v36  ;;  %2476 = vadd.xlane.f32.xlu1 %v2457_v55  ;;  %v2387_v62 = vpop.f32.mrb[31].mxu0 }
 0x4e7   : > { %v2388_v63 = vadd.f32 %v4265_v36, %v2387_v62  ;;  %2472 = vadd.xlane.f32.xlu0 %v2455_v59  ;;  %v2435_v57 = vmax.f32 %v2385_v56, 0.0 }
 0x4e8   : > { %v2438_v0 = vmax.f32 %v2396_v61, 0.0  ;;  %v2460_v1 = vmul.f32 %v4270_v42, %v2437_v60 }
 0x4e9   : > { %v2436_v2 = vmax.f32 %v2388_v63, 0.0  ;;  %v2458_v9 = vmul.f32 %v4270_v42, %v2435_v57 }
 0x4ea   : > { %v2461_v3 = vmul.f32 %v4270_v42, %v2438_v0 }
 0x4eb   : > { %v3744_v4 = vpop.f32.mrb[32].mxu0  ;;  %2482 = vadd.xlane.f32.xlu0 %v2460_v1  ;;  %v2459_v13 = vmul.f32 %v4270_v42, %v2436_v2 }
 0x4ec   : > { %v2409_v5 = vadd.f32 %v3744_v4, %v4265_v36  ;;  %2484 = vadd.xlane.f32.xlu1 %v2461_v3  ;;  %v2400_v6 = vpop.f32.mrb[33].mxu0 }
 0x4ed   : > { %v2401_v7 = vadd.f32 %v4265_v36, %v2400_v6  ;;  %v3745_v8 = vpop.f32.mrb[34].mxu0 }
 0x4ee   : > { %v2441_v10 = vmax.f32 %v2409_v5, 0.0  ;;  %v2412_v11 = vadd.f32 %v3745_v8, %v4265_v36  ;;  %v2403_v12 = vpop.f32.mrb[35].mxu0 }
 0x4ef   : > { %v2404_v15 = vadd.f32 %v4265_v36, %v2403_v12  ;;  %2478 = vadd.xlane.f32.xlu0 %v2458_v9  ;;  %v2439_v17 = vmax.f32 %v2401_v7, 0.0 }
 0x4f0   : > { %v2442_v16 = vmax.f32 %v2412_v11, 0.0  ;;  %2480 = vadd.xlane.f32.xlu1 %v2459_v13  ;;  %v2464_v14 = vmul.f32 %v4270_v42, %v2441_v10 }
 0x4f1   : > { %v2440_v31 = vmax.f32 %v2404_v15, 0.0  ;;  %v2462_v23 = vmul.f32 %v4270_v42, %v2439_v17 }
 0x4f2   : > { %v2465_v18 = vmul.f32 %v4270_v42, %v2442_v16 }
 0x4f3   : > { %v3748_v30 = vpop.f32.mrb[36].mxu0  ;;  %2490 = vadd.xlane.f32.xlu0 %v2464_v14  ;;  %v2463_v25 = vmul.f32 %v4270_v42, %v2440_v31 }
 0x4f4   : > { %v2416_v19 = vpop.f32.mrb[37].mxu0  ;;  %2492 = vadd.xlane.f32.xlu1 %v2465_v18  ;;  %v2425_v20 = vadd.f32 %v3748_v30, %v4265_v36  ;;  %v3236_v18 = vld [vmem:[%s4355_s11] ss:$0 sm:$0xff] }
 0x4f5   : > { %v2417_v21 = vadd.f32 %v4265_v36, %v2416_v19  ;;  %v3749_v22 = vpop.f32.mrb[38].mxu0 }
 0x4f6   : > { %v2419_v24 = vpop.f32.mrb[39].mxu0  ;;  %v2428_v27 = vadd.f32 %v3749_v22, %v4265_v36  ;;  %v2445_v29 = vmax.f32 %v2425_v20, 0.0 }
 0x4f7   : > { %v2443_v26 = vmax.f32 %v2417_v21, 0.0  ;;  %v2420_v28 = vadd.f32 %v4265_v36, %v2419_v24  ;;  %2486 = vadd.xlane.f32.xlu0 %v2462_v23  ;;  %v4302_v36 = vld [vmem:[#allocation2] ss:$0 sm:$0xff] }
 0x4f8   : > { %2488 = vadd.xlane.f32.xlu1 %v2463_v25  ;;  %v2446_v34 = vmax.f32 %v2428_v27, 0.0  ;;  %v2468_v38 = vmul.f32 %v4270_v42, %v2445_v29 }
 0x4f9   : > { %v2444_v32 = vmax.f32 %v2420_v28, 0.0  ;;  %v2466_v33 = vmul.f32 %v4270_v42, %v2443_v26 }
 0x4fa   : > { %v2469_v39 = vmul.f32 %v4270_v42, %v2446_v34 }
 0x4fb   : > { %2494 = vadd.xlane.f32.xlu0 %v2466_v33  ;;  %v2467_v35 = vmul.f32 %v4270_v42, %v2444_v32 }
 0x4fd   : > { %2496 = vadd.xlane.f32.xlu1 %v2467_v35 }
 0x4ff   : > { %2498 = vadd.xlane.f32.xlu0 %v2468_v38 }
 0x501   : > { %2500 = vadd.xlane.f32.xlu1 %v2469_v39 }
 0x56f   : > { %v2475_v40 = vpop.xlane.xlu1 %2474 }
 0x570   : > { %v2511_v41 = vadd.f32 %v4302_v36, %v2475_v40  ;;  %v2471_v43 = vpop.xlane.xlu0 %2470 }
 0x571   : > { %v2509_v44 = vadd.f32 %v4302_v36, %v2471_v43 }
 0x572   : > { %3870 = vtanh.f32 %v2511_v41 }
 0x573   : > { %3872 = vtanh.f32 %v2509_v44  ;;  %v2477_v45 = vpop.xlane.xlu1 %2476 }
 0x574   : > { %v2512_v46 = vadd.f32 %v4302_v36, %v2477_v45  ;;  %v2473_v47 = vpop.xlane.xlu0 %2472 }
 0x575   : > { %v2510_v48 = vadd.f32 %v4302_v36, %v2473_v47 }
 0x576   : > { %3874 = vtanh.f32 %v2512_v46 }
 0x577   : > { %3876 = vtanh.f32 %v2510_v48 }
 0x578   : > { %v2483_v49 = vpop.xlane.xlu0 %2482 }
 0x579   : > { %v2485_v42 = vpop.xlane.xlu1 %2484  ;;  %v2515_v50 = vadd.f32 %v4302_v36, %v2483_v49 }
 0x57a   : > { %v2516_v60 = vadd.f32 %v4302_v36, %v2485_v42 }
 0x57b   : > { %3878 = vtanh.f32 %v2515_v50 }
 0x57c   : > { %v3871_v51 = vpop.eup %3870  ;;  %v2479_v52 = vpop.xlane.xlu0 %2478 }
 0x57d   : > { %v3873_v53 = vpop.eup %3872  ;;  %2721 = vperm.xlu1 %3788, %v3871_v51   ;;  %v2481_v54 = vpop.xlane.xlu1 %2480  ;;  %v2513_v55 = vadd.f32 %v4302_v36, %v2479_v52 }
 0x57e   : > { %2711 = vperm.xlu0 %3789, %v3873_v53   ;;  %v2514_v0 = vadd.f32 %v4302_v36, %v2481_v54 }
 0x57f   : > { %3880 = vtanh.f32 %v2513_v55 }
 0x580   : > { %v3875_v56 = vpop.eup %3874  ;;  %v2491_v58 = vpop.xlane.xlu0 %2490 }
 0x581   : > { %2726 = vperm.xlu1 %3788, %v3875_v56   ;;  %v2493_v59 = vpop.xlane.xlu1 %2492  ;;  %v3877_v62 = vpop.eup %3876  ;;  %v2519_v3 = vadd.f32 %v4302_v36, %v2491_v58 }
 0x582   : > { %v2520_v61 = vadd.f32 %v4302_v36, %v2493_v59 }
 0x584   : > { %3882 = vtanh.f32 %v2520_v61  ;;  %v2487_v57 = vpop.xlane.xlu0 %2486 }
 0x585   : > { %v2489_v63 = vpop.xlane.xlu1 %2488  ;;  %2716 = vperm.xlu1 %3788, %v3877_v62   ;;  %3884 = vtanh.f32 %v2516_v60  ;;  %v3879_v2 = vpop.eup %3878  ;;  %v2517_v9 = vadd.f32 %v4302_v36, %v2487_v57 }
 0x586   : > { %v2518_v1 = vadd.f32 %v4302_v36, %v2489_v63 }
 0x588   : > { %3886 = vtanh.f32 %v2518_v1  ;;  %v2495_v7 = vpop.xlane.xlu0 %2494 }
 0x589   : > { %2741 = vperm.xlu1 %3788, %v3879_v2   ;;  %3888 = vtanh.f32 %v2514_v0  ;;  %v3881_v6 = vpop.eup %3880  ;;  %v2521_v15 = vadd.f32 %v4302_v36, %v2495_v7 }
 0x58a   : > { %v2497_v4 = vpop.xlane.xlu1 %2496 }
 0x58b   : > { %v2522_v5 = vadd.f32 %v4302_v36, %v2497_v4 }
 0x58c   : > { %v2499_v16 = vpop.xlane.xlu0 %2498 }
 0x58d   : > { %3890 = vtanh.f32 %v2522_v5  ;;  %2731 = vperm.xlu1 %3788, %v3881_v6   ;;  %v2523_v17 = vadd.f32 %v4302_v36, %v2499_v16 }
 0x58e   : > { %v3883_v8 = vpop.eup %3882  ;;  %3892 = vtanh.f32 %v2519_v3  ;;  %v2501_v10 = vpop.xlane.xlu1 %2500 }
 0x58f   : > { %v2524_v11 = vadd.f32 %v4302_v36, %v2501_v10  ;;  %2774 = vperm.xlu0 %3789, %v3883_v8   ;;  %v3885_v12 = vpop.eup %3884 }
 0x591   : > { %3894 = vtanh.f32 %v2524_v11  ;;  %2746 = vperm.xlu1 %3788, %v3885_v12  }
 0x592   : > { %v3887_v13 = vpop.eup %3886  ;;  %3896 = vtanh.f32 %v2517_v9 }
 0x593   : > { %2764 = vperm.xlu0 %3789, %v3887_v13   ;;  %v3889_v14 = vpop.eup %3888  ;;  %3898 = vtanh.f32 %v2521_v15 }
 0x594   : > { %3900 = vtanh.f32 %v2523_v17 }
 0x595   : > { %2736 = vperm.xlu1 %3788, %v3889_v14  }
 0x597   : > { %v3891_v31 = vpop.eup %3890 }
 0x598   : > { %v3893_v30 = vpop.eup %3892  ;;  %2784 = vperm.xlu0 %3789, %v3891_v31  }
 0x599   : > { %2769 = vperm.xlu1 %3788, %v3893_v30   ;;  %v3712_v19 = vpop.f32.mrb[32].mxu1 }
 0x59a   : > { %v2233_v20 = vadd.f32 %v3712_v19, %v3236_v18  ;;  %v2224_v21 = vpop.f32.mrb[33].mxu1 }
 0x59b   : > { %v3895_v22 = vpop.eup %3894  ;;  %v2225_v23 = vadd.f32 %v3236_v18, %v2224_v21  ;;  %v3713_v24 = vpop.f32.mrb[34].mxu1 }
 0x59c   : > { %v3897_v25 = vpop.eup %3896  ;;  %2794 = vperm.xlu0 %3789, %v3895_v22   ;;  %v2236_v26 = vadd.f32 %v3713_v24, %v3236_v18  ;;  %v2227_v27 = vpop.f32.mrb[35].mxu1  ;;  %v2257_v29 = vmax.f32 %v2233_v20, 0.0 }
 0x59d   : > { %2759 = vperm.xlu1 %3788, %v3897_v25   ;;  %v2228_v28 = vadd.f32 %v3236_v18, %v2227_v27  ;;  %v2255_v33 = vmax.f32 %v2225_v23, 0.0  ;;  %v3899_v35 = vpop.eup %3898 }
 0x59e   : > { %v2258_v32 = vmax.f32 %v2236_v26, 0.0  ;;  %v3901_v44 = vpop.eup %3900 }
 0x59f   : > { %v2256_v34 = vmax.f32 %v2228_v28, 0.0 }
 0x5a0   : > { %v3390_v37 = vpack.c.bf16 %v2258_v32, %v2257_v29 }
 0x5a1   : > { %v3385_v38 = vpack.c.bf16 %v2256_v34, %v2255_v33  ;;  %2779 = vperm.xlu1 %3788, %v3899_v35   ;;  %v3716_v39 = vpop.f32.mrb[36].mxu1 }
 0x5a2   : > { %3411 = vst [vmem:[%s1008_s16 + $0x8] sm:$0xff] %v3390_v37   ;;  %v2249_v36 = vadd.f32 %v3716_v39, %v3236_v18  ;;  %v2240_v40 = vpop.f32.mrb[37].mxu1 }
 0x5a3   : > { %3386 = vst [vmem:[%s1008_s16] sm:$0xff] %v3385_v38   ;;  %v2241_v41 = vadd.f32 %v3236_v18, %v2240_v40  ;;  %v3717_v43 = vpop.f32.mrb[38].mxu1 }
 0x5a4   : > { %v2261_v45 = vmax.f32 %v2249_v36, 0.0  ;;  %v2252_v46 = vadd.f32 %v3717_v43, %v3236_v18  ;;  %v2243_v47 = vpop.f32.mrb[39].mxu1 }
 0x5a5   : > { %v2259_v48 = vmax.f32 %v2241_v41, 0.0  ;;  %2789 = vperm.xlu1 %3788, %v3901_v44   ;;  %v2244_v49 = vadd.f32 %v3236_v18, %v2243_v47 }
 0x5a6   : > { %v2262_v42 = vmax.f32 %v2252_v46, 0.0 }
 0x5a7   : > { %v2260_v50 = vmax.f32 %v2244_v49, 0.0 }
 0x5a8   : > { %v3400_v51 = vpack.c.bf16 %v2262_v42, %v2261_v45 }
 0x5a9   : > { %v3395_v52 = vpack.c.bf16 %v2260_v50, %v2259_v48 }
 0x5aa   : > { %3413 = vst [vmem:[%s1008_s16 + $0x18] sm:$0xff] %v3400_v51  }
 0x5ab   : > { %3412 = vst [vmem:[%s1008_s16 + $0x10] sm:$0xff] %v3395_v52  }
 0x5fc   : > { %v2722_v53 = vpop.permute.xlu1 %2721 }
 0x5fd   : > { %2751 = vst [vmem:[%s1014_s6 + $0x10] sm:$0xff] %v2722_v53  ;;  %v2712_v54 = vpop.permute.xlu0 %2711 }
 0x5fe   : > { %2749 = vst [vmem:[%s1014_s6] sm:$0xff] %v2712_v54 }
 0x600   : > { %v2727_v55 = vpop.permute.xlu1 %2726 }
 0x601   : > { %2752 = vst [vmem:[%s1014_s6 + $0x18] sm:$0xff] %v2727_v55 }
 0x604   : > { %v2717_v56 = vpop.permute.xlu1 %2716 }
 0x605   : > { %2750 = vst [vmem:[%s1014_s6 + $0x8] sm:$0xff] %v2717_v56 }
 0x608   : > { %v2742_v58 = vpop.permute.xlu1 %2741 }
 0x609   : > { %2755 = vst [vmem:[%s1014_s6 + $0x30] sm:$0xff] %v2742_v58 }
 0x60c   : > { %v2732_v59 = vpop.permute.xlu1 %2731 }
 0x60d   : > { %2753 = vst [vmem:[%s1014_s6 + $0x20] sm:$0xff] %v2732_v59 }
 0x60e   : > { %v2775_v60 = vpop.permute.xlu0 %2774 }
 0x60f   : > { %2800 = vst [vmem:[%s1020_s18 + $0x18] sm:$0xff] %v2775_v60 }
 0x610   : > { %v2747_v61 = vpop.permute.xlu1 %2746 }
 0x611   : > { %2756 = vst [vmem:[%s1014_s6 + $0x38] sm:$0xff] %v2747_v61 }
 0x612   : > { %v2765_v62 = vpop.permute.xlu0 %2764 }
 0x613   : > { %2798 = vst [vmem:[%s1020_s18 + $0x8] sm:$0xff] %v2765_v62 }
 0x614   : > { %v2737_v63 = vpop.permute.xlu1 %2736 }
 0x615   : > { %2754 = vst [vmem:[%s1014_s6 + $0x28] sm:$0xff] %v2737_v63 }
 0x617   : > { %v2785_v0 = vpop.permute.xlu0 %2784 }
 0x618   : > { %2802 = vst [vmem:[%s1020_s18 + $0x28] sm:$0xff] %v2785_v0  ;;  %v2770_v1 = vpop.permute.xlu1 %2769 }
 0x619   : > { %2799 = vst [vmem:[%s1020_s18 + $0x10] sm:$0xff] %v2770_v1 }
 0x61b   : > { %v2795_v57 = vpop.permute.xlu0 %2794 }
 0x61c   : > { %2804 = vst [vmem:[%s1020_s18 + $0x38] sm:$0xff] %v2795_v57  ;;  %v2760_v2 = vpop.permute.xlu1 %2759 }
 0x61d   : > { %2797 = vst [vmem:[%s1020_s18] sm:$0xff] %v2760_v2 }
 0x620   : > { %v2780_v3 = vpop.permute.xlu1 %2779 }
 0x621   : > { %2801 = vst [vmem:[%s1020_s18 + $0x20] sm:$0xff] %v2780_v3 }
 0x624   : > { %v2790_v4 = vpop.permute.xlu1 %2789 }
 0x625   : > { %2803 = vst [vmem:[%s1020_s18 + $0x30] sm:$0xff] %v2790_v4 }
 0x626 PF: > { %s72_s7 = sadd.s32 1, %s3908_s7  }
 0x627   : > { %p69_p4 = scmp.ge.s32.totalorder %s72_s7, 4  }
 0x629   :  { %71 = sbr.rel (!%p69_p4) target bundleno = 43 (0x2b), region = 254 }

</bundles_post_ra>
